<compile_context>
chip_gen: v5e
topology: v5e:2x2
jax: 0.10.0
libtpu: 0.0.40
codegen_flags: <defaults>
</compile_context>

<pallas_src>
import functools
import math

import jax
import jax.numpy as jnp
from jax.experimental import pallas as pl
from jax.experimental.pallas import tpu as pltpu


# ----------------------------- kernel helpers ------------------------------

def _elu(x):
    # torch.nn.ELU(alpha=1.0)
    return jnp.where(x > 0.0, x, jnp.exp(jnp.minimum(x, 0.0)) - 1.0)


def _sigmoid(x):
    # exp on the EUP + approx reciprocal (EUP slot) -> no full-precision VPU divide
    return pl.reciprocal(1.0 + jnp.exp(-x), approx=True)


def _round_up(x, m):
    return ((x + m - 1) // m) * m


# --------------------------------- kernel ----------------------------------

def efin_kernel(F, FH,
                feat_ref,
                emb_exp_ref, stacked_eye_ref, rep_mat_ref,
                w_qkv_ref, b_qkv_ref, expand_q_ref, block_sum_ref,
                group_sum_ref, expand_w_ref,
                wc1_ref, bc1_ref,
                wa2_ref, ba2_ref, a1_ref, wa3_ref, awrep_ref,
                w2c_ref, w2u_ref, b2_ref, w3_ref, b3_ref, w4_ref, b4_ref,
                wh_ref, bh_ref,
                out_ref):
    f32 = jnp.float32
    bf16 = jnp.bfloat16
    feat = feat_ref[...]                                                     # (B, F)

    # x_rep in lane-concatenated layout: x_cat[b, f*hu+d] = feat[b,f] * emb[f,d]
    x_cat = jnp.dot(feat, emb_exp_ref[...], preferred_element_type=f32)      # (B, F*hu)

    # L2 norm over the feature axis (torch dim=1, keepdim) -> per hidden dim d
    sq = x_cat * x_cat
    nrm = jnp.dot(sq, stacked_eye_ref[...], preferred_element_type=f32)      # (B, hu)
    inv = jax.lax.rsqrt(nrm)                                                 # EUP
    inv_rep = jnp.dot(inv, rep_mat_ref[...], preferred_element_type=f32)     # (B, F*hu)
    xn = x_cat * inv_rep

    # ---- self attention ----
    # merged block-diagonal Q/K/V projection (Q pre-scaled by 1/sqrt(hu)); bf16 MXU
    qkv = jnp.dot(xn.astype(bf16), w_qkv_ref[...],
                  preferred_element_type=f32) + b_qkv_ref[...]               # (B, 3*F*hu)
    q_proj = qkv[:, :FH]
    k_proj = qkv[:, FH:2 * FH]
    v_proj = qkv[:, 2 * FH:]

    # (q, k, d) pair layout: QQ via one 0/1 block-repeat expansion matmul (MXU);
    # KK / VV via lane tiling (pure vreg copies, no matmul).
    qq = jnp.dot(q_proj.astype(bf16), expand_q_ref[...],
                 preferred_element_type=f32)                                 # (B, F*F*hu)
    kk = jnp.tile(k_proj, (1, F))                                            # (B, F*F*hu)
    vv = jnp.tile(v_proj, (1, F))                                            # (B, F*F*hu)

    # scores S[b, q*F+k] = <Q_q, K_k> / sqrt(hu)  (scale already folded into Q)
    s = jnp.dot((qq * kk).astype(bf16), block_sum_ref[...],
                preferred_element_type=f32)                                  # (B, F*F)
    # softmax(sigmoid(S)) over k; sigmoid in (0,1) so no max-subtraction needed
    e = jnp.exp(_sigmoid(s))
    den = jnp.dot(e, group_sum_ref[...], preferred_element_type=f32)         # per-q sums
    w = e * pl.reciprocal(den, approx=True)                                  # (B, F*F)

    # control first layer: attention k-collapse + (B,F*hu) reshape + Linear(F*hu->hc)
    # all folded into ONE K=F*F*hu matmul (bf16 operands).
    ww = jnp.dot(w.astype(bf16), expand_w_ref[...], preferred_element_type=f32)
    c1 = _elu(jnp.dot((ww * vv).astype(bf16), wc1_ref[...],
                      preferred_element_type=f32) + bc1_ref[...])            # (B, hc)

    # ---- interaction attention (uses the UN-normalized x_rep) ----
    a2 = _sigmoid(jnp.dot(x_cat.astype(bf16), wa2_ref[...],
                          preferred_element_type=f32) + ba2_ref[...])        # (B, F*hu)
    h = jnp.maximum(a1_ref[...] + a2, 0.0)                                   # (B, F*hu)
    sc = jnp.dot(h, wa3_ref[...], preferred_element_type=f32)                # (B, F)
    m = jnp.max(sc, axis=-1, keepdims=True)
    es = jnp.exp(sc - m)
    aden = jnp.sum(es, axis=-1, keepdims=True)
    aw = es * pl.reciprocal(aden, approx=True)                               # (B, F)
    aw_rep = jnp.dot(aw, awrep_ref[...], preferred_element_type=f32)         # (B, F*hu)
    xt = jnp.dot(aw_rep * x_cat, stacked_eye_ref[...],
                 preferred_element_type=f32)                                 # (B, hu)

    # ---- merged control/uplift towers on a lane-concatenated [c | u] slab ----
    # [c2|u1] built with two zero-padded projections (no in-kernel concat needed)
    z = _elu(jnp.dot(c1, w2c_ref[...], preferred_element_type=f32)
             + jnp.dot(xt, w2u_ref[...], preferred_element_type=f32)
             + b2_ref[...])                                                  # (B, hc+hu)
    z = _elu(jnp.dot(z, w3_ref[...], preferred_element_type=f32) + b3_ref[...])
    z = _elu(jnp.dot(z, w4_ref[...], preferred_element_type=f32) + b4_ref[...])

    # packed heads: [c_logit, c_tau, t_logit, u_tau] in one (B, 4) store
    out_ref[...] = jnp.dot(z, wh_ref[...], preferred_element_type=f32) + bh_ref[...]


# --------------------------- host-side weight prep ---------------------------

def pack_inputs(p, F, HU, HC):
    """Fold the per-feature / per-head structure into MXU-friendly matrices."""
    f32 = jnp.float32
    bf16 = jnp.bfloat16
    eyeF = jnp.eye(F, dtype=f32)
    eyeHU = jnp.eye(HU, dtype=f32)
    eyeFF = jnp.eye(F * F, dtype=f32)
    ones1F = jnp.ones((1, F), dtype=f32)
    scale = 1.0 / math.sqrt(float(HU))

    # x_cat[b, f*hu+d] = feat[b,f] * emb[f,d]
    emb_exp = (eyeF[:, :, None] * p['emb'][:, None, :]).reshape(F, F * HU)
    stacked_eye = jnp.tile(eyeHU, (F, 1))            # (F*hu, hu): sum over feature blocks
    rep_mat = jnp.tile(eyeHU, (1, F))                # (hu, F*hu): replicate across blocks

    # merged block-diagonal Q/K/V projection (1/sqrt(hu) folded into Q weights+bias)
    w_qkv = jnp.concatenate([jnp.kron(eyeF, p['wq'] * scale),
                             jnp.kron(eyeF, p['wk']),
                             jnp.kron(eyeF, p['wv'])], axis=1).astype(bf16)  # (F*hu, 3*F*hu)
    b_qkv = jnp.concatenate([jnp.tile(p['bq'] * scale, (1, F)),
                             jnp.tile(p['bk'], (1, F)),
                             jnp.tile(p['bv'], (1, F))], axis=1)             # (1, 3*F*hu)

    # 0/1 structure matrices (exact in bf16)
    expand_q = jnp.kron(eyeF, jnp.kron(ones1F, eyeHU)).astype(bf16)   # (F*hu, F*F*hu)
    block_sum = jnp.kron(eyeFF, jnp.ones((HU, 1), f32)).astype(bf16)  # (F*F*hu, F*F)
    group_sum = jnp.kron(eyeF, jnp.ones((F, F), f32))                 # (F*F, F*F)  f32
    expand_w = jnp.kron(eyeFF, jnp.ones((1, HU), f32)).astype(bf16)   # (F*F, F*F*hu)

    # first control layer with the k-collapse + (B, F*hu) reshape folded in
    wc1_big = jnp.broadcast_to(p['wc1'].reshape(F, 1, HU, HC),
                               (F, F, HU, HC)).reshape(F * F * HU, HC).astype(bf16)

    # interaction attention
    wa2_blk = jnp.kron(eyeF, p['wa2']).astype(bf16)                   # (F*hu, F*hu)
    ba2_rep = jnp.tile(p['ba2'], (1, F))
    a1 = jax.nn.sigmoid((p['wt'] + p['bt']) @ p['wa1'])               # (1, hu), batch-indep
    a1_rep = jnp.tile(a1, (1, F))                                     # (1, F*hu)
    wa3_stack = jnp.kron(eyeF, p['wa3'])                              # (F*hu, F)
    awrep = jnp.kron(eyeF, jnp.ones((1, HU), f32))                    # (F, F*hu)

    # merged control/uplift towers: block-diagonal layer fusion
    def bdiag(a, b):
        za = jnp.zeros((a.shape[0], b.shape[1]), f32)
        zb = jnp.zeros((b.shape[0], a.shape[1]), f32)
        return jnp.concatenate(
            [jnp.concatenate([a, za], axis=1),
             jnp.concatenate([zb, b], axis=1)], axis=0)

    # layer 2: [c1 | xt] -> [c2 | u1], built from two zero-padded projections
    w2c = jnp.concatenate([p['wc2'], jnp.zeros((HC, HU), f32)], axis=1)    # (hc, hc+hu)
    w2u = jnp.concatenate([jnp.zeros((HU, HC), f32), p['wu1']], axis=1)    # (hu, hc+hu)
    b2 = jnp.concatenate([p['bc2'], p['bu1']], axis=1)                     # (1, hc+hu)
    w3 = bdiag(p['wc3'], p['wu2']); b3 = jnp.concatenate([p['bc3'], p['bu2']], axis=1)
    w4 = bdiag(p['wc4'], p['wu3']); b4 = jnp.concatenate([p['bc4'], p['bu3']], axis=1)

    # fused output heads -> single packed (·, 4) projection [c_logit, c_tau, t_logit, u_tau]
    hc4, hu4 = HC // 4, HU // 4
    w_heads = jnp.zeros((hc4 + hu4, 4), f32)
    w_heads = w_heads.at[:hc4, 0:1].set(p['wcl'])
    w_heads = w_heads.at[:hc4, 1:2].set(p['wct'])
    w_heads = w_heads.at[hc4:, 2:3].set(p['wtl'])
    w_heads = w_heads.at[hc4:, 3:4].set(p['wut'])
    b_heads = jnp.concatenate([p['bcl'], p['bct'], p['btl'], p['but']], axis=1)  # (1, 4)

    return [emb_exp, stacked_eye, rep_mat,
            w_qkv, b_qkv, expand_q, block_sum, group_sum, expand_w,
            wc1_big, p['bc1'],
            wa2_blk, ba2_rep, a1_rep, wa3_stack, awrep,
            w2c, w2u, b2, w3, b3, w4, b4, w_heads, b_heads]


# ------------------------------- wrapper ------------------------------------

def efin_forward(features, is_treat, params, input_dim, hu_dim, hc_dim,
                 tile_b=256):
    del is_treat  # only used for shape in the torch model (t_rep uses ones_like)
    F, HU, HC = input_dim, hu_dim, hc_dim
    features = features.astype(jnp.float32)
    B = features.shape[0]

    packed = pack_inputs(params, F, HU, HC)

    # batch tiling (pad to a multiple of the tile; padded rows are ones -> no rsqrt(0))
    tb = min(tile_b, _round_up(B, 8))
    Bp = _round_up(B, tb)
    if Bp != B:
        pad = jnp.ones((Bp - B, F), jnp.float32)
        feat_p = jnp.concatenate([features, pad], axis=0)
    else:
        feat_p = features
    grid = (Bp // tb,)

    feat_spec = pl.BlockSpec((tb, F), lambda i: (i, 0))
    const_specs = [pl.BlockSpec(a.shape, lambda i: (0, 0)) for a in packed]
    out_spec = pl.BlockSpec((tb, 4), lambda i: (i, 0))

    out = pl.pallas_call(
        functools.partial(efin_kernel, F, F * HU),
        out_shape=jax.ShapeDtypeStruct((Bp, 4), jnp.float32),
        grid=grid,
        in_specs=[feat_spec] + const_specs,
        out_specs=out_spec,
        compiler_params=pltpu.CompilerParams(
            dimension_semantics=("parallel",),
            # keep below the 64 MiB per-TC VMEM on v7x; v5e/v6e (128 MiB) have headroom
            vmem_limit_bytes=56 * 1024 * 1024),
    )(feat_p, *packed)

    out = out[:B]
    c_logit = out[:, 0:1]
    c_tau = out[:, 1:2]
    t_logit = out[:, 2:3]
    u_tau = out[:, 3:4]

    c_prob = jax.nn.sigmoid(c_logit)
    t_prob = jax.nn.sigmoid(t_logit)
    return {
        'c_logit': c_logit, 'c_prob': c_prob, 'c_tau': c_tau,
        't_logit': t_logit, 't_prob': t_prob, 'u_tau': u_tau,
        'uc': c_logit, 'ut': c_logit + u_tau,            # detach has no fwd effect
        'uplift': t_prob - c_prob,
        'p_mu0': c_prob, 'p_mu1': t_prob,
        'mu0_logit': c_logit, 'mu1_logit': t_logit,
    }


# ------------------------------ parameters -----------------------------------

def init_params(key, input_dim, hc_dim, hu_dim):
    ks = iter(jax.random.split(key, 64))

    def w(shape, scale=0.1):
        return (scale * jax.random.normal(next(ks), shape)).astype(jnp.float32)

    p = {}
    p['emb'] = w((input_dim, hu_dim))
    # self-attention (weights pre-transposed: (in, out))
    p['wq'] = w((hu_dim, hu_dim)); p['bq'] = w((1, hu_dim), 0.01)
    p['wk'] = w((hu_dim, hu_dim)); p['bk'] = w((1, hu_dim), 0.01)
    p['wv'] = w((hu_dim, hu_dim)); p['bv'] = w((1, hu_dim), 0.01)
    # control net (version='3'): [F*hu->hc, hc->hc, hc->hc/2, hc/2->hc/4]
    p['wc1'] = w((input_dim * hu_dim, hc_dim)); p['bc1'] = w((1, hc_dim), 0.01)
    p['wc2'] = w((hc_dim, hc_dim));             p['bc2'] = w((1, hc_dim), 0.01)
    p['wc3'] = w((hc_dim, hc_dim // 2));        p['bc3'] = w((1, hc_dim // 2), 0.01)
    p['wc4'] = w((hc_dim // 2, hc_dim // 4));   p['bc4'] = w((1, hc_dim // 4), 0.01)
    p['wcl'] = w((hc_dim // 4, 1));             p['bcl'] = w((1, 1), 0.01)
    p['wct'] = w((hc_dim // 4, 1));             p['bct'] = w((1, 1), 0.01)
    # treatment rep Linear(1, hu)  (stored as (1, hu) so ones @ W == W row)
    p['wt'] = w((1, hu_dim)); p['bt'] = w((1, hu_dim), 0.01)
    # interaction attention
    p['wa1'] = w((hu_dim, hu_dim))                        # no bias
    p['wa2'] = w((hu_dim, hu_dim)); p['ba2'] = w((1, hu_dim), 0.01)
    p['wa3'] = w((hu_dim, 1))                             # no bias
    # uplift net (version='3'): [hu->hu, hu->hu/2, hu/2->hu/4]
    p['wu1'] = w((hu_dim, hu_dim));            p['bu1'] = w((1, hu_dim), 0.01)
    p['wu2'] = w((hu_dim, hu_dim // 2));       p['bu2'] = w((1, hu_dim // 2), 0.01)
    p['wu3'] = w((hu_dim // 2, hu_dim // 4));  p['bu3'] = w((1, hu_dim // 4), 0.01)
    p['wtl'] = w((hu_dim // 4, 1));            p['btl'] = w((1, 1), 0.01)
    p['wut'] = w((hu_dim // 4, 1));            p['but'] = w((1, 1), 0.01)
    return p


# ------------------------ pure-JAX reference (check) -------------------------

def efin_reference(features, params, input_dim, hu_dim):
    B = features.shape[0]
    emb = params['emb']
    x_rep = features[:, :, None] * emb[None, :, :]                   # (B, F, hu)
    norm = jnp.sqrt(jnp.sum(x_rep ** 2, axis=1, keepdims=True))
    xn = x_rep / norm
    Q = xn @ params['wq'] + params['bq']
    K = xn @ params['wk'] + params['bk']
    V = xn @ params['wv'] + params['bv']
    s = jnp.einsum('bqd,bkd->bqk', Q, K) / (hu_dim ** 0.5)
    w = jax.nn.softmax(jax.nn.sigmoid(s), axis=-1)
    xx = jnp.einsum('bqk,bkd->bqd', w, V)

    c = xx.reshape(B, input_dim * hu_dim)
    c = jax.nn.elu(c @ params['wc1'] + params['bc1'])
    c = jax.nn.elu(c @ params['wc2'] + params['bc2'])
    c = jax.nn.elu(c @ params['wc3'] + params['bc3'])
    c = jax.nn.elu(c @ params['wc4'] + params['bc4'])
    c_logit = c @ params['wcl'] + params['bcl']
    c_tau = c @ params['wct'] + params['bct']

    t_rep = jnp.ones((B, 1), jnp.float32) @ params['wt'] + params['bt']   # (B, hu)
    a1 = jax.nn.sigmoid(t_rep @ params['wa1'])
    scores = []
    for i in range(input_dim):
        a2 = jax.nn.sigmoid(x_rep[:, i, :] @ params['wa2'] + params['ba2'])
        scores.append(jax.nn.relu(a1 + a2) @ params['wa3'])
    attn = jax.nn.softmax(jnp.concatenate(scores, axis=1), axis=1)        # (B, F)
    xt = jnp.einsum('bf,bfd->bd', attn, x_rep)

    u = jax.nn.elu(xt @ params['wu1'] + params['bu1'])
    u = jax.nn.elu(u @ params['wu2'] + params['bu2'])
    u = jax.nn.elu(u @ params['wu3'] + params['bu3'])
    t_logit = u @ params['wtl'] + params['btl']
    u_tau = u @ params['wut'] + params['but']
    return c_logit, c_tau, t_logit, u_tau


def _check(outputs, ref):
    # 5e-3 tolerance: bf16 MXU operands on the large fold matmuls + approx EUP
    # reciprocals contribute ~1e-3 absolute noise; structural bugs would be >> this.
    got = (outputs['c_logit'], outputs['c_tau'], outputs['t_logit'], outputs['u_tau'])
    for r, g in zip(ref, got):
        assert bool(jnp.allclose(r, g, rtol=5e-3, atol=5e-3)), "mismatch vs reference"


# ---------------------------------- main -------------------------------------

if __name__ == "__main__":
    B, INPUT_DIM, HC_DIM, HU_DIM = 8, 8, 32, 32

    key = jax.random.PRNGKey(0)
    k_feat, k_treat, k_param, k_feat2, k_treat2 = jax.random.split(key, 5)
    features = jax.random.normal(k_feat, (B, INPUT_DIM), dtype=jnp.float32)
    is_treat = (jax.random.uniform(k_treat, (B,)) > 0.5).astype(jnp.float32)
    params = init_params(k_param, INPUT_DIM, HC_DIM, HU_DIM)

    # small batch (single grid step)
    outputs = efin_forward(features, is_treat, params, INPUT_DIM, HU_DIM, HC_DIM)
    jax.block_until_ready(outputs)
    _check(outputs, efin_reference(features, params, INPUT_DIM, HU_DIM))

    # larger batch: tb=256 -> grid=(2,), exercises streaming with resident weights
    # (and gives one tile per TensorCore on v7x)
    B2 = 512
    features2 = jax.random.normal(k_feat2, (B2, INPUT_DIM), dtype=jnp.float32)
    is_treat2 = (jax.random.uniform(k_treat2, (B2,)) > 0.5).astype(jnp.float32)
    outputs2 = efin_forward(features2, is_treat2, params, INPUT_DIM, HU_DIM, HC_DIM)
    jax.block_until_ready(outputs2)
    _check(outputs2, efin_reference(features2, params, INPUT_DIM, HU_DIM))

    print("KERNEL_OK")
</pallas_src>

<mosaic_0001>
module attributes {stable_mosaic.version = 11 : i64} {
  func.func @efin_kernel(%arg0: i32, %arg1: memref<8x8xf32, #tpu.memory_space<vmem>>, %arg2: memref<8x256xf32, #tpu.memory_space<vmem>>, %arg3: memref<256x32xf32, #tpu.memory_space<vmem>>, %arg4: memref<32x256xf32, #tpu.memory_space<vmem>>, %arg5: memref<256x768xbf16, #tpu.memory_space<vmem>>, %arg6: memref<1x768xf32, #tpu.memory_space<vmem>>, %arg7: memref<256x2048xbf16, #tpu.memory_space<vmem>>, %arg8: memref<2048x64xbf16, #tpu.memory_space<vmem>>, %arg9: memref<64x64xf32, #tpu.memory_space<vmem>>, %arg10: memref<64x2048xbf16, #tpu.memory_space<vmem>>, %arg11: memref<2048x32xbf16, #tpu.memory_space<vmem>>, %arg12: memref<1x32xf32, #tpu.memory_space<vmem>>, %arg13: memref<256x256xbf16, #tpu.memory_space<vmem>>, %arg14: memref<1x256xf32, #tpu.memory_space<vmem>>, %arg15: memref<1x256xf32, #tpu.memory_space<vmem>>, %arg16: memref<256x8xf32, #tpu.memory_space<vmem>>, %arg17: memref<8x256xf32, #tpu.memory_space<vmem>>, %arg18: memref<32x64xf32, #tpu.memory_space<vmem>>, %arg19: memref<32x64xf32, #tpu.memory_space<vmem>>, %arg20: memref<1x64xf32, #tpu.memory_space<vmem>>, %arg21: memref<64x32xf32, #tpu.memory_space<vmem>>, %arg22: memref<1x32xf32, #tpu.memory_space<vmem>>, %arg23: memref<32x16xf32, #tpu.memory_space<vmem>>, %arg24: memref<1x16xf32, #tpu.memory_space<vmem>>, %arg25: memref<16x4xf32, #tpu.memory_space<vmem>>, %arg26: memref<1x4xf32, #tpu.memory_space<vmem>>, %arg27: memref<8x4xf32, #tpu.memory_space<vmem>>) attributes {dimension_semantics = [#tpu.dimension_semantics<parallel>], iteration_bounds = array<i64: 1>, scalar_prefetch = 0 : i64, scratch_operands = 0 : i64, tpu.core_type = #tpu.core_type<tc>, window_params = [{transform_indices = @transform_0, window_bounds = array<i64: 8, 8>}, {pipeline_mode = #tpu.pipeline_mode<synchronous>, transform_indices = @transform_1, window_bounds = array<i64: 8, 256>}, {pipeline_mode = #tpu.pipeline_mode<synchronous>, transform_indices = @transform_2, window_bounds = array<i64: 256, 32>}, {pipeline_mode = #tpu.pipeline_mode<synchronous>, transform_indices = @transform_3, window_bounds = array<i64: 32, 256>}, {pipeline_mode = #tpu.pipeline_mode<synchronous>, transform_indices = @transform_4, window_bounds = array<i64: 256, 768>}, {pipeline_mode = #tpu.pipeline_mode<synchronous>, transform_indices = @transform_5, window_bounds = array<i64: 1, 768>}, {pipeline_mode = #tpu.pipeline_mode<synchronous>, transform_indices = @transform_6, window_bounds = array<i64: 256, 2048>}, {pipeline_mode = #tpu.pipeline_mode<synchronous>, transform_indices = @transform_7, window_bounds = array<i64: 2048, 64>}, {pipeline_mode = #tpu.pipeline_mode<synchronous>, transform_indices = @transform_8, window_bounds = array<i64: 64, 64>}, {pipeline_mode = #tpu.pipeline_mode<synchronous>, transform_indices = @transform_9, window_bounds = array<i64: 64, 2048>}, {pipeline_mode = #tpu.pipeline_mode<synchronous>, transform_indices = @transform_10, window_bounds = array<i64: 2048, 32>}, {pipeline_mode = #tpu.pipeline_mode<synchronous>, transform_indices = @transform_11, window_bounds = array<i64: 1, 32>}, {pipeline_mode = #tpu.pipeline_mode<synchronous>, transform_indices = @transform_12, window_bounds = array<i64: 256, 256>}, {pipeline_mode = #tpu.pipeline_mode<synchronous>, transform_indices = @transform_13, window_bounds = array<i64: 1, 256>}, {pipeline_mode = #tpu.pipeline_mode<synchronous>, transform_indices = @transform_14, window_bounds = array<i64: 1, 256>}, {pipeline_mode = #tpu.pipeline_mode<synchronous>, transform_indices = @transform_15, window_bounds = array<i64: 256, 8>}, {pipeline_mode = #tpu.pipeline_mode<synchronous>, transform_indices = @transform_16, window_bounds = array<i64: 8, 256>}, {pipeline_mode = #tpu.pipeline_mode<synchronous>, transform_indices = @transform_17, window_bounds = array<i64: 32, 64>}, {pipeline_mode = #tpu.pipeline_mode<synchronous>, transform_indices = @transform_18, window_bounds = array<i64: 32, 64>}, {pipeline_mode = #tpu.pipeline_mode<synchronous>, transform_indices = @transform_19, window_bounds = array<i64: 1, 64>}, {pipeline_mode = #tpu.pipeline_mode<synchronous>, transform_indices = @transform_20, window_bounds = array<i64: 64, 32>}, {pipeline_mode = #tpu.pipeline_mode<synchronous>, transform_indices = @transform_21, window_bounds = array<i64: 1, 32>}, {pipeline_mode = #tpu.pipeline_mode<synchronous>, transform_indices = @transform_22, window_bounds = array<i64: 32, 16>}, {pipeline_mode = #tpu.pipeline_mode<synchronous>, transform_indices = @transform_23, window_bounds = array<i64: 1, 16>}, {pipeline_mode = #tpu.pipeline_mode<synchronous>, transform_indices = @transform_24, window_bounds = array<i64: 16, 4>}, {pipeline_mode = #tpu.pipeline_mode<synchronous>, transform_indices = @transform_25, window_bounds = array<i64: 1, 4>}, {transform_indices = @transform_26, window_bounds = array<i64: 8, 4>}]} {
    %c0 = arith.constant 0 : index
    %c0_0 = arith.constant 0 : index
    %0 = vector.load %arg1[%c0, %c0_0] : memref<8x8xf32, #tpu.memory_space<vmem>>, vector<8x8xf32>
    %c0_1 = arith.constant 0 : index
    %c0_2 = arith.constant 0 : index
    %1 = vector.load %arg2[%c0_1, %c0_2] : memref<8x256xf32, #tpu.memory_space<vmem>>, vector<8x256xf32>
    %cst = arith.constant dense<0.000000e+00> : vector<8x256xf32>
    %2 = tpu.matmul %0, %1, %cst {dimension_numbers = #tpu.dot_dimension_numbers<[1], [0], [0], [1], [0, 0, 1, 1], [], []>} : vector<8x8xf32>, vector<8x256xf32>, vector<8x256xf32> -> vector<8x256xf32>
    %3 = arith.mulf %2, %2 : vector<8x256xf32>
    %c0_3 = arith.constant 0 : index
    %c0_4 = arith.constant 0 : index
    %4 = vector.load %arg3[%c0_3, %c0_4] : memref<256x32xf32, #tpu.memory_space<vmem>>, vector<256x32xf32>
    %cst_5 = arith.constant dense<0.000000e+00> : vector<8x32xf32>
    %5 = tpu.matmul %3, %4, %cst_5 {dimension_numbers = #tpu.dot_dimension_numbers<[1], [0], [0], [1], [0, 0, 1, 1], [], []>} : vector<8x256xf32>, vector<256x32xf32>, vector<8x32xf32> -> vector<8x32xf32>
    %6 = math.rsqrt %5 : vector<8x32xf32>
    %c0_6 = arith.constant 0 : index
    %c0_7 = arith.constant 0 : index
    %7 = vector.load %arg4[%c0_6, %c0_7] : memref<32x256xf32, #tpu.memory_space<vmem>>, vector<32x256xf32>
    %cst_8 = arith.constant dense<0.000000e+00> : vector<8x256xf32>
    %8 = tpu.matmul %6, %7, %cst_8 {dimension_numbers = #tpu.dot_dimension_numbers<[1], [0], [0], [1], [0, 0, 1, 1], [], []>} : vector<8x32xf32>, vector<32x256xf32>, vector<8x256xf32> -> vector<8x256xf32>
    %9 = arith.mulf %2, %8 : vector<8x256xf32>
    %10 = arith.truncf %9 : vector<8x256xf32> to vector<8x256xbf16>
    %c0_9 = arith.constant 0 : index
    %c0_10 = arith.constant 0 : index
    %11 = vector.load %arg5[%c0_9, %c0_10] : memref<256x768xbf16, #tpu.memory_space<vmem>>, vector<256x768xbf16>
    %cst_11 = arith.constant dense<0.000000e+00> : vector<8x768xf32>
    %12 = tpu.matmul %10, %11, %cst_11 {dimension_numbers = #tpu.dot_dimension_numbers<[1], [0], [0], [1], [0, 0, 1, 1], [], []>} : vector<8x256xbf16>, vector<256x768xbf16>, vector<8x768xf32> -> vector<8x768xf32>
    %c0_12 = arith.constant 0 : index
    %c0_13 = arith.constant 0 : index
    %13 = vector.load %arg6[%c0_12, %c0_13] : memref<1x768xf32, #tpu.memory_space<vmem>>, vector<1x768xf32>
    %14 = vector.broadcast %13 : vector<1x768xf32> to vector<8x768xf32>
    %15 = arith.addf %12, %14 : vector<8x768xf32>
    %16 = vector.extract_strided_slice %15 {offsets = [0, 0], sizes = [8, 256], strides = [1, 1]} : vector<8x768xf32> to vector<8x256xf32>
    %17 = vector.extract_strided_slice %15 {offsets = [0, 256], sizes = [8, 256], strides = [1, 1]} : vector<8x768xf32> to vector<8x256xf32>
    %18 = vector.extract_strided_slice %15 {offsets = [0, 512], sizes = [8, 256], strides = [1, 1]} : vector<8x768xf32> to vector<8x256xf32>
    %19 = arith.truncf %16 : vector<8x256xf32> to vector<8x256xbf16>
    %c0_14 = arith.constant 0 : index
    %c0_15 = arith.constant 0 : index
    %20 = vector.load %arg7[%c0_14, %c0_15] : memref<256x2048xbf16, #tpu.memory_space<vmem>>, vector<256x2048xbf16>
    %cst_16 = arith.constant dense<0.000000e+00> : vector<8x2048xf32>
    %21 = tpu.matmul %19, %20, %cst_16 {dimension_numbers = #tpu.dot_dimension_numbers<[1], [0], [0], [1], [0, 0, 1, 1], [], []>} : vector<8x256xbf16>, vector<256x2048xbf16>, vector<8x2048xf32> -> vector<8x2048xf32>
    %22 = tpu.concatenate %17, %17, %17, %17, %17, %17, %17, %17 in 1 : vector<8x256xf32>, vector<8x256xf32>, vector<8x256xf32>, vector<8x256xf32>, vector<8x256xf32>, vector<8x256xf32>, vector<8x256xf32>, vector<8x256xf32> -> vector<8x2048xf32>
    %23 = tpu.concatenate %18, %18, %18, %18, %18, %18, %18, %18 in 1 : vector<8x256xf32>, vector<8x256xf32>, vector<8x256xf32>, vector<8x256xf32>, vector<8x256xf32>, vector<8x256xf32>, vector<8x256xf32>, vector<8x256xf32> -> vector<8x2048xf32>
    %24 = arith.mulf %21, %22 : vector<8x2048xf32>
    %25 = arith.truncf %24 : vector<8x2048xf32> to vector<8x2048xbf16>
    %c0_17 = arith.constant 0 : index
    %c0_18 = arith.constant 0 : index
    %26 = vector.load %arg8[%c0_17, %c0_18] : memref<2048x64xbf16, #tpu.memory_space<vmem>>, vector<2048x64xbf16>
    %cst_19 = arith.constant dense<0.000000e+00> : vector<8x64xf32>
    %27 = tpu.matmul %25, %26, %cst_19 {dimension_numbers = #tpu.dot_dimension_numbers<[1], [0], [0], [1], [0, 0, 1, 1], [], []>} : vector<8x2048xbf16>, vector<2048x64xbf16>, vector<8x64xf32> -> vector<8x64xf32>
    %cst_20 = arith.constant 0.000000e+00 : f32
    %28 = vector.broadcast %cst_20 : f32 to vector<8x64xf32>
    %29 = arith.subf %28, %27 : vector<8x64xf32>
    %30 = math.exp %29 : vector<8x64xf32>
    %cst_21 = arith.constant 1.000000e+00 : f32
    %31 = vector.broadcast %cst_21 : f32 to vector<8x64xf32>
    %32 = arith.addf %31, %30 : vector<8x64xf32>
    %33 = tpu.reciprocal %32 {approx = true} : vector<8x64xf32> -> vector<8x64xf32>
    %34 = math.exp %33 : vector<8x64xf32>
    %c0_22 = arith.constant 0 : index
    %c0_23 = arith.constant 0 : index
    %35 = vector.load %arg9[%c0_22, %c0_23] : memref<64x64xf32, #tpu.memory_space<vmem>>, vector<64x64xf32>
    %cst_24 = arith.constant dense<0.000000e+00> : vector<8x64xf32>
    %36 = tpu.matmul %34, %35, %cst_24 {dimension_numbers = #tpu.dot_dimension_numbers<[1], [0], [0], [1], [0, 0, 1, 1], [], []>} : vector<8x64xf32>, vector<64x64xf32>, vector<8x64xf32> -> vector<8x64xf32>
    %37 = tpu.reciprocal %36 {approx = true} : vector<8x64xf32> -> vector<8x64xf32>
    %38 = arith.mulf %34, %37 : vector<8x64xf32>
    %39 = arith.truncf %38 : vector<8x64xf32> to vector<8x64xbf16>
    %c0_25 = arith.constant 0 : index
    %c0_26 = arith.constant 0 : index
    %40 = vector.load %arg10[%c0_25, %c0_26] : memref<64x2048xbf16, #tpu.memory_space<vmem>>, vector<64x2048xbf16>
    %cst_27 = arith.constant dense<0.000000e+00> : vector<8x2048xf32>
    %41 = tpu.matmul %39, %40, %cst_27 {dimension_numbers = #tpu.dot_dimension_numbers<[1], [0], [0], [1], [0, 0, 1, 1], [], []>} : vector<8x64xbf16>, vector<64x2048xbf16>, vector<8x2048xf32> -> vector<8x2048xf32>
    %42 = arith.mulf %41, %23 : vector<8x2048xf32>
    %43 = arith.truncf %42 : vector<8x2048xf32> to vector<8x2048xbf16>
    %c0_28 = arith.constant 0 : index
    %c0_29 = arith.constant 0 : index
    %44 = vector.load %arg11[%c0_28, %c0_29] : memref<2048x32xbf16, #tpu.memory_space<vmem>>, vector<2048x32xbf16>
    %cst_30 = arith.constant dense<0.000000e+00> : vector<8x32xf32>
    %45 = tpu.matmul %43, %44, %cst_30 {dimension_numbers = #tpu.dot_dimension_numbers<[1], [0], [0], [1], [0, 0, 1, 1], [], []>} : vector<8x2048xbf16>, vector<2048x32xbf16>, vector<8x32xf32> -> vector<8x32xf32>
    %c0_31 = arith.constant 0 : index
    %c0_32 = arith.constant 0 : index
    %46 = vector.load %arg12[%c0_31, %c0_32] : memref<1x32xf32, #tpu.memory_space<vmem>>, vector<1x32xf32>
    %47 = vector.broadcast %46 : vector<1x32xf32> to vector<8x32xf32>
    %48 = arith.addf %45, %47 : vector<8x32xf32>
    %cst_33 = arith.constant 0.000000e+00 : f32
    %49 = vector.broadcast %cst_33 : f32 to vector<8x32xf32>
    %50 = arith.cmpf ogt, %48, %49 : vector<8x32xf32>
    %cst_34 = arith.constant 0.000000e+00 : f32
    %51 = vector.broadcast %cst_34 : f32 to vector<8x32xf32>
    %52 = arith.minimumf %48, %51 : vector<8x32xf32>
    %53 = math.exp %52 : vector<8x32xf32>
    %cst_35 = arith.constant 1.000000e+00 : f32
    %54 = vector.broadcast %cst_35 : f32 to vector<8x32xf32>
    %55 = arith.subf %53, %54 : vector<8x32xf32>
    %56 = arith.select %50, %48, %55 : vector<8x32xi1>, vector<8x32xf32>
    %57 = arith.truncf %2 : vector<8x256xf32> to vector<8x256xbf16>
    %c0_36 = arith.constant 0 : index
    %c0_37 = arith.constant 0 : index
    %58 = vector.load %arg13[%c0_36, %c0_37] : memref<256x256xbf16, #tpu.memory_space<vmem>>, vector<256x256xbf16>
    %cst_38 = arith.constant dense<0.000000e+00> : vector<8x256xf32>
    %59 = tpu.matmul %57, %58, %cst_38 {dimension_numbers = #tpu.dot_dimension_numbers<[1], [0], [0], [1], [0, 0, 1, 1], [], []>} : vector<8x256xbf16>, vector<256x256xbf16>, vector<8x256xf32> -> vector<8x256xf32>
    %c0_39 = arith.constant 0 : index
    %c0_40 = arith.constant 0 : index
    %60 = vector.load %arg14[%c0_39, %c0_40] : memref<1x256xf32, #tpu.memory_space<vmem>>, vector<1x256xf32>
    %61 = vector.broadcast %60 : vector<1x256xf32> to vector<8x256xf32>
    %62 = arith.addf %59, %61 : vector<8x256xf32>
    %cst_41 = arith.constant 0.000000e+00 : f32
    %63 = vector.broadcast %cst_41 : f32 to vector<8x256xf32>
    %64 = arith.subf %63, %62 : vector<8x256xf32>
    %65 = math.exp %64 : vector<8x256xf32>
    %cst_42 = arith.constant 1.000000e+00 : f32
    %66 = vector.broadcast %cst_42 : f32 to vector<8x256xf32>
    %67 = arith.addf %66, %65 : vector<8x256xf32>
    %68 = tpu.reciprocal %67 {approx = true} : vector<8x256xf32> -> vector<8x256xf32>
    %c0_43 = arith.constant 0 : index
    %c0_44 = arith.constant 0 : index
    %69 = vector.load %arg15[%c0_43, %c0_44] : memref<1x256xf32, #tpu.memory_space<vmem>>, vector<1x256xf32>
    %70 = vector.broadcast %69 : vector<1x256xf32> to vector<8x256xf32>
    %71 = arith.addf %70, %68 : vector<8x256xf32>
    %cst_45 = arith.constant 0.000000e+00 : f32
    %72 = vector.broadcast %cst_45 : f32 to vector<8x256xf32>
    %73 = arith.maximumf %71, %72 : vector<8x256xf32>
    %c0_46 = arith.constant 0 : index
    %c0_47 = arith.constant 0 : index
    %74 = vector.load %arg16[%c0_46, %c0_47] : memref<256x8xf32, #tpu.memory_space<vmem>>, vector<256x8xf32>
    %cst_48 = arith.constant dense<0.000000e+00> : vector<8x8xf32>
    %75 = tpu.matmul %73, %74, %cst_48 {dimension_numbers = #tpu.dot_dimension_numbers<[1], [0], [0], [1], [0, 0, 1, 1], [], []>} : vector<8x256xf32>, vector<256x8xf32>, vector<8x8xf32> -> vector<8x8xf32>
    %cst_49 = arith.constant dense<0xFF800000> : vector<8xf32>
    %76 = vector.multi_reduction <maximumf>, %75, %cst_49 [1] : vector<8x8xf32> to vector<8xf32>
    %77 = vector.shape_cast %76 : vector<8xf32> to vector<8x1xf32>
    %78 = vector.broadcast %77 : vector<8x1xf32> to vector<8x8xf32>
    %79 = arith.subf %75, %78 : vector<8x8xf32>
    %80 = math.exp %79 : vector<8x8xf32>
    %cst_50 = arith.constant dense<0.000000e+00> : vector<8xf32>
    %81 = vector.multi_reduction <add>, %80, %cst_50 [1] : vector<8x8xf32> to vector<8xf32>
    %82 = vector.shape_cast %81 : vector<8xf32> to vector<8x1xf32>
    %83 = tpu.reciprocal %82 {approx = true} : vector<8x1xf32> -> vector<8x1xf32>
    %84 = vector.broadcast %83 : vector<8x1xf32> to vector<8x8xf32>
    %85 = arith.mulf %80, %84 : vector<8x8xf32>
    %c0_51 = arith.constant 0 : index
    %c0_52 = arith.constant 0 : index
    %86 = vector.load %arg17[%c0_51, %c0_52] : memref<8x256xf32, #tpu.memory_space<vmem>>, vector<8x256xf32>
    %cst_53 = arith.constant dense<0.000000e+00> : vector<8x256xf32>
    %87 = tpu.matmul %85, %86, %cst_53 {dimension_numbers = #tpu.dot_dimension_numbers<[1], [0], [0], [1], [0, 0, 1, 1], [], []>} : vector<8x8xf32>, vector<8x256xf32>, vector<8x256xf32> -> vector<8x256xf32>
    %88 = arith.mulf %87, %2 : vector<8x256xf32>
    %c0_54 = arith.constant 0 : index
    %c0_55 = arith.constant 0 : index
    %89 = vector.load %arg3[%c0_54, %c0_55] : memref<256x32xf32, #tpu.memory_space<vmem>>, vector<256x32xf32>
    %cst_56 = arith.constant dense<0.000000e+00> : vector<8x32xf32>
    %90 = tpu.matmul %88, %89, %cst_56 {dimension_numbers = #tpu.dot_dimension_numbers<[1], [0], [0], [1], [0, 0, 1, 1], [], []>} : vector<8x256xf32>, vector<256x32xf32>, vector<8x32xf32> -> vector<8x32xf32>
    %c0_57 = arith.constant 0 : index
    %c0_58 = arith.constant 0 : index
    %91 = vector.load %arg18[%c0_57, %c0_58] : memref<32x64xf32, #tpu.memory_space<vmem>>, vector<32x64xf32>
    %cst_59 = arith.constant dense<0.000000e+00> : vector<8x64xf32>
    %92 = tpu.matmul %56, %91, %cst_59 {dimension_numbers = #tpu.dot_dimension_numbers<[1], [0], [0], [1], [0, 0, 1, 1], [], []>} : vector<8x32xf32>, vector<32x64xf32>, vector<8x64xf32> -> vector<8x64xf32>
    %c0_60 = arith.constant 0 : index
    %c0_61 = arith.constant 0 : index
    %93 = vector.load %arg19[%c0_60, %c0_61] : memref<32x64xf32, #tpu.memory_space<vmem>>, vector<32x64xf32>
    %cst_62 = arith.constant dense<0.000000e+00> : vector<8x64xf32>
    %94 = tpu.matmul %90, %93, %cst_62 {dimension_numbers = #tpu.dot_dimension_numbers<[1], [0], [0], [1], [0, 0, 1, 1], [], []>} : vector<8x32xf32>, vector<32x64xf32>, vector<8x64xf32> -> vector<8x64xf32>
    %95 = arith.addf %92, %94 : vector<8x64xf32>
    %c0_63 = arith.constant 0 : index
    %c0_64 = arith.constant 0 : index
    %96 = vector.load %arg20[%c0_63, %c0_64] : memref<1x64xf32, #tpu.memory_space<vmem>>, vector<1x64xf32>
    %97 = vector.broadcast %96 : vector<1x64xf32> to vector<8x64xf32>
    %98 = arith.addf %95, %97 : vector<8x64xf32>
    %cst_65 = arith.constant 0.000000e+00 : f32
    %99 = vector.broadcast %cst_65 : f32 to vector<8x64xf32>
    %100 = arith.cmpf ogt, %98, %99 : vector<8x64xf32>
    %cst_66 = arith.constant 0.000000e+00 : f32
    %101 = vector.broadcast %cst_66 : f32 to vector<8x64xf32>
    %102 = arith.minimumf %98, %101 : vector<8x64xf32>
    %103 = math.exp %102 : vector<8x64xf32>
    %cst_67 = arith.constant 1.000000e+00 : f32
    %104 = vector.broadcast %cst_67 : f32 to vector<8x64xf32>
    %105 = arith.subf %103, %104 : vector<8x64xf32>
    %106 = arith.select %100, %98, %105 : vector<8x64xi1>, vector<8x64xf32>
    %c0_68 = arith.constant 0 : index
    %c0_69 = arith.constant 0 : index
    %107 = vector.load %arg21[%c0_68, %c0_69] : memref<64x32xf32, #tpu.memory_space<vmem>>, vector<64x32xf32>
    %cst_70 = arith.constant dense<0.000000e+00> : vector<8x32xf32>
    %108 = tpu.matmul %106, %107, %cst_70 {dimension_numbers = #tpu.dot_dimension_numbers<[1], [0], [0], [1], [0, 0, 1, 1], [], []>} : vector<8x64xf32>, vector<64x32xf32>, vector<8x32xf32> -> vector<8x32xf32>
    %c0_71 = arith.constant 0 : index
    %c0_72 = arith.constant 0 : index
    %109 = vector.load %arg22[%c0_71, %c0_72] : memref<1x32xf32, #tpu.memory_space<vmem>>, vector<1x32xf32>
    %110 = vector.broadcast %109 : vector<1x32xf32> to vector<8x32xf32>
    %111 = arith.addf %108, %110 : vector<8x32xf32>
    %cst_73 = arith.constant 0.000000e+00 : f32
    %112 = vector.broadcast %cst_73 : f32 to vector<8x32xf32>
    %113 = arith.cmpf ogt, %111, %112 : vector<8x32xf32>
    %cst_74 = arith.constant 0.000000e+00 : f32
    %114 = vector.broadcast %cst_74 : f32 to vector<8x32xf32>
    %115 = arith.minimumf %111, %114 : vector<8x32xf32>
    %116 = math.exp %115 : vector<8x32xf32>
    %cst_75 = arith.constant 1.000000e+00 : f32
    %117 = vector.broadcast %cst_75 : f32 to vector<8x32xf32>
    %118 = arith.subf %116, %117 : vector<8x32xf32>
    %119 = arith.select %113, %111, %118 : vector<8x32xi1>, vector<8x32xf32>
    %c0_76 = arith.constant 0 : index
    %c0_77 = arith.constant 0 : index
    %120 = vector.load %arg23[%c0_76, %c0_77] : memref<32x16xf32, #tpu.memory_space<vmem>>, vector<32x16xf32>
    %cst_78 = arith.constant dense<0.000000e+00> : vector<8x16xf32>
    %121 = tpu.matmul %119, %120, %cst_78 {dimension_numbers = #tpu.dot_dimension_numbers<[1], [0], [0], [1], [0, 0, 1, 1], [], []>} : vector<8x32xf32>, vector<32x16xf32>, vector<8x16xf32> -> vector<8x16xf32>
    %c0_79 = arith.constant 0 : index
    %c0_80 = arith.constant 0 : index
    %122 = vector.load %arg24[%c0_79, %c0_80] : memref<1x16xf32, #tpu.memory_space<vmem>>, vector<1x16xf32>
    %123 = vector.broadcast %122 : vector<1x16xf32> to vector<8x16xf32>
    %124 = arith.addf %121, %123 : vector<8x16xf32>
    %cst_81 = arith.constant 0.000000e+00 : f32
    %125 = vector.broadcast %cst_81 : f32 to vector<8x16xf32>
    %126 = arith.cmpf ogt, %124, %125 : vector<8x16xf32>
    %cst_82 = arith.constant 0.000000e+00 : f32
    %127 = vector.broadcast %cst_82 : f32 to vector<8x16xf32>
    %128 = arith.minimumf %124, %127 : vector<8x16xf32>
    %129 = math.exp %128 : vector<8x16xf32>
    %cst_83 = arith.constant 1.000000e+00 : f32
    %130 = vector.broadcast %cst_83 : f32 to vector<8x16xf32>
    %131 = arith.subf %129, %130 : vector<8x16xf32>
    %132 = arith.select %126, %124, %131 : vector<8x16xi1>, vector<8x16xf32>
    %c0_84 = arith.constant 0 : index
    %c0_85 = arith.constant 0 : index
    %133 = vector.load %arg25[%c0_84, %c0_85] : memref<16x4xf32, #tpu.memory_space<vmem>>, vector<16x4xf32>
    %cst_86 = arith.constant dense<0.000000e+00> : vector<8x4xf32>
    %134 = tpu.matmul %132, %133, %cst_86 {dimension_numbers = #tpu.dot_dimension_numbers<[1], [0], [0], [1], [0, 0, 1, 1], [], []>} : vector<8x16xf32>, vector<16x4xf32>, vector<8x4xf32> -> vector<8x4xf32>
    %c0_87 = arith.constant 0 : index
    %c0_88 = arith.constant 0 : index
    %135 = vector.load %arg26[%c0_87, %c0_88] : memref<1x4xf32, #tpu.memory_space<vmem>>, vector<1x4xf32>
    %136 = vector.broadcast %135 : vector<1x4xf32> to vector<8x4xf32>
    %137 = arith.addf %134, %136 : vector<8x4xf32>
    %c0_89 = arith.constant 0 : index
    %c0_90 = arith.constant 0 : index
    %138 = vector.load %arg27[%c0_89, %c0_90] : memref<8x4xf32, #tpu.memory_space<vmem>>, vector<8x4xf32>
    tpu.vector_store %arg27[%c0_89, %c0_90], %137 {strides = array<i32>} : memref<8x4xf32, #tpu.memory_space<vmem>>, vector<8x4xf32>,
    return
  }
  func.func @transform_0(%arg0: i32) -> (i32, i32) {
    %c0_i32 = arith.constant 0 : i32
    %c0_i32_0 = arith.constant 0 : i32
    return %arg0, %c0_i32 : i32, i32
  }
  func.func @transform_1(%arg0: i32) -> (i32, i32) {
    %c0_i32 = arith.constant 0 : i32
    %c0_i32_0 = arith.constant 0 : i32
    %c0_i32_1 = arith.constant 0 : i32
    return %c0_i32, %c0_i32_0 : i32, i32
  }
  func.func @transform_2(%arg0: i32) -> (i32, i32) {
    %c0_i32 = arith.constant 0 : i32
    %c0_i32_0 = arith.constant 0 : i32
    %c0_i32_1 = arith.constant 0 : i32
    return %c0_i32, %c0_i32_0 : i32, i32
  }
  func.func @transform_3(%arg0: i32) -> (i32, i32) {
    %c0_i32 = arith.constant 0 : i32
    %c0_i32_0 = arith.constant 0 : i32
    %c0_i32_1 = arith.constant 0 : i32
    return %c0_i32, %c0_i32_0 : i32, i32
  }
  func.func @transform_4(%arg0: i32) -> (i32, i32) {
    %c0_i32 = arith.constant 0 : i32
    %c0_i32_0 = arith.constant 0 : i32
    %c0_i32_1 = arith.constant 0 : i32
    return %c0_i32, %c0_i32_0 : i32, i32
  }
  func.func @transform_5(%arg0: i32) -> (i32, i32) {
    %c0_i32 = arith.constant 0 : i32
    %c0_i32_0 = arith.constant 0 : i32
    %c0_i32_1 = arith.constant 0 : i32
    return %c0_i32, %c0_i32_0 : i32, i32
  }
  func.func @transform_6(%arg0: i32) -> (i32, i32) {
    %c0_i32 = arith.constant 0 : i32
    %c0_i32_0 = arith.constant 0 : i32
    %c0_i32_1 = arith.constant 0 : i32
    return %c0_i32, %c0_i32_0 : i32, i32
  }
  func.func @transform_7(%arg0: i32) -> (i32, i32) {
    %c0_i32 = arith.constant 0 : i32
    %c0_i32_0 = arith.constant 0 : i32
    %c0_i32_1 = arith.constant 0 : i32
    return %c0_i32, %c0_i32_0 : i32, i32
  }
  func.func @transform_8(%arg0: i32) -> (i32, i32) {
    %c0_i32 = arith.constant 0 : i32
    %c0_i32_0 = arith.constant 0 : i32
    %c0_i32_1 = arith.constant 0 : i32
    return %c0_i32, %c0_i32_0 : i32, i32
  }
  func.func @transform_9(%arg0: i32) -> (i32, i32) {
    %c0_i32 = arith.constant 0 : i32
    %c0_i32_0 = arith.constant 0 : i32
    %c0_i32_1 = arith.constant 0 : i32
    return %c0_i32, %c0_i32_0 : i32, i32
  }
  func.func @transform_10(%arg0: i32) -> (i32, i32) {
    %c0_i32 = arith.constant 0 : i32
    %c0_i32_0 = arith.constant 0 : i32
    %c0_i32_1 = arith.constant 0 : i32
    return %c0_i32, %c0_i32_0 : i32, i32
  }
  func.func @transform_11(%arg0: i32) -> (i32, i32) {
    %c0_i32 = arith.constant 0 : i32
    %c0_i32_0 = arith.constant 0 : i32
    %c0_i32_1 = arith.constant 0 : i32
    return %c0_i32, %c0_i32_0 : i32, i32
  }
  func.func @transform_12(%arg0: i32) -> (i32, i32) {
    %c0_i32 = arith.constant 0 : i32
    %c0_i32_0 = arith.constant 0 : i32
    %c0_i32_1 = arith.constant 0 : i32
    return %c0_i32, %c0_i32_0 : i32, i32
  }
  func.func @transform_13(%arg0: i32) -> (i32, i32) {
    %c0_i32 = arith.constant 0 : i32
    %c0_i32_0 = arith.constant 0 : i32
    %c0_i32_1 = arith.constant 0 : i32
    return %c0_i32, %c0_i32_0 : i32, i32
  }
  func.func @transform_14(%arg0: i32) -> (i32, i32) {
    %c0_i32 = arith.constant 0 : i32
    %c0_i32_0 = arith.constant 0 : i32
    %c0_i32_1 = arith.constant 0 : i32
    return %c0_i32, %c0_i32_0 : i32, i32
  }
  func.func @transform_15(%arg0: i32) -> (i32, i32) {
    %c0_i32 = arith.constant 0 : i32
    %c0_i32_0 = arith.constant 0 : i32
    %c0_i32_1 = arith.constant 0 : i32
    return %c0_i32, %c0_i32_0 : i32, i32
  }
  func.func @transform_16(%arg0: i32) -> (i32, i32) {
    %c0_i32 = arith.constant 0 : i32
    %c0_i32_0 = arith.constant 0 : i32
    %c0_i32_1 = arith.constant 0 : i32
    return %c0_i32, %c0_i32_0 : i32, i32
  }
  func.func @transform_17(%arg0: i32) -> (i32, i32) {
    %c0_i32 = arith.constant 0 : i32
    %c0_i32_0 = arith.constant 0 : i32
    %c0_i32_1 = arith.constant 0 : i32
    return %c0_i32, %c0_i32_0 : i32, i32
  }
  func.func @transform_18(%arg0: i32) -> (i32, i32) {
    %c0_i32 = arith.constant 0 : i32
    %c0_i32_0 = arith.constant 0 : i32
    %c0_i32_1 = arith.constant 0 : i32
    return %c0_i32, %c0_i32_0 : i32, i32
  }
  func.func @transform_19(%arg0: i32) -> (i32, i32) {
    %c0_i32 = arith.constant 0 : i32
    %c0_i32_0 = arith.constant 0 : i32
    %c0_i32_1 = arith.constant 0 : i32
    return %c0_i32, %c0_i32_0 : i32, i32
  }
  func.func @transform_20(%arg0: i32) -> (i32, i32) {
    %c0_i32 = arith.constant 0 : i32
    %c0_i32_0 = arith.constant 0 : i32
    %c0_i32_1 = arith.constant 0 : i32
    return %c0_i32, %c0_i32_0 : i32, i32
  }
  func.func @transform_21(%arg0: i32) -> (i32, i32) {
    %c0_i32 = arith.constant 0 : i32
    %c0_i32_0 = arith.constant 0 : i32
    %c0_i32_1 = arith.constant 0 : i32
    return %c0_i32, %c0_i32_0 : i32, i32
  }
  func.func @transform_22(%arg0: i32) -> (i32, i32) {
    %c0_i32 = arith.constant 0 : i32
    %c0_i32_0 = arith.constant 0 : i32
    %c0_i32_1 = arith.constant 0 : i32
    return %c0_i32, %c0_i32_0 : i32, i32
  }
  func.func @transform_23(%arg0: i32) -> (i32, i32) {
    %c0_i32 = arith.constant 0 : i32
    %c0_i32_0 = arith.constant 0 : i32
    %c0_i32_1 = arith.constant 0 : i32
    return %c0_i32, %c0_i32_0 : i32, i32
  }
  func.func @transform_24(%arg0: i32) -> (i32, i32) {
    %c0_i32 = arith.constant 0 : i32
    %c0_i32_0 = arith.constant 0 : i32
    %c0_i32_1 = arith.constant 0 : i32
    return %c0_i32, %c0_i32_0 : i32, i32
  }
  func.func @transform_25(%arg0: i32) -> (i32, i32) {
    %c0_i32 = arith.constant 0 : i32
    %c0_i32_0 = arith.constant 0 : i32
    %c0_i32_1 = arith.constant 0 : i32
    return %c0_i32, %c0_i32_0 : i32, i32
  }
  func.func @transform_26(%arg0: i32) -> (i32, i32) {
    %c0_i32 = arith.constant 0 : i32
    %c0_i32_0 = arith.constant 0 : i32
    return %arg0, %c0_i32 : i32, i32
  }
}

</mosaic_0001>

<bundles_post_ra>
// kernel: tpu_custom_call.1
= control target key start
LH: loop header
LB: loop body
LE: loop exit
PB: predicated region body
PF: predicated region fallthrough
CT: control target
= control target key end

     0   :  { %s14152_s0 = inlined_call_operand.vmem [shape: f32[8,8], index: 0, kind: input, shape index: {}]   ;;  %s14153_s1 = inlined_call_operand.vmem [shape: f32[8,256], index: 1, kind: input, shape index: {}]   ;;  %s14154_s2 = inlined_call_operand.vmem [shape: f32[256,32], index: 2, kind: input, shape index: {}]   ;;  %s14155_s3 = inlined_call_operand.vmem [shape: f32[32,256], index: 3, kind: input, shape index: {}]   ;;  %s14156_s4 = inlined_call_operand.hbm [shape: bf16[256,768], index: 4, kind: input, shape index: {}]   ;;  %s14157_s5 = inlined_call_operand.hbm [shape: f32[1,768], index: 5, kind: input, shape index: {}]   ;;  %s14158_s6 = inlined_call_operand.vmem [shape: bf16[256,2048], index: 6, kind: input, shape index: {}]   ;;  %s14159_s7 = inlined_call_operand.vmem [shape: bf16[2048,64], index: 7, kind: input, shape index: {}]   ;;  %s14160_s8 = inlined_call_operand.vmem [shape: f32[64,64], index: 8, kind: input, shape index: {}]   ;;  %s14161_s9 = inlined_call_operand.vmem [shape: bf16[64,2048], index: 9, kind: input, shape index: {}]   ;;  %s14162_s10 = inlined_call_operand.vmem [shape: bf16[2048,32], index: 10, kind: input, shape index: {}]   ;;  %s14163_s11 = inlined_call_operand.hbm [shape: f32[1,32], index: 11, kind: input, shape index: {}]   ;;  %s14164_s12 = inlined_call_operand.hbm [shape: bf16[256,256], index: 12, kind: input, shape index: {}]   ;;  %s14165_s13 = inlined_call_operand.vmem [shape: f32[1,256], index: 13, kind: input, shape index: {}]   ;;  %s14166_s14 = inlined_call_operand.vmem [shape: f32[1,256], index: 14, kind: input, shape index: {}]   ;;  %s14167_s15 = inlined_call_operand.vmem [shape: f32[256,8], index: 15, kind: input, shape index: {}]   ;;  %s14168_s16 = inlined_call_operand.hbm [shape: f32[8,256], index: 16, kind: input, shape index: {}]   ;;  %s14169_s17 = inlined_call_operand.vmem [shape: f32[32,64], index: 17, kind: input, shape index: {}]   ;;  %s14170_s18 = inlined_call_operand.hbm [shape: f32[32,64], index: 18, kind: input, shape index: {}]   ;;  %s14171_s19 = inlined_call_operand.vmem [shape: f32[1,64], index: 19, kind: input, shape index: {}]   ;;  %s14172_s20 = inlined_call_operand.vmem [shape: f32[64,32], index: 20, kind: input, shape index: {}]   ;;  %s14173_s21 = inlined_call_operand.vmem [shape: f32[1,32], index: 21, kind: input, shape index: {}]   ;;  %s14174_s22 = inlined_call_operand.vmem [shape: f32[32,16], index: 22, kind: input, shape index: {}]   ;;  %s14175_s23 = inlined_call_operand.vmem [shape: f32[1,16], index: 23, kind: input, shape index: {}]   ;;  %s14176_s24 = inlined_call_operand.vmem [shape: f32[16,4], index: 24, kind: input, shape index: {}]   ;;  %s14177_s25 = inlined_call_operand.vmem [shape: f32[1,4], index: 25, kind: input, shape index: {}]   ;;  %s14178_s26 = inlined_call_operand.vmem [shape: f32[8,4], index: 26, kind: output, shape index: {}]  }
   0x1   :  { %14187 = sst [smem:[#allocation16_spill]] %s14152_s0 }
   0x2   :  { %14188 = sst [smem:[#allocation17_spill]] %s14153_s1 }
   0x3   :  { %14189 = sst [smem:[#allocation18_spill]] %s14154_s2 }
   0x4   :  { %14190 = sst [smem:[#allocation19_spill]] %s14155_s3 }
   0x5   :  { %14191 = sst [smem:[#allocation20_spill]] %s14156_s4 }
   0x6   :  { %14192 = sst [smem:[#allocation21_spill]] %s14157_s5 }
   0x7   :  { %14193 = sst [smem:[#allocation22_spill]] %s14158_s6 }
   0x8   :  { %14194 = sst [smem:[#allocation23_spill]] %s14159_s7 }
   0x9   :  { %14195 = sst [smem:[#allocation24_spill]] %s14160_s8 }
   0xa   :  { %14196 = sst [smem:[#allocation25_spill]] %s14161_s9 }
   0xb   :  { %14197 = sst [smem:[#allocation26_spill]] %s14162_s10 }
   0xc   :  { %14198 = sst [smem:[#allocation27_spill]] %s14177_s25 }
   0xd   :  { %14199 = sst [smem:[#allocation28_spill]] %s14178_s26 }
   0xe   :  { %31 = vsyncpa [#allocation3], 0 }
   0xf   :  { %32 = vsyncpa [#allocation5], 0 }
  0x10   :  { %33 = vsyncpa [#allocation8], 0  ;;  %s14200_s7 = sld [smem:[#allocation21_spill]] }
  0x16   :  { %s61_s28 = sshll.u32 %s14200_s7, 4  ;;  %s62_s28 = int_to_ptr.hbm [resolvable:$true] %s61_s28 }
  0x17   :  { %34 = vsyncpa [#allocation11], 0  ;;  %s10640_s8 = smov [#allocation4]   ;;  %s92_s9 = sshll.u32 %s14164_s12, 4  ;;  %s93_s9 = int_to_ptr.hbm [resolvable:$true] %s92_s9 }
  0x18   :  { %s63_s4 = sshll.u32 %s10640_s8, 4  ;;  %s10641_s30 = smov [#allocation7]   ;;  %s64_s4 = int_to_ptr.vmem [resolvable:$true] %s63_s4 }
  0x19   :  { %66 = dma.hbm_to_vmem [thread:$0]  %s62_s28, 96, %s64_s4, [#allocation5]  }
  0x1a   :  { %s94_s2 = sshll.u32 %s10641_s30, 4  ;;  %s10642_s5 = smov 128   ;;  %s95_s2 = int_to_ptr.vmem [resolvable:$true] %s94_s2 }
  0x1b   :  { %s10643_s10 = smov 8   ;;  %s14201_s27 = sld [smem:[#allocation20_spill]] }
  0x1c   :  { %100 = dma.hbm_to_vmem [thread:$0]  %s93_s9, 4096, %s95_s2, [#allocation8], %s10642_s5, %s10642_s5, %s10643_s10  }
  0x1d   :  { %s10644_s7 = smov [#allocation2]   ;;  %s82_s4 = sshll.u32 %s14163_s11, 4  ;;  %s83_s4 = int_to_ptr.hbm [resolvable:$true] %s82_s4 }
  0x1e   :  { %s49_s8 = sshll.u32 %s10644_s7, 4  ;;  %s10645_s29 = smov 384   ;;  %s50_s8 = int_to_ptr.vmem [resolvable:$true] %s49_s8 }
  0x1f   :  { %s10646_s0 = smov 24   ;;  %s10647_s30 = smov [#allocation6]  }
  0x20   :  { %s84_s26 = sshll.u32 %s10647_s30, 4  ;;  %s112_s2 = sshll.u32 %s14168_s16, 4  ;;  %s85_s26 = int_to_ptr.vmem [resolvable:$true] %s84_s26  ;;  %s113_s2 = int_to_ptr.hbm [resolvable:$true] %s112_s2 }
  0x21   :  { %s47_s3 = sshll.u32 %s14201_s27, 4  ;;  %s124_s27 = sshll.u32 %s14170_s18, 4  ;;  %s48_s3 = int_to_ptr.hbm [resolvable:$true] %s47_s3  ;;  %s125_s27 = int_to_ptr.hbm [resolvable:$true] %s124_s27 }
  0x22   :  { %55 = dma.hbm_to_vmem [thread:$0]  %s48_s3, 12288, %s50_s8, [#allocation3], %s10645_s29, %s10645_s29, %s10646_s0  }
  0x23   :  { %87 = dma.hbm_to_vmem [thread:$0]  %s83_s4, 16, %s85_s26, [#allocation5]  }
  0x24   :  { %s10648_s7 = smov [#allocation9]   ;;  %s10649_s11 = smov [#allocation10]  }
  0x25   :  { %s114_s12 = sshll.u32 %s10648_s7, 4  ;;  %s126_s3 = sshll.u32 %s10649_s11, 4  ;;  %s115_s12 = int_to_ptr.vmem [resolvable:$true] %s114_s12  ;;  %s127_s3 = int_to_ptr.vmem [resolvable:$true] %s126_s3 }
  0x26   :  { %117 = dma.hbm_to_vmem [thread:$0]  %s113_s2, 256, %s115_s12, [#allocation8]  }
  0x27   :  { %132 = dma.hbm_to_vmem [thread:$0]  %s125_s27, 512, %s127_s3, [#allocation11], %s10642_s5, %s10642_s5, %s10643_s10  }
  0x28   :  { %10632 = dma.done.wait [#allocation3], 12288  }
  0x29   :  { %10633 = vsyncadd [#allocation3], 4294955008 }
  0x2a   :  { %10634 = dma.done.wait [#allocation5], 112  }
  0x2b   :  { %10635 = vsyncadd [#allocation5], 4294967184 }
  0x2c   :  { %10636 = dma.done.wait [#allocation8], 4352  }
  0x2d   :  { %10637 = vsyncadd [#allocation8], 4294962944 }
  0x2e   :  { %10638 = dma.done.wait [#allocation11], 512  }
  0x2f   :  { %10639 = vsyncadd [#allocation11], 4294966784  ;;  %vm175_vm0 = vcmask 64512   ;;  %s14202_s25 = sld [smem:[#allocation17_spill]]  ;;  %v7033_v47 = vld [vmem:[#allocation2 + $0x150] sm:$0xf] }
  0x30   :  { %s14203_s5 = sld [smem:[#allocation16_spill]]  ;;  %v9752_v48 = vld [vmem:[#allocation2 + $0x164] sm:$0xf0]  ;;  %v7225_v49 = vld [vmem:[#allocation2 + $0x2d0] sm:$0xf]  ;;  %vm311_vm2 = vcmask 261120  }
  0x31   :  { %s14204_s0 = sld [smem:[#allocation18_spill]]  ;;  %v7034_v50 = vor.u32 %v9752_v48, %v7033_v47  ;;  %v9800_v51 = vld [vmem:[#allocation2 + $0x2e4] sm:$0xf0]  ;;  %v9749_v52 = vld [vmem:[#allocation2 + $0x154] sm:$0xf]  ;;  %vm4338_vm5 = vcmask 523264  }
  0x32   :  { %s14205_s1 = sld [smem:[#allocation19_spill]]  ;;  %v7035_v53 = vld [vmem:[#allocation2 + $0x168] sm:$0xf0]  ;;  %v7226_v54 = vor.u32 %v9800_v51, %v7225_v49  ;;  %v9797_v56 = vld [vmem:[#allocation2 + $0x2d4] sm:$0xf]  ;;  %vm6825_vm9 = vcmask 130048  }
  0x33   :  { %v7038_v55 = vor.u32 %v9749_v52, %v7035_v53  ;;  %v7227_v57 = vld [vmem:[#allocation2 + $0x2e8] sm:$0xf0]  ;;  %v7009_v58 = vld [vmem:[#allocation2 + $0x120] sm:$0xf]  ;;  %v9746_v60 = vld [vmem:[#allocation2 + $0x134] sm:$0xf0] }
  0x34   :  { %v7230_v59 = vor.u32 %v9797_v56, %v7227_v57  ;;  %v7201_v61 = vld [vmem:[#allocation2 + $0x2a0] sm:$0xf]  ;;  %v9794_v62 = vld [vmem:[#allocation2 + $0x2b4] sm:$0xf0]  ;;  %v7010_v63 = vor.u32 %v9746_v60, %v7009_v58  ;;  %v9719_v52 = vld [vmem:[#allocation2 + $0x64] sm:$0xf] }
  0x35   :  { %v173_v0 = vld [vmem:[%s14202_s25] sm:$0xff]  ;;  %v174_v1 = vld [vmem:[%s14202_s25 + $0x8] sm:$0xff]  ;;  %v9722_v48 = vld [vmem:[#allocation2 + $0x74] sm:$0xf0]  ;;  %s14206_s9 = sld [smem:[#allocation22_spill]]  ;;  %vm6849_vm11 = vcmask 31744  }
  0x36   :  { %v172_v2 = vld [vmem:[%s14203_s5] sm:$0xff]  ;;  %194 = vmatpush.msra.mxu0 %v173_v0  ;;  %214 = vmatpush.msra.mxu1 %v174_v1  ;;  %v7202_v0 = vor.u32 %v9794_v62, %v7201_v61  ;;  %v9770_v51 = vld [vmem:[#allocation2 + $0x1f4] sm:$0xf0]  ;;  %v6915_v53 = vld [vmem:[#allocation2 + $0x78] sm:$0xf0]  ;;  %s14207_s18 = sld [smem:[#allocation23_spill]] }
  0x37   :  { %v236_v3 = vld [vmem:[%s14204_s0 + $0x78] sm:$0xff]  ;;  %6859 = vmatmul.msk.f32.vlgmr.msra.gmra.mxu0 %vm175_vm0, %v172_v2  ;;  %6860 = vmatmul.msk.f32.vlgmr.msra.gmra.mxu1 %vm175_vm0, %v172_v2  ;;  %v235_v5 = vld [vmem:[%s14204_s0 + $0x70] sm:$0xff]  ;;  %v234_v7 = vld [vmem:[%s14204_s0 + $0x68] sm:$0xff]  ;;  %s14208_s11 = sld [smem:[#allocation24_spill]] }
  0x38   :  { %v252_v4 = vld [vmem:[%s14204_s0 + $0xf8] sm:$0xff]  ;;  %v251_v6 = vld [vmem:[%s14204_s0 + $0xf0] sm:$0xff]  ;;  %253 = vmatpush.msra.mxu2 %v236_v3  ;;  %v250_v8 = vld [vmem:[%s14204_s0 + $0xe8] sm:$0xff]  ;;  %s14210_s12 = sld [smem:[#allocation26_spill]] }
  0x39   :  { %273 = vmatpush.msra.mxu3 %v252_v4  ;;  %v233_v9 = vld [vmem:[%s14204_s0 + $0x60] sm:$0xff]  ;;  %v232_v11 = vld [vmem:[%s14204_s0 + $0x58] sm:$0xff]  ;;  %v231_v13 = vld [vmem:[%s14204_s0 + $0x50] sm:$0xff]  ;;  %s14212_s10 = sld [smem:[#allocation28_spill]] }
  0x3a   :  { %254 = vmatpush.msra.mxu2 %v235_v5  ;;  %v249_v10 = vld [vmem:[%s14204_s0 + $0xe0] sm:$0xff]  ;;  %v248_v12 = vld [vmem:[%s14204_s0 + $0xd8] sm:$0xff]  ;;  %v247_v14 = vld [vmem:[%s14204_s0 + $0xd0] sm:$0xff] }
  0x3b   :  { %274 = vmatpush.msra.mxu3 %v251_v6  ;;  %v230_v15 = vld [vmem:[%s14204_s0 + $0x48] sm:$0xff]  ;;  %v229_v17 = vld [vmem:[%s14204_s0 + $0x40] sm:$0xff]  ;;  %v228_v19 = vld [vmem:[%s14204_s0 + $0x38] sm:$0xff] }
  0x3c   :  { %255 = vmatpush.msra.mxu2 %v234_v7  ;;  %v246_v16 = vld [vmem:[%s14204_s0 + $0xc8] sm:$0xff]  ;;  %v245_v18 = vld [vmem:[%s14204_s0 + $0xc0] sm:$0xff]  ;;  %v244_v20 = vld [vmem:[%s14204_s0 + $0xb8] sm:$0xff] }
  0x3d   :  { %275 = vmatpush.msra.mxu3 %v250_v8  ;;  %v227_v21 = vld [vmem:[%s14204_s0 + $0x30] sm:$0xff]  ;;  %v226_v23 = vld [vmem:[%s14204_s0 + $0x28] sm:$0xff]  ;;  %v225_v25 = vld [vmem:[%s14204_s0 + $0x20] sm:$0xff] }
  0x3e   :  { %256 = vmatpush.msra.mxu2 %v233_v9  ;;  %v243_v22 = vld [vmem:[%s14204_s0 + $0xb0] sm:$0xff]  ;;  %v242_v24 = vld [vmem:[%s14204_s0 + $0xa8] sm:$0xff]  ;;  %v241_v26 = vld [vmem:[%s14204_s0 + $0xa0] sm:$0xff] }
  0x3f   :  { %276 = vmatpush.msra.mxu3 %v249_v10  ;;  %v224_v27 = vld [vmem:[%s14204_s0 + $0x18] sm:$0xff]  ;;  %v223_v29 = vld [vmem:[%s14204_s0 + $0x10] sm:$0xff]  ;;  %v222_v31 = vld [vmem:[%s14204_s0 + $0x8] sm:$0xff] }
  0x40   :  { %257 = vmatpush.msra.mxu2 %v232_v11  ;;  %v240_v28 = vld [vmem:[%s14204_s0 + $0x98] sm:$0xff]  ;;  %v239_v30 = vld [vmem:[%s14204_s0 + $0x90] sm:$0xff]  ;;  %v238_v32 = vld [vmem:[%s14204_s0 + $0x88] sm:$0xff] }
  0x41   :  { %277 = vmatpush.msra.mxu3 %v248_v12  ;;  %v221_v33 = vld [vmem:[%s14204_s0] sm:$0xff]  ;;  %v309_v39 = vld [vmem:[%s14205_s1 + $0x30] sm:$0xff]  ;;  %v310_v40 = vld [vmem:[%s14205_s1 + $0x38] sm:$0xff] }
  0x42   :  { %258 = vmatpush.msra.mxu2 %v231_v13  ;;  %v237_v34 = vld [vmem:[%s14204_s0 + $0x80] sm:$0xff]  ;;  %327 = vmatpush.msrb.mxu0 %v309_v39  ;;  %v308_v42 = vld [vmem:[%s14205_s1 + $0x28] sm:$0xff]  ;;  %v305_v43 = vld [vmem:[%s14205_s1 + $0x10] sm:$0xff] }
  0x43   :  { %278 = vmatpush.msra.mxu3 %v247_v14  ;;  %347 = vmatpush.msrb.mxu1 %v310_v40  ;;  %v307_v41 = vld [vmem:[%s14205_s1 + $0x20] sm:$0xff]  ;;  %v306_v44 = vld [vmem:[%s14205_s1 + $0x18] sm:$0xff]  ;;  %v304_v46 = vld [vmem:[%s14205_s1 + $0x8] sm:$0xff] }
  0x44   :  { %259 = vmatpush.msra.mxu2 %v230_v15  ;;  %328 = vmatpush.msrb.mxu0 %v307_v41  ;;  %v303_v45 = vld [vmem:[%s14205_s1] sm:$0xff]  ;;  %v7011_v2 = vld [vmem:[#allocation2 + $0x138] sm:$0xf0]  ;;  %v6985_v6 = vld [vmem:[#allocation2 + $0xf0] sm:$0xf] }
  0x45   :  { %279 = vmatpush.msra.mxu3 %v246_v16  ;;  %348 = vmatpush.msrb.mxu1 %v308_v42  ;;  %v9743_v1 = vld [vmem:[#allocation2 + $0x124] sm:$0xf]  ;;  %v7203_v5 = vld [vmem:[#allocation2 + $0x2b8] sm:$0xf0]  ;;  %v9740_v7 = vld [vmem:[#allocation2 + $0x104] sm:$0xf0] }
  0x46   :  { %260 = vmatpush.msra.mxu2 %v229_v17  ;;  %329 = vmatpush.msrb.mxu0 %v305_v43  ;;  %v9791_v3 = vld [vmem:[#allocation2 + $0x2a4] sm:$0xf]  ;;  %v7014_v4 = vor.u32 %v9743_v1, %v7011_v2  ;;  %v7177_v9 = vld [vmem:[#allocation2 + $0x270] sm:$0xf]  ;;  %v9788_v10 = vld [vmem:[#allocation2 + $0x284] sm:$0xf0]  ;;  %v6986_v12 = vor.u32 %v9740_v7, %v6985_v6 }
  0x47   :  { %280 = vmatpush.msra.mxu3 %v245_v18  ;;  %349 = vmatpush.msrb.mxu1 %v306_v44  ;;  %v7206_v8 = vor.u32 %v9791_v3, %v7203_v5  ;;  %v9737_v11 = vld [vmem:[#allocation2 + $0xf4] sm:$0xf]  ;;  %v6987_v13 = vld [vmem:[#allocation2 + $0x108] sm:$0xf0]  ;;  %v7178_v16 = vor.u32 %v9788_v10, %v7177_v9  ;;  %v6961_v18 = vld [vmem:[#allocation2 + $0xc0] sm:$0xf] }
  0x48   :  { %261 = vmatpush.msra.mxu2 %v228_v19  ;;  %330 = vmatpush.msrb.mxu0 %v303_v45  ;;  %v9785_v14 = vld [vmem:[#allocation2 + $0x274] sm:$0xf]  ;;  %v7179_v15 = vld [vmem:[#allocation2 + $0x288] sm:$0xf0]  ;;  %v6990_v17 = vor.u32 %v9737_v11, %v6987_v13  ;;  %v9734_v19 = vld [vmem:[#allocation2 + $0xd4] sm:$0xf0] }
  0x49   :  { %281 = vmatpush.msra.mxu3 %v244_v20  ;;  %350 = vmatpush.msrb.mxu1 %v304_v46  ;;  %v7153_v20 = vld [vmem:[#allocation2 + $0x240] sm:$0xf]  ;;  %v9776_v39 = vld [vmem:[#allocation2 + $0x224] sm:$0xf0]  ;;  %v9725_v40 = vld [vmem:[#allocation2 + $0x94] sm:$0xf] }
  0x4a   :  { %262 = vmatpush.msra.mxu2 %v227_v21  ;;  %949 = vmatpush.bf16.msra.mxu0 %v7034_v50  ;;  %v7182_v21 = vor.u32 %v9785_v14, %v7179_v15  ;;  %v6939_v41 = vld [vmem:[#allocation2 + $0xa8] sm:$0xf0]  ;;  %v9773_v42 = vld [vmem:[#allocation2 + $0x214] sm:$0xf]  ;;  %v6913_v47 = vld [vmem:[#allocation2 + $0x60] sm:$0xf] }
  0x4b   :  { %282 = vmatpush.msra.mxu3 %v243_v22  ;;  %962 = vmatpush.bf16.msra.mxu1 %v7226_v54  ;;  %v9782_v22 = vld [vmem:[#allocation2 + $0x254] sm:$0xf0]  ;;  %v7131_v43 = vld [vmem:[#allocation2 + $0x228] sm:$0xf0]  ;;  %v6942_v46 = vor.u32 %v9725_v40, %v6939_v41  ;;  %v7105_v49 = vld [vmem:[#allocation2 + $0x1e0] sm:$0xf]  ;;  %v6914_v56 = vor.u32 %v9722_v48, %v6913_v47 }
  0x4c   :  { %263 = vmatpush.msra.mxu2 %v226_v23  ;;  %v9731_v23 = vld [vmem:[#allocation2 + $0xc4] sm:$0xf]  ;;  %v7134_v50 = vor.u32 %v9773_v42, %v7131_v43  ;;  %v7106_v58 = vor.u32 %v9770_v51, %v7105_v49  ;;  %v6889_v60 = vld [vmem:[#allocation2 + $0x30] sm:$0xf]  ;;  %v9716_v61 = vld [vmem:[#allocation2 + $0x44] sm:$0xf0] }
  0x4d   :  { %283 = vmatpush.msra.mxu3 %v242_v24  ;;  %v6963_v24 = vld [vmem:[#allocation2 + $0xd8] sm:$0xf0]  ;;  %v9767_v54 = vld [vmem:[#allocation2 + $0x1e4] sm:$0xf]  ;;  %v7081_v62 = vld [vmem:[#allocation2 + $0x1b0] sm:$0xf]  ;;  %v6890_v7 = vor.u32 %v9716_v61, %v6889_v60 }
  0x4e   :  { %264 = vmatpush.msra.mxu2 %v225_v25  ;;  %950 = vmatpush.bf16.msra.mxu0 %v7010_v63  ;;  %v9779_v25 = vld [vmem:[#allocation2 + $0x244] sm:$0xf]  ;;  %v9764_v1 = vld [vmem:[#allocation2 + $0x1c4] sm:$0xf0]  ;;  %v9713_v2 = vld [vmem:[#allocation2 + $0x34] sm:$0xf] }
  0x4f   :  { %284 = vmatpush.msra.mxu3 %v241_v26  ;;  %963 = vmatpush.bf16.msra.mxu1 %v7202_v0  ;;  %v7155_v26 = vld [vmem:[#allocation2 + $0x258] sm:$0xf0]  ;;  %v6891_v3 = vld [vmem:[#allocation2 + $0x48] sm:$0xf0]  ;;  %v7082_v9 = vor.u32 %v9764_v1, %v7081_v62  ;;  %v9710_v11 = vld [vmem:[#allocation2 + $0x14] sm:$0xf0] }
  0x50   :  { %265 = vmatpush.msra.mxu2 %v224_v27  ;;  %v7083_v5 = vld [vmem:[#allocation2 + $0x1c8] sm:$0xf0]  ;;  %v6894_v10 = vor.u32 %v9713_v2, %v6891_v3  ;;  %v9758_v13 = vld [vmem:[#allocation2 + $0x194] sm:$0xf0]  ;;  %v7017_v41 = vld [vmem:[#allocation2 + $0x128] sm:$0xf] }
  0x51   :  { %285 = vmatpush.msra.mxu3 %v240_v28  ;;  %v9747_v42 = vld [vmem:[#allocation2 + $0x13c] sm:$0xf0]  ;;  %v7209_v43 = vld [vmem:[#allocation2 + $0x2a8] sm:$0xf]  ;;  %v9792_v47 = vld [vmem:[#allocation2 + $0x2ac] sm:$0xf] }
  0x52   :  { %266 = vmatpush.msra.mxu2 %v223_v29  ;;  %951 = vmatpush.bf16.msra.mxu0 %v6986_v12  ;;  %v6962_v29 = vor.u32 %v9734_v19, %v6961_v18  ;;  %v7057_v12 = vld [vmem:[#allocation2 + $0x180] sm:$0xf]  ;;  %v9755_v18 = vld [vmem:[#allocation2 + $0x184] sm:$0xf]  ;;  %v7059_v19 = vld [vmem:[#allocation2 + $0x198] sm:$0xf0]  ;;  %v7018_v49 = vor.u32 %v9747_v42, %v7017_v41 }
  0x53   :  { %286 = vmatpush.msra.mxu3 %v239_v30  ;;  %964 = vmatpush.bf16.msra.mxu1 %v7178_v16  ;;  %v9707_v16 = vld [vmem:[#allocation2 + $0x4] sm:$0xf]  ;;  %v7187_v60 = vld [vmem:[#allocation2 + $0x290] sm:$0xf0]  ;;  %v9735_v1 = vld [vmem:[#allocation2 + $0xdc] sm:$0xf0] }
  0x54   :  { %267 = vmatpush.msra.mxu2 %v222_v31  ;;  %v7154_v31 = vor.u32 %v9782_v22, %v7153_v20  ;;  %v7041_v20 = vld [vmem:[#allocation2 + $0x158] sm:$0xf]  ;;  %v7211_v48 = vld [vmem:[#allocation2 + $0x2c0] sm:$0xf0]  ;;  %v7161_v2 = vld [vmem:[#allocation2 + $0x248] sm:$0xf] }
  0x55   :  { %287 = vmatpush.msra.mxu3 %v238_v32  ;;  %v6966_v32 = vor.u32 %v9731_v23, %v6963_v24  ;;  %v9753_v23 = vld [vmem:[#allocation2 + $0x16c] sm:$0xf0]  ;;  %v7233_v24 = vld [vmem:[#allocation2 + $0x2d8] sm:$0xf] }
  0x56   :  { %268 = vmatpush.msra.mxu2 %v221_v33  ;;  %v6937_v33 = vld [vmem:[#allocation2 + $0x90] sm:$0xf]  ;;  %952 = vmatpush.bf16.msra.mxu0 %v6962_v29  ;;  %v7058_v29 = vor.u32 %v9758_v13, %v7057_v12  ;;  %v6945_v12 = vld [vmem:[#allocation2 + $0x98] sm:$0xf] }
  0x57   :  { %288 = vmatpush.msra.mxu3 %v237_v34  ;;  %v9728_v34 = vld [vmem:[#allocation2 + $0xa4] sm:$0xf0]  ;;  %965 = vmatpush.bf16.msra.mxu1 %v7154_v31  ;;  %v9729_v13 = vld [vmem:[#allocation2 + $0xac] sm:$0xf0]  ;;  %v7089_v42 = vld [vmem:[#allocation2 + $0x1b8] sm:$0xf] }
  0x58   :  { %975 = vmatpush.bf16.msrb.mxu2 %v7038_v55  ;;  %v6938_v44 = vor.u32 %v9728_v34, %v6937_v33  ;;  %v7107_v55 = vld [vmem:[#allocation2 + $0x1f8] sm:$0xf0]  ;;  %v7235_v33 = vld [vmem:[#allocation2 + $0x2f0] sm:$0xf0]  ;;  %v7062_v34 = vor.u32 %v9755_v18, %v7059_v19  ;;  %v9717_v41 = vld [vmem:[#allocation2 + $0x4c] sm:$0xf0] }
  0x59   :  { %988 = vmatpush.bf16.msrb.mxu3 %v7230_v59  ;;  %v6918_v59 = vor.u32 %v9719_v52, %v6915_v53  ;;  %v7110_v0 = vor.u32 %v9767_v54, %v7107_v55  ;;  %v6993_v52 = vld [vmem:[#allocation2 + $0xf8] sm:$0xf]  ;;  %v9741_v53 = vld [vmem:[#allocation2 + $0x10c] sm:$0xf0]  ;;  %v7214_v55 = vor.u32 %v9792_v47, %v7211_v48  ;;  %v6947_v18 = vld [vmem:[#allocation2 + $0xb0] sm:$0xf0] }
  0x5a   :  { %953 = vmatpush.bf16.msra.mxu0 %v6938_v44  ;;  %v9795_v44 = vld [vmem:[#allocation2 + $0x2bc] sm:$0xf0]  ;;  %v7185_v54 = vld [vmem:[#allocation2 + $0x278] sm:$0xf]  ;;  %v6994_v61 = vor.u32 %v9741_v53, %v6993_v52  ;;  %v9774_v19 = vld [vmem:[#allocation2 + $0x21c] sm:$0xf] }
  0x5b   :  { %v9762_v48 = vld [vmem:[#allocation2 + $0x1bc] sm:$0xf]  ;;  %v9711_v52 = vld [vmem:[#allocation2 + $0x1c] sm:$0xf0]  ;;  %v7065_v53 = vld [vmem:[#allocation2 + $0x188] sm:$0xf] }
  0x5c   :  { %976 = vmatpush.bf16.msrb.mxu2 %v7014_v4  ;;  %v9761_v4 = vld [vmem:[#allocation2 + $0x1b4] sm:$0xf] }
  0x5d   :  { %989 = vmatpush.bf16.msrb.mxu3 %v7206_v8  ;;  %v6865_v8 = vld [vmem:[#allocation2] sm:$0xf]  ;;  %v7086_v15 = vor.u32 %v9761_v4, %v7083_v5  ;;  %v9732_v5 = vld [vmem:[#allocation2 + $0xcc] sm:$0xf] }
  0x5e   :  { %954 = vmatpush.bf16.msra.mxu0 %v6914_v56  ;;  %v6866_v22 = vor.u32 %v9710_v11, %v6865_v8  ;;  %v9789_v56 = vld [vmem:[#allocation2 + $0x28c] sm:$0xf0]  ;;  %v9783_v4 = vld [vmem:[#allocation2 + $0x25c] sm:$0xf0]  ;;  %v7163_v8 = vld [vmem:[#allocation2 + $0x260] sm:$0xf0] }
  0x5f   :  { %v7186_v62 = vor.u32 %v9789_v56, %v7185_v54  ;;  %v9708_v56 = vld [vmem:[#allocation2 + $0xc] sm:$0xf] }
  0x60   :  { %977 = vmatpush.bf16.msrb.mxu2 %v6990_v17  ;;  %v6867_v17 = vld [vmem:[#allocation2 + $0x18] sm:$0xf0] }
  0x61   :  { %990 = vmatpush.bf16.msrb.mxu3 %v7182_v21  ;;  %v6870_v31 = vor.u32 %v9707_v16, %v6867_v17  ;;  %v9777_v16 = vld [vmem:[#allocation2 + $0x22c] sm:$0xf0]  ;;  %v9726_v17 = vld [vmem:[#allocation2 + $0x9c] sm:$0xf] }
  0x62   :  { %955 = vmatpush.bf16.msra.mxu0 %v6890_v7  ;;  %v9780_v7 = vld [vmem:[#allocation2 + $0x24c] sm:$0xf] }
  0x64   :  { %978 = vmatpush.bf16.msrb.mxu2 %v6966_v32  ;;  %v9798_v32 = vld [vmem:[#allocation2 + $0x2dc] sm:$0xf] }
  0x66   :  { %956 = vmatpush.bf16.msra.mxu0 %v6866_v22 }
  0x68   :  { %979 = vmatpush.bf16.msrb.mxu2 %v6942_v46  ;;  %v7019_v46 = vld [vmem:[#allocation2 + $0x140] sm:$0xf0] }
  0x6c   :  { %980 = vmatpush.bf16.msrb.mxu2 %v6918_v59  ;;  %v9786_v59 = vld [vmem:[#allocation2 + $0x27c] sm:$0xf] }
  0x6d   :  { %v7190_v3 = vor.u32 %v9786_v59, %v7187_v60  ;;  %v9756_v60 = vld [vmem:[#allocation2 + $0x18c] sm:$0xf] }
  0x70   :  { %981 = vmatpush.bf16.msrb.mxu2 %v6894_v10  ;;  %v7162_v10 = vor.u32 %v9783_v4, %v7161_v2  ;;  %v9802_v4 = vld [vmem:[#allocation2 + $0x2f4] sm:$0xf0] }
  0x74   :  { %982 = vmatpush.bf16.msrb.mxu2 %v6870_v31  ;;  %v6923_v31 = vld [vmem:[#allocation2 + $0x80] sm:$0xf0] }
  0xb4   :  { %v10916_v35 = vpop.f32.mrf.mxu0  ;;  %v10918_v36 = vpop.f32.mrf.mxu1 }
  0xb5   :  { %v219_v37 = vmul.f32 %v10916_v35, %v10916_v35  ;;  %v220_v38 = vmul.f32 %v10918_v36, %v10918_v36 }
  0xb7   :  { %269 = vmatmul.f32.vlgmr.msra.gmra.mxu2 %v219_v37  ;;  %289 = vmatmul.f32.vlgmr.msra.gmra.mxu3 %v220_v38  ;;  %v7129_v37 = vld [vmem:[#allocation2 + $0x210] sm:$0xf]  ;;  %v7158_v38 = vor.u32 %v9779_v25, %v7155_v26  ;;  %v9750_v26 = vld [vmem:[#allocation2 + $0x15c] sm:$0xf] }
  0xb8   :  { %v7130_v45 = vor.u32 %v9776_v39, %v7129_v37  ;;  %v9801_v25 = vld [vmem:[#allocation2 + $0x2ec] sm:$0xf0]  ;;  %v7042_v37 = vor.u32 %v9753_v23, %v7041_v20  ;;  %v7139_v20 = vld [vmem:[#allocation2 + $0x230] sm:$0xf0]  ;;  %v6950_v23 = vor.u32 %v9726_v17, %v6947_v18 }
  0xb9   :  { %991 = vmatpush.bf16.msrb.mxu3 %v7158_v38  ;;  %v7234_v39 = vor.u32 %v9801_v25, %v7233_v24  ;;  %v6921_v24 = vld [vmem:[#allocation2 + $0x68] sm:$0xf]  ;;  %v9723_v25 = vld [vmem:[#allocation2 + $0x7c] sm:$0xf0] }
  0xba   :  { %966 = vmatpush.bf16.msra.mxu1 %v7130_v45  ;;  %v9744_v45 = vld [vmem:[#allocation2 + $0x12c] sm:$0xf] }
  0xbb   :  { %v7022_v51 = vor.u32 %v9744_v45, %v7019_v46  ;;  %v6899_v45 = vld [vmem:[#allocation2 + $0x50] sm:$0xf0] }
  0xbd   :  { %992 = vmatpush.bf16.msrb.mxu3 %v7134_v50  ;;  %v7210_v50 = vor.u32 %v9795_v44, %v7209_v43  ;;  %v9714_v44 = vld [vmem:[#allocation2 + $0x3c] sm:$0xf] }
  0xbe   :  { %967 = vmatpush.bf16.msra.mxu1 %v7106_v58  ;;  %v6995_v58 = vld [vmem:[#allocation2 + $0x110] sm:$0xf0]  ;;  %v6902_v47 = vor.u32 %v9714_v44, %v6899_v45  ;;  %v7169_v45 = vld [vmem:[#allocation2 + $0x250] sm:$0xf] }
  0xc1   :  { %993 = vmatpush.bf16.msrb.mxu3 %v7110_v0  ;;  %v6969_v0 = vld [vmem:[#allocation2 + $0xc8] sm:$0xf] }
  0xc2   :  { %968 = vmatpush.bf16.msra.mxu1 %v7082_v9  ;;  %v6970_v9 = vor.u32 %v9735_v1, %v6969_v0  ;;  %v9754_v0 = vld [vmem:[#allocation2 + $0x174] sm:$0xf0] }
  0xc5   :  { %994 = vmatpush.bf16.msrb.mxu3 %v7086_v15  ;;  %v7166_v15 = vor.u32 %v9780_v7, %v7163_v8  ;;  %v7051_v8 = vld [vmem:[#allocation2 + $0x178] sm:$0xf0] }
  0xc6   :  { %969 = vmatpush.bf16.msra.mxu1 %v7058_v29  ;;  %v9720_v29 = vld [vmem:[#allocation2 + $0x6c] sm:$0xf] }
  0xc9   :  { %995 = vmatpush.bf16.msrb.mxu3 %v7062_v34  ;;  %v6922_v34 = vor.u32 %v9723_v25, %v6921_v24  ;;  %v7219_v24 = vld [vmem:[#allocation2 + $0x2c8] sm:$0xf0] }
 0x13a   :  { %v270_v27 = vpop.f32.mrf.mxu2  ;;  %v290_v28 = vpop.f32.mrf.mxu3 }
 0x13b   :  { %v10948_v30 = vadd.f32 %v290_v28, %v270_v27  ;;  %v7043_v27 = vld [vmem:[#allocation2 + $0x170] sm:$0xf0] }
 0x13c   :  { %v7046_v40 = vor.u32 %v9750_v26, %v7043_v27  ;;  %v7113_v26 = vld [vmem:[#allocation2 + $0x1e8] sm:$0xf]  ;;  %v7142_v27 = vor.u32 %v9774_v19, %v7139_v20  ;;  %v7217_v19 = vld [vmem:[#allocation2 + $0x2b0] sm:$0xf] }
 0x13d   :  { %10426 = vrsqrt.f32 %v10948_v30  ;;  %vm299_vm3 = vweird.f32 %v10948_v30  ;;  %v9796_v20 = vld [vmem:[#allocation2 + $0x2c4] sm:$0xf0] }
 0x13e   :  { %1027 = vmatpush.bf16.msra.mxu2 %v7046_v40  ;;  %v6897_v40 = vld [vmem:[#allocation2 + $0x38] sm:$0xf] }
 0x13f   :  { %v6898_v43 = vor.u32 %v9717_v41, %v6897_v40 }
 0x142   :  { %1028 = vmatpush.bf16.msra.mxu2 %v7022_v51  ;;  %v6873_v51 = vld [vmem:[#allocation2 + $0x8] sm:$0xf] }
 0x143   :  { %v10427_v57 = vpop.eup %10426  ;;  %v6874_v54 = vor.u32 %v9711_v52, %v6873_v51 }
 0x144   :  { %v294_v63 = vmul.f32 %v10427_v57, %v10948_v30  ;;  %vm300_vm1 = vweird.f32 %v10427_v57  ;;  %v7238_v30 = vor.u32 %v9798_v32, %v7235_v33  ;;  %v9768_v32 = vld [vmem:[#allocation2 + $0x1ec] sm:$0xf]  ;;  %v7115_v33 = vld [vmem:[#allocation2 + $0x200] sm:$0xf0] }
 0x145   :  { %vm301_vm4 = vmor %vm299_vm3, %vm300_vm1 }
 0x146   :  { %v295_v6 = vmul.f32 %v10427_v57, %v294_v63  ;;  %1040 = vmatpush.bf16.msra.mxu3 %v7238_v30  ;;  %v9765_v30 = vld [vmem:[#allocation2 + $0x1cc] sm:$0xf0] }
 0x147   :  { %v7090_v46 = vor.u32 %v9765_v30, %v7089_v42  ;;  %v6977_v42 = vld [vmem:[#allocation2 + $0xd0] sm:$0xf] }
 0x148   :  { %v296_v14 = vmul.f32 0.5, %v295_v6  ;;  %v6971_v6 = vld [vmem:[#allocation2 + $0xe0] sm:$0xf0] }
 0x149   :  { %v6974_v11 = vor.u32 %v9732_v5, %v6971_v6  ;;  %v9751_v5 = vld [vmem:[#allocation2 + $0x164] sm:$0xf] }
 0x14a   :  { %v297_v21 = vsub.f32 1.5, %v296_v14  ;;  %1041 = vmatpush.bf16.msra.mxu3 %v7214_v55  ;;  %v7137_v14 = vld [vmem:[#allocation2 + $0x218] sm:$0xf]  ;;  %v9759_v55 = vld [vmem:[#allocation2 + $0x19c] sm:$0xf0]  ;;  %v7054_v17 = vor.u32 %v9751_v5, %v7051_v8 }
 0x14b   :  { %v7138_v22 = vor.u32 %v9777_v16, %v7137_v14  ;;  %v9748_v16 = vld [vmem:[#allocation2 + $0x144] sm:$0xf0]  ;;  %v7121_v5 = vld [vmem:[#allocation2 + $0x1f0] sm:$0xf]  ;;  %v6931_v8 = vld [vmem:[#allocation2 + $0x88] sm:$0xf0] }
 0x14c   :  { %v298_v28 = vmul.f32 %v10427_v57, %v297_v21  ;;  %v6946_v21 = vor.u32 %v9729_v13, %v6945_v12 }
 0x14e   :  { %v302_v38 = vsel %vm301_vm4, %v10427_v57, %v298_v28  ;;  %v9738_v57 = vld [vmem:[#allocation2 + $0xfc] sm:$0xf]  ;;  %1042 = vmatpush.bf16.msra.mxu3 %v7190_v3  ;;  %v9771_v28 = vld [vmem:[#allocation2 + $0x1fc] sm:$0xf0] }
 0x14f   :  { %6861 = vmatmul.msk.f32.vlgmr.msrb.gmra.mxu0 %vm311_vm2, %v302_v38  ;;  %6862 = vmatmul.msk.f32.vlgmr.msrb.gmra.mxu1 %vm311_vm2, %v302_v38  ;;  %v6998_v63 = vor.u32 %v9738_v57, %v6995_v58  ;;  %v6926_v38 = vor.u32 %v9720_v29, %v6923_v31  ;;  %v6875_v57 = vld [vmem:[#allocation2 + $0x20] sm:$0xf0]  ;;  %v7066_v58 = vor.u32 %v9759_v55, %v7065_v53  ;;  %v7241_v3 = vld [vmem:[#allocation2 + $0x2e0] sm:$0xf] }
 0x150   :  { %1001 = vmatpush.bf16.msrb.mxu0 %v7042_v37  ;;  %1014 = vmatpush.bf16.msrb.mxu1 %v7234_v39  ;;  %v7114_v37 = vor.u32 %v9771_v28, %v7113_v26  ;;  %v7118_v39 = vor.u32 %v9768_v32, %v7115_v33  ;;  %v6878_v59 = vor.u32 %v9708_v56, %v6875_v57  ;;  %v9742_v28 = vld [vmem:[#allocation2 + $0x114] sm:$0xf0]  ;;  %v7193_v32 = vld [vmem:[#allocation2 + $0x280] sm:$0xf] }
 0x151   :  { %1029 = vmatpush.bf16.msra.mxu2 %v6998_v63  ;;  %v7049_v63 = vld [vmem:[#allocation2 + $0x160] sm:$0xf]  ;;  %v7242_v14 = vor.u32 %v9802_v4, %v7241_v3  ;;  %v7218_v26 = vor.u32 %v9796_v20, %v7217_v19  ;;  %v9790_v33 = vld [vmem:[#allocation2 + $0x294] sm:$0xf0] }
 0x152   :  { %1043 = vmatpush.bf16.msra.mxu3 %v7166_v15  ;;  %v7050_v13 = vor.u32 %v9754_v0, %v7049_v63  ;;  %v7025_v15 = vld [vmem:[#allocation2 + $0x130] sm:$0xf]  ;;  %v7194_v41 = vor.u32 %v9790_v33, %v7193_v32  ;;  %v6953_v53 = vld [vmem:[#allocation2 + $0xa0] sm:$0xf]  ;;  %v9766_v20 = vld [vmem:[#allocation2 + $0x1d4] sm:$0xf0] }
 0x153   :  { %v7026_v25 = vor.u32 %v9748_v16, %v7025_v15  ;;  %v7145_v57 = vld [vmem:[#allocation2 + $0x220] sm:$0xf]  ;;  %v9718_v16 = vld [vmem:[#allocation2 + $0x54] sm:$0xf0]  ;;  %v9760_v33 = vld [vmem:[#allocation2 + $0x1a4] sm:$0xf0] }
 0x154   :  { %1002 = vmatpush.bf16.msrb.mxu0 %v7018_v49  ;;  %1015 = vmatpush.bf16.msrb.mxu1 %v7210_v50  ;;  %v7091_v49 = vld [vmem:[#allocation2 + $0x1d0] sm:$0xf0]  ;;  %v6905_v15 = vld [vmem:[#allocation2 + $0x40] sm:$0xf] }
 0x155   :  { %1030 = vmatpush.bf16.msra.mxu2 %v6974_v11  ;;  %v7094_v50 = vor.u32 %v9762_v48, %v7091_v49  ;;  %v6979_v48 = vld [vmem:[#allocation2 + $0xe8] sm:$0xf0]  ;;  %v9781_v49 = vld [vmem:[#allocation2 + $0x254] sm:$0xf]  ;;  %v7097_v19 = vld [vmem:[#allocation2 + $0x1c0] sm:$0xf] }
 0x156   :  { %1044 = vmatpush.bf16.msra.mxu3 %v7142_v27  ;;  %v7001_v27 = vld [vmem:[#allocation2 + $0x100] sm:$0xf] }
 0x157   :  { %v7002_v40 = vor.u32 %v9742_v28, %v7001_v27  ;;  %v6881_v27 = vld [vmem:[#allocation2 + $0x10] sm:$0xf]  ;;  %v9712_v28 = vld [vmem:[#allocation2 + $0x24] sm:$0xf0] }
 0x158   :  { %1003 = vmatpush.bf16.msrb.mxu0 %v6994_v61  ;;  %1016 = vmatpush.bf16.msrb.mxu1 %v7186_v62  ;;  %v7067_v61 = vld [vmem:[#allocation2 + $0x1a0] sm:$0xf0] }
 0x159   :  { %1031 = vmatpush.bf16.msra.mxu2 %v6950_v23  ;;  %v7070_v62 = vor.u32 %v9756_v60, %v7067_v61  ;;  %v9793_v23 = vld [vmem:[#allocation2 + $0x2b4] sm:$0xf]  ;;  %v6955_v60 = vld [vmem:[#allocation2 + $0xb8] sm:$0xf0]  ;;  %v9775_v61 = vld [vmem:[#allocation2 + $0x224] sm:$0xf] }
 0x15a   :  { %1045 = vmatpush.bf16.msra.mxu3 %v7118_v39  ;;  %v7222_v31 = vor.u32 %v9793_v23, %v7219_v24  ;;  %v7195_v39 = vld [vmem:[#allocation2 + $0x298] sm:$0xf0]  ;;  %v9763_v23 = vld [vmem:[#allocation2 + $0x1c4] sm:$0xf] }
 0x15b   :  { %v7099_v24 = vld [vmem:[#allocation2 + $0x1d8] sm:$0xf0] }
 0x15c   :  { %1004 = vmatpush.bf16.msrb.mxu0 %v6970_v9  ;;  %1017 = vmatpush.bf16.msrb.mxu1 %v7162_v10  ;;  %v9799_v9 = vld [vmem:[#allocation2 + $0x2e4] sm:$0xf]  ;;  %v7243_v10 = vld [vmem:[#allocation2 + $0x2f8] sm:$0xf0]  ;;  %v7102_v32 = vor.u32 %v9763_v23, %v7099_v24  ;;  %v10003_v23 = vld [vmem:[%s14206_s9 + $0x63c] sm:$0xf0] }
 0x15d   :  { %1032 = vmatpush.bf16.msra.mxu2 %v6926_v38  ;;  %v7246_v18 = vor.u32 %v9799_v9, %v7243_v10  ;;  %v9787_v38 = vld [vmem:[#allocation2 + $0x284] sm:$0xf]  ;;  %v9769_v9 = vld [vmem:[#allocation2 + $0x1f4] sm:$0xf]  ;;  %v7123_v10 = vld [vmem:[#allocation2 + $0x208] sm:$0xf0] }
 0x15e   :  { %1046 = vmatpush.bf16.msra.mxu3 %v7094_v50  ;;  %v7198_v44 = vor.u32 %v9787_v38, %v7195_v39  ;;  %v7171_v50 = vld [vmem:[#allocation2 + $0x268] sm:$0xf0]  ;;  %v9757_v38 = vld [vmem:[#allocation2 + $0x194] sm:$0xf]  ;;  %v9995_v24 = vld [vmem:[%s14206_s9 + $0x604] sm:$0xf] }
 0x15f   :  { %v7174_v56 = vor.u32 %v9781_v49, %v7171_v50  ;;  %v7075_v39 = vld [vmem:[#allocation2 + $0x1a8] sm:$0xf0] }
 0x160   :  { %1005 = vmatpush.bf16.msrb.mxu0 %v6946_v21  ;;  %1018 = vmatpush.bf16.msrb.mxu1 %v7138_v22  ;;  %v9745_v21 = vld [vmem:[#allocation2 + $0x134] sm:$0xf]  ;;  %v7027_v22 = vld [vmem:[#allocation2 + $0x148] sm:$0xf0] }
 0x161   :  { %1033 = vmatpush.bf16.msra.mxu2 %v6902_v47  ;;  %v7030_v29 = vor.u32 %v9745_v21, %v7027_v22  ;;  %v9733_v47 = vld [vmem:[#allocation2 + $0xd4] sm:$0xf]  ;;  %v9715_v21 = vld [vmem:[#allocation2 + $0x44] sm:$0xf]  ;;  %v6907_v22 = vld [vmem:[#allocation2 + $0x58] sm:$0xf0] }
 0x162   :  { %1047 = vmatpush.bf16.msra.mxu3 %v7070_v62  ;;  %v6982_v55 = vor.u32 %v9733_v47, %v6979_v48  ;;  %v7147_v62 = vld [vmem:[#allocation2 + $0x238] sm:$0xf0]  ;;  %v7633_v47 = vld [vmem:[%s14206_s9 + $0x300] sm:$0xf] }
 0x163   :  { %v7150_v4 = vor.u32 %v9775_v61, %v7147_v62  ;;  %v8209_v48 = vld [vmem:[%s14206_s9 + $0x780] sm:$0xf] }
 0x164   :  { %1006 = vmatpush.bf16.msrb.mxu0 %v6922_v34  ;;  %1019 = vmatpush.bf16.msrb.mxu1 %v7114_v37  ;;  %v9739_v34 = vld [vmem:[#allocation2 + $0x104] sm:$0xf]  ;;  %v7003_v37 = vld [vmem:[#allocation2 + $0x118] sm:$0xf0] }
 0x165   :  { %1034 = vmatpush.bf16.msra.mxu2 %v6878_v59  ;;  %v7006_v30 = vor.u32 %v9739_v34, %v7003_v37  ;;  %v9727_v59 = vld [vmem:[#allocation2 + $0xa4] sm:$0xf]  ;;  %v9709_v34 = vld [vmem:[#allocation2 + $0x14] sm:$0xf]  ;;  %v6883_v37 = vld [vmem:[#allocation2 + $0x28] sm:$0xf0] }
 0x166   :  { %v6958_v3 = vor.u32 %v9727_v59, %v6955_v60  ;;  %v7569_v59 = vld [vmem:[%s14206_s9 + $0x280] sm:$0xf] }
 0x167   :  { %v8145_v60 = vld [vmem:[%s14206_s9 + $0x700] sm:$0xf] }
 0x168   :  { %1007 = vmatpush.bf16.msrb.mxu0 %v6898_v43  ;;  %1020 = vmatpush.bf16.msrb.mxu1 %v7090_v46  ;;  %v9736_v43 = vld [vmem:[#allocation2 + $0xe4] sm:$0xf0] }
 0x169   :  { %v9784_v46 = vld [vmem:[#allocation2 + $0x264] sm:$0xf0]  ;;  %v6978_v51 = vor.u32 %v9736_v43, %v6977_v42  ;;  %v9915_v42 = vld [vmem:[%s14206_s9 + $0x384] sm:$0xf] }
 0x16a   :  { %v7170_v52 = vor.u32 %v9784_v46, %v7169_v45  ;;  %v7699_v43 = vld [vmem:[%s14206_s9 + $0x3c0] sm:$0xf0]  ;;  %v6886_v45 = vor.u32 %v9709_v34, %v6883_v37  ;;  %v7078_v46 = vor.u32 %v9757_v38, %v7075_v39  ;;  %v9987_v38 = vld [vmem:[%s14206_s9 + $0x5bc] sm:$0xf0] }
 0x16b   :  { %v7702_v50 = vor.u32 %v9915_v42, %v7699_v43  ;;  %v9979_v39 = vld [vmem:[%s14206_s9 + $0x584] sm:$0xf] }
 0x16c   :  { %1008 = vmatpush.bf16.msrb.mxu0 %v6874_v54  ;;  %1021 = vmatpush.bf16.msrb.mxu1 %v7066_v58  ;;  %v9730_v54 = vld [vmem:[#allocation2 + $0xb4] sm:$0xf0]  ;;  %v9835_v42 = vld [vmem:[%s14206_s9 + $0x104] sm:$0xf] }
 0x16d   :  { %v9778_v58 = vld [vmem:[#allocation2 + $0x234] sm:$0xf0]  ;;  %v6954_v63 = vor.u32 %v9730_v54, %v6953_v53  ;;  %v8211_v53 = vld [vmem:[%s14206_s9 + $0x7c0] sm:$0xf0]  ;;  %v9907_v54 = vld [vmem:[%s14206_s9 + $0x33c] sm:$0xf0] }
 0x16e   :  { %v7146_v0 = vor.u32 %v9778_v58, %v7145_v57  ;;  %v7634_v61 = vor.u32 %v9907_v54, %v7633_v47  ;;  %v7379_v43 = vld [vmem:[%s14206_s9 + $0x140] sm:$0xf0] }
 0x16f   :  { %v7315_v54 = vld [vmem:[%s14206_s9 + $0xc0] sm:$0xf0] }
 0x1cc   :  { %v332_v1 = vpop.f32.mrf.mxu0  ;;  %v352_v2 = vpop.f32.mrf.mxu1 }
 0x1cd   :  { %v355_v6 = vmul.f32 %v332_v1, %v10916_v35  ;;  %v356_v7 = vmul.f32 %v352_v2, %v10918_v36  ;;  %v6929_v1 = vld [vmem:[#allocation2 + $0x70] sm:$0xf]  ;;  %v9724_v2 = vld [vmem:[#allocation2 + $0x84] sm:$0xf0] }
 0x1cf   :  { %v10958_v11 = vpack.c.bf16 %v355_v6, %v355_v6  ;;  %v10960_v12 = vpack.c.bf16 %v356_v7, %v356_v7  ;;  %v9772_v6 = vld [vmem:[#allocation2 + $0x204] sm:$0xf0]  ;;  %v9721_v7 = vld [vmem:[#allocation2 + $0x74] sm:$0xf] }
 0x1d1   :  { %957 = vmatmul.bf16.vlgmr.msra.gmra.mxu0 %v10958_v11  ;;  %970 = vmatmul.bf16.vlgmr.msra.gmra.mxu1 %v10960_v12 }
 0x1d2   :  { %983 = vmatmul.bf16.vlgmr.msrb.gmra.mxu2 %v10958_v11  ;;  %996 = vmatmul.bf16.vlgmr.msrb.gmra.mxu3 %v10960_v12 }
 0x1d3   :  { %1053 = vmatpush.bf16.msra.mxu0 %v7050_v13  ;;  %1066 = vmatpush.bf16.msra.mxu1 %v7242_v14  ;;  %v6930_v13 = vor.u32 %v9724_v2, %v6929_v1  ;;  %v7122_v14 = vor.u32 %v9772_v6, %v7121_v5  ;;  %v8147_v1 = vld [vmem:[%s14206_s9 + $0x740] sm:$0xf0]  ;;  %v9891_v2 = vld [vmem:[%s14206_s9 + $0x2bc] sm:$0xf0] }
 0x1d4   :  { %1079 = vmatpush.bf16.msrb.mxu2 %v7054_v17  ;;  %1092 = vmatpush.bf16.msrb.mxu3 %v7246_v18  ;;  %v6934_v17 = vor.u32 %v9721_v7, %v6931_v8  ;;  %v7126_v18 = vor.u32 %v9769_v9, %v7123_v10  ;;  %v7505_v7 = vld [vmem:[%s14206_s9 + $0x200] sm:$0xf]  ;;  %v7570_v9 = vor.u32 %v9891_v2, %v7569_v59  ;;  %v7251_v2 = vld [vmem:[%s14206_s9 + $0x40] sm:$0xf0] }
 0x1d5   :  { %v8081_v8 = vld [vmem:[%s14206_s9 + $0x680] sm:$0xf] }
 0x1d6   :  { %v7825_v59 = vld [vmem:[%s14206_s9 + $0x480] sm:$0xf] }
 0x1d7   :  { %1054 = vmatpush.bf16.msra.mxu0 %v7026_v25  ;;  %1067 = vmatpush.bf16.msra.mxu1 %v7218_v26  ;;  %v6906_v25 = vor.u32 %v9718_v16, %v6905_v15  ;;  %v7098_v26 = vor.u32 %v9766_v20, %v7097_v19  ;;  %v9867_v15 = vld [vmem:[%s14206_s9 + $0x204] sm:$0xf]  ;;  %v7441_v19 = vld [vmem:[%s14206_s9 + $0x180] sm:$0xf] }
 0x1d8   :  { %1080 = vmatpush.bf16.msrb.mxu2 %v7030_v29  ;;  %1093 = vmatpush.bf16.msrb.mxu3 %v7222_v31  ;;  %v7073_v29 = vld [vmem:[#allocation2 + $0x190] sm:$0xf]  ;;  %v6910_v31 = vor.u32 %v9715_v21, %v6907_v22  ;;  %v7507_v16 = vld [vmem:[%s14206_s9 + $0x240] sm:$0xf0]  ;;  %v8017_v20 = vld [vmem:[%s14206_s9 + $0x600] sm:$0xf] }
 0x1d9   :  { %v7510_v22 = vor.u32 %v9867_v15, %v7507_v16  ;;  %v7763_v15 = vld [vmem:[%s14206_s9 + $0x440] sm:$0xf0]  ;;  %v8217_v16 = vld [vmem:[%s14206_s9 + $0x788] sm:$0xf] }
 0x1db   :  { %1055 = vmatpush.bf16.msra.mxu0 %v7002_v40  ;;  %1068 = vmatpush.bf16.msra.mxu1 %v7194_v41  ;;  %v7697_v40 = vld [vmem:[%s14206_s9 + $0x380] sm:$0xf] }
 0x1dc   :  { %1081 = vmatpush.bf16.msrb.mxu2 %v7006_v30  ;;  %1094 = vmatpush.bf16.msrb.mxu3 %v7198_v44  ;;  %v9923_v41 = vld [vmem:[%s14206_s9 + $0x3bc] sm:$0xf0]  ;;  %v6882_v30 = vor.u32 %v9712_v28, %v6881_v27  ;;  %v7074_v44 = vor.u32 %v9760_v33, %v7073_v29  ;;  %v9851_v27 = vld [vmem:[%s14206_s9 + $0x184] sm:$0xf]  ;;  %v8018_v29 = vor.u32 %v10003_v23, %v8017_v20  ;;  %v10044_v20 = vld [vmem:[%s14206_s9 + $0x78c] sm:$0xf] }
 0x1dd   :  { %v7698_v49 = vor.u32 %v9923_v41, %v7697_v40  ;;  %v7443_v28 = vld [vmem:[%s14206_s9 + $0x1c0] sm:$0xf0]  ;;  %v7953_v33 = vld [vmem:[%s14206_s9 + $0x580] sm:$0xf]  ;;  %v9900_v23 = vld [vmem:[%s14206_s9 + $0x30c] sm:$0xf] }
 0x1de   :  { %v7446_v37 = vor.u32 %v9851_v27, %v7443_v28  ;;  %v7955_v40 = vld [vmem:[%s14206_s9 + $0x5c0] sm:$0xf0]  ;;  %v9843_v41 = vld [vmem:[%s14206_s9 + $0x13c] sm:$0xf0] }
 0x1df   :  { %1056 = vmatpush.bf16.msra.mxu0 %v6978_v51  ;;  %1069 = vmatpush.bf16.msra.mxu1 %v7170_v52  ;;  %v10051_v51 = vld [vmem:[%s14206_s9 + $0x7bc] sm:$0xf0]  ;;  %v10043_v52 = vld [vmem:[%s14206_s9 + $0x784] sm:$0xf] }
 0x1e0   :  { %1082 = vmatpush.bf16.msrb.mxu2 %v6982_v55  ;;  %1095 = vmatpush.bf16.msrb.mxu3 %v7174_v56  ;;  %v9899_v55 = vld [vmem:[%s14206_s9 + $0x304] sm:$0xf]  ;;  %v8210_v57 = vor.u32 %v10051_v51, %v8209_v48  ;;  %v8214_v58 = vor.u32 %v10043_v52, %v8211_v53  ;;  %v7382_v48 = vor.u32 %v9835_v42, %v7379_v43  ;;  %v9827_v52 = vld [vmem:[%s14206_s9 + $0xbc] sm:$0xf0] }
 0x1e1   :  { %1009 = vmatmul.bf16.vlgmr.msrb.gmra.mxu0 %v10958_v11  ;;  %1022 = vmatmul.bf16.vlgmr.msrb.gmra.mxu1 %v10960_v12  ;;  %v7635_v56 = vld [vmem:[%s14206_s9 + $0x340] sm:$0xf0] }
 0x1e2   :  { %1035 = vmatmul.bf16.vlgmr.msra.gmra.mxu2 %v10958_v11  ;;  %1048 = vmatmul.bf16.vlgmr.msra.gmra.mxu3 %v10960_v12  ;;  %v7638_v62 = vor.u32 %v9899_v55, %v7635_v56  ;;  %v7891_v51 = vld [vmem:[%s14206_s9 + $0x540] sm:$0xf0] }
 0x1e3   :  { %1057 = vmatpush.bf16.msra.mxu0 %v6954_v63  ;;  %1070 = vmatpush.bf16.msra.mxu1 %v7146_v0  ;;  %v10035_v63 = vld [vmem:[%s14206_s9 + $0x73c] sm:$0xf0]  ;;  %v10027_v0 = vld [vmem:[%s14206_s9 + $0x704] sm:$0xf] }
 0x1e4   :  { %1083 = vmatpush.bf16.msrb.mxu2 %v6958_v3  ;;  %1096 = vmatpush.bf16.msrb.mxu3 %v7150_v4  ;;  %v9883_v3 = vld [vmem:[%s14206_s9 + $0x284] sm:$0xf]  ;;  %v8146_v5 = vor.u32 %v10035_v63, %v8145_v60  ;;  %v8150_v6 = vor.u32 %v10027_v0, %v8147_v1 }
 0x1e5   :  { %v7571_v4 = vld [vmem:[%s14206_s9 + $0x2c0] sm:$0xf0] }
 0x1e6   :  { %v7574_v10 = vor.u32 %v9883_v3, %v7571_v4  ;;  %v9819_v53 = vld [vmem:[%s14206_s9 + $0x84] sm:$0xf]  ;;  %v7705_v3 = vld [vmem:[%s14206_s9 + $0x388] sm:$0xf] }
 0x1e7   :  { %1058 = vmatpush.bf16.msra.mxu0 %v6930_v13  ;;  %1071 = vmatpush.bf16.msra.mxu1 %v7122_v14  ;;  %v8083_v13 = vld [vmem:[%s14206_s9 + $0x6c0] sm:$0xf0]  ;;  %v9875_v14 = vld [vmem:[%s14206_s9 + $0x23c] sm:$0xf0]  ;;  %v9924_v4 = vld [vmem:[%s14206_s9 + $0x3c4] sm:$0xf0] }
 0x1e8   :  { %1084 = vmatpush.bf16.msrb.mxu2 %v6934_v17  ;;  %1097 = vmatpush.bf16.msrb.mxu3 %v7126_v18  ;;  %v7506_v21 = vor.u32 %v9875_v14, %v7505_v7  ;;  %v9947_v63 = vld [vmem:[%s14206_s9 + $0x484] sm:$0xf] }
 0x1e9   :  { %v7827_v0 = vld [vmem:[%s14206_s9 + $0x4c0] sm:$0xf0] }
 0x1ea   :  { %v9803_v1 = vld [vmem:[%s14206_s9 + $0x4] sm:$0xf] }
 0x1eb   :  { %1059 = vmatpush.bf16.msra.mxu0 %v6906_v25  ;;  %1072 = vmatpush.bf16.msra.mxu1 %v7098_v26  ;;  %v8019_v25 = vld [vmem:[%s14206_s9 + $0x640] sm:$0xf0]  ;;  %v9859_v26 = vld [vmem:[%s14206_s9 + $0x1bc] sm:$0xf0] }
 0x1ec   :  { %1085 = vmatpush.bf16.msrb.mxu2 %v6910_v31  ;;  %1098 = vmatpush.bf16.msrb.mxu3 %v7102_v32  ;;  %v8022_v31 = vor.u32 %v9995_v24, %v8019_v25  ;;  %v7377_v32 = vld [vmem:[%s14206_s9 + $0x100] sm:$0xf]  ;;  %v7442_v34 = vor.u32 %v9859_v26, %v7441_v19  ;;  %v9931_v14 = vld [vmem:[%s14206_s9 + $0x404] sm:$0xf]  ;;  %v10052_v19 = vld [vmem:[%s14206_s9 + $0x7c4] sm:$0xf0] }
 0x1ed   :  { %v7378_v47 = vor.u32 %v9843_v41, %v7377_v32  ;;  %v7643_v24 = vld [vmem:[%s14206_s9 + $0x348] sm:$0xf0]  ;;  %v7766_v26 = vor.u32 %v9931_v14, %v7763_v15  ;;  %v8218_v27 = vor.u32 %v10052_v19, %v8217_v16 }
 0x1ee   :  { %v7579_v41 = vld [vmem:[%s14206_s9 + $0x2c8] sm:$0xf0] }
 0x1ef   :  { %1060 = vmatpush.bf16.msra.mxu0 %v6882_v30  ;;  %1073 = vmatpush.bf16.msra.mxu1 %v7074_v44  ;;  %v7954_v30 = vor.u32 %v9987_v38, %v7953_v33  ;;  %v7958_v44 = vor.u32 %v9979_v39, %v7955_v40  ;;  %v7646_v33 = vor.u32 %v9900_v23, %v7643_v24  ;;  %v8155_v38 = vld [vmem:[%s14206_s9 + $0x748] sm:$0xf0]  ;;  %v9892_v39 = vld [vmem:[%s14206_s9 + $0x2c4] sm:$0xf0] }
 0x1f0   :  { %1086 = vmatpush.bf16.msrb.mxu2 %v6886_v45  ;;  %1099 = vmatpush.bf16.msrb.mxu3 %v7078_v46  ;;  %v7313_v45 = vld [vmem:[%s14206_s9 + $0x80] sm:$0xf]  ;;  %v9884_v40 = vld [vmem:[%s14206_s9 + $0x28c] sm:$0xf]  ;;  %v7897_v23 = vld [vmem:[%s14206_s9 + $0x508] sm:$0xf] }
 0x1f1   :  { %v7889_v46 = vld [vmem:[%s14206_s9 + $0x500] sm:$0xf]  ;;  %v7314_v60 = vor.u32 %v9827_v52, %v7313_v45  ;;  %v7515_v52 = vld [vmem:[%s14206_s9 + $0x248] sm:$0xf0]  ;;  %v9972_v24 = vld [vmem:[%s14206_s9 + $0x544] sm:$0xf0] }
 0x1f2   :  { %1061 = vmatmul.bf16.vlgmr.msra.gmra.mxu0 %v10958_v11  ;;  %1074 = vmatmul.bf16.vlgmr.msra.gmra.mxu1 %v10960_v12  ;;  %v7963_v15 = vld [vmem:[%s14206_s9 + $0x5c8] sm:$0xf0] }
 0x1f3   :  { %2643 = vmatpush.bf16.msrb.mxu0 %v7698_v49  ;;  %1087 = vmatmul.bf16.vlgmr.msrb.gmra.mxu2 %v10958_v11  ;;  %v10019_v11 = vld [vmem:[%s14206_s9 + $0x6bc] sm:$0xf0]  ;;  %v9820_v19 = vld [vmem:[%s14206_s9 + $0x8c] sm:$0xf] }
 0x1f4   :  { %2669 = vmatpush.bf16.msra.mxu2 %v7702_v50  ;;  %1100 = vmatmul.bf16.vlgmr.msrb.gmra.mxu3 %v10960_v12  ;;  %v10011_v12 = vld [vmem:[%s14206_s9 + $0x684] sm:$0xf]  ;;  %v8082_v17 = vor.u32 %v10019_v11, %v8081_v8  ;;  %v9971_v49 = vld [vmem:[%s14206_s9 + $0x53c] sm:$0xf0]  ;;  %v7830_v8 = vor.u32 %v9947_v63, %v7827_v0  ;;  %v9852_v63 = vld [vmem:[%s14206_s9 + $0x18c] sm:$0xf] }
 0x1f5   :  { %2656 = vmatpush.bf16.msrb.mxu1 %v8210_v57  ;;  %2682 = vmatpush.bf16.msra.mxu3 %v8214_v58  ;;  %v8086_v18 = vor.u32 %v10011_v12, %v8083_v13  ;;  %v9963_v50 = vld [vmem:[%s14206_s9 + $0x504] sm:$0xf]  ;;  %v7890_v55 = vor.u32 %v9971_v49, %v7889_v46  ;;  %v7249_v57 = vld [vmem:[%s14206_s9] sm:$0xf]  ;;  %v7254_v12 = vor.u32 %v9803_v1, %v7251_v2  ;;  %v7641_v13 = vld [vmem:[%s14206_s9 + $0x308] sm:$0xf] }
 0x1f6   :  { %v7894_v56 = vor.u32 %v9963_v50, %v7891_v51  ;;  %v9811_v58 = vld [vmem:[%s14206_s9 + $0x3c] sm:$0xf0]  ;;  %v7582_v46 = vor.u32 %v9884_v40, %v7579_v41  ;;  %v8091_v49 = vld [vmem:[%s14206_s9 + $0x6c8] sm:$0xf0]  ;;  %v9876_v50 = vld [vmem:[%s14206_s9 + $0x244] sm:$0xf0] }
 0x1f7   :  { %2644 = vmatpush.bf16.msrb.mxu0 %v7634_v61  ;;  %v7318_v61 = vor.u32 %v9819_v53, %v7315_v54  ;;  %v7250_v11 = vor.u32 %v9811_v58, %v7249_v57  ;;  %v9868_v51 = vld [vmem:[%s14206_s9 + $0x20c] sm:$0xf] }
 0x1f8   :  { %2670 = vmatpush.bf16.msra.mxu2 %v7638_v62  ;;  %v9955_v62 = vld [vmem:[%s14206_s9 + $0x4bc] sm:$0xf0]  ;;  %v7518_v58 = vor.u32 %v9868_v51, %v7515_v52  ;;  %v7451_v0 = vld [vmem:[%s14206_s9 + $0x1c8] sm:$0xf0] }
 0x1f9   :  { %2657 = vmatpush.bf16.msrb.mxu1 %v8146_v5  ;;  %2683 = vmatpush.bf16.msra.mxu3 %v8150_v6  ;;  %v9916_v5 = vld [vmem:[%s14206_s9 + $0x38c] sm:$0xf]  ;;  %v7826_v7 = vor.u32 %v9955_v62, %v7825_v59  ;;  %v10004_v59 = vld [vmem:[%s14206_s9 + $0x644] sm:$0xf0] }
 0x1fa   :  { %v7707_v6 = vld [vmem:[%s14206_s9 + $0x3c8] sm:$0xf0]  ;;  %v9860_v62 = vld [vmem:[%s14206_s9 + $0x1c4] sm:$0xf0] }
 0x1fb   :  { %2645 = vmatpush.bf16.msrb.mxu0 %v7570_v9  ;;  %v7761_v9 = vld [vmem:[%s14206_s9 + $0x400] sm:$0xf]  ;;  %v9948_v40 = vld [vmem:[%s14206_s9 + $0x48c] sm:$0xf] }
 0x1fc   :  { %2671 = vmatpush.bf16.msra.mxu2 %v7574_v10  ;;  %v9939_v10 = vld [vmem:[%s14206_s9 + $0x43c] sm:$0xf0] }
 0x1fd   :  { %2658 = vmatpush.bf16.msrb.mxu1 %v8082_v17  ;;  %2684 = vmatpush.bf16.msra.mxu3 %v8086_v18  ;;  %v7706_v17 = vor.u32 %v9924_v4, %v7705_v3  ;;  %v7710_v18 = vor.u32 %v9916_v5, %v7707_v6  ;;  %v7762_v25 = vor.u32 %v9939_v10, %v7761_v9  ;;  %v7385_v5 = vld [vmem:[%s14206_s9 + $0x108] sm:$0xf] }
 0x1fe   :  { %v7454_v4 = vor.u32 %v9852_v63, %v7451_v0  ;;  %v9844_v6 = vld [vmem:[%s14206_s9 + $0x144] sm:$0xf0]  ;;  %v9909_v0 = vld [vmem:[%s14206_s9 + $0x34c] sm:$0xf0] }
 0x1ff   :  { %2646 = vmatpush.bf16.msrb.mxu0 %v7506_v21  ;;  %v8219_v21 = vld [vmem:[%s14206_s9 + $0x7c8] sm:$0xf0]  ;;  %v7386_v9 = vor.u32 %v9844_v6, %v7385_v5  ;;  %v8225_v5 = vld [vmem:[%s14206_s9 + $0x790] sm:$0xf] }
 0x200   :  { %2672 = vmatpush.bf16.msra.mxu2 %v7510_v22  ;;  %v9908_v22 = vld [vmem:[%s14206_s9 + $0x344] sm:$0xf0]  ;;  %v8222_v28 = vor.u32 %v10044_v20, %v8219_v21  ;;  %v7323_v21 = vld [vmem:[%s14206_s9 + $0xc8] sm:$0xf0]  ;;  %v10053_v6 = vld [vmem:[%s14206_s9 + $0x7cc] sm:$0xf0] }
 0x201   :  { %2659 = vmatpush.bf16.msrb.mxu1 %v8018_v29  ;;  %2685 = vmatpush.bf16.msra.mxu3 %v8022_v31  ;;  %v7577_v29 = vld [vmem:[%s14206_s9 + $0x288] sm:$0xf]  ;;  %v7642_v32 = vor.u32 %v9908_v22, %v7641_v13  ;;  %v9980_v13 = vld [vmem:[%s14206_s9 + $0x58c] sm:$0xf]  ;;  %v7326_v22 = vor.u32 %v9820_v19, %v7323_v21  ;;  %v8226_v19 = vor.u32 %v10053_v6, %v8225_v5 }
 0x202   :  { %v8153_v31 = vld [vmem:[%s14206_s9 + $0x708] sm:$0xf]  ;;  %v7578_v45 = vor.u32 %v9892_v39, %v7577_v29  ;;  %v7966_v16 = vor.u32 %v9980_v13, %v7963_v15  ;;  %v8227_v13 = vld [vmem:[%s14206_s9 + $0x7d0] sm:$0xf0]  ;;  %v9893_v15 = vld [vmem:[%s14206_s9 + $0x2cc] sm:$0xf0] }
 0x203   :  { %2647 = vmatpush.bf16.msrb.mxu0 %v7442_v34  ;;  %v10036_v34 = vld [vmem:[%s14206_s9 + $0x744] sm:$0xf0] }
 0x204   :  { %2673 = vmatpush.bf16.msra.mxu2 %v7446_v37  ;;  %v10028_v37 = vld [vmem:[%s14206_s9 + $0x70c] sm:$0xf]  ;;  %v8154_v42 = vor.u32 %v10036_v34, %v8153_v31  ;;  %v7257_v29 = vld [vmem:[%s14206_s9 + $0x8] sm:$0xf] }
 0x205   :  { %2660 = vmatpush.bf16.msrb.mxu1 %v7954_v30  ;;  %2686 = vmatpush.bf16.msra.mxu3 %v7958_v44  ;;  %v8158_v43 = vor.u32 %v10028_v37, %v8155_v38  ;;  %v7513_v30 = vld [vmem:[%s14206_s9 + $0x208] sm:$0xf]  ;;  %v7259_v34 = vld [vmem:[%s14206_s9 + $0x48] sm:$0xf0] }
 0x206   :  { %v8089_v44 = vld [vmem:[%s14206_s9 + $0x688] sm:$0xf]  ;;  %v7514_v57 = vor.u32 %v9876_v50, %v7513_v30 }
 0x207   :  { %2648 = vmatpush.bf16.msrb.mxu0 %v7378_v47  ;;  %v10020_v47 = vld [vmem:[%s14206_s9 + $0x6c4] sm:$0xf0] }
 0x208   :  { %2674 = vmatpush.bf16.msra.mxu2 %v7382_v48  ;;  %v10012_v48 = vld [vmem:[%s14206_s9 + $0x68c] sm:$0xf]  ;;  %v8090_v53 = vor.u32 %v10020_v47, %v8089_v44  ;;  %v9812_v31 = vld [vmem:[%s14206_s9 + $0x44] sm:$0xf0] }
 0x209   :  { %2661 = vmatpush.bf16.msrb.mxu1 %v7890_v55  ;;  %2687 = vmatpush.bf16.msra.mxu3 %v7894_v56  ;;  %v8094_v54 = vor.u32 %v10012_v48, %v8091_v49  ;;  %v7449_v55 = vld [vmem:[%s14206_s9 + $0x188] sm:$0xf]  ;;  %v7771_v47 = vld [vmem:[%s14206_s9 + $0x448] sm:$0xf0]  ;;  %v11358_v49 = vld [vmem:[#allocation4] sm:$0x3f] }
 0x20a   :  { %v8025_v56 = vld [vmem:[%s14206_s9 + $0x608] sm:$0xf]  ;;  %v7450_v3 = vor.u32 %v9860_v62, %v7449_v55  ;;  %v457_v50 = vperm.slane %v11358_v49, 0  ;;  %v9925_v55 = vld [vmem:[%s14206_s9 + $0x3cc] sm:$0xf0]  ;;  %v459_v21 = vperm.slane %v11358_v49, 2 }
 0x20b   :  { %2649 = vmatpush.bf16.msrb.mxu0 %v7314_v60  ;;  %v9996_v60 = vld [vmem:[%s14206_s9 + $0x60c] sm:$0xf]  ;;  %v8026_v1 = vor.u32 %v10004_v59, %v8025_v56  ;;  %v7833_v38 = vld [vmem:[%s14206_s9 + $0x488] sm:$0xf]  ;;  %v9917_v56 = vld [vmem:[%s14206_s9 + $0x394] sm:$0xf] }
 0x20c   :  { %2675 = vmatpush.bf16.msra.mxu2 %v7318_v61  ;;  %v8027_v61 = vld [vmem:[%s14206_s9 + $0x648] sm:$0xf0]  ;;  %v9956_v39 = vld [vmem:[%s14206_s9 + $0x4c4] sm:$0xf0]  ;;  %v458_v59 = vperm.slane %v11358_v49, 1 }
 0x20d   :  { %2662 = vmatpush.bf16.msrb.mxu1 %v7826_v7  ;;  %2688 = vmatpush.bf16.msra.mxu3 %v7830_v8  ;;  %v8030_v2 = vor.u32 %v9996_v60, %v8027_v61  ;;  %v9836_v7 = vld [vmem:[%s14206_s9 + $0x10c] sm:$0xf]  ;;  %v7834_v41 = vor.u32 %v9956_v39, %v7833_v38  ;;  %v7769_v30 = vld [vmem:[%s14206_s9 + $0x408] sm:$0xf]  ;;  %v7649_v62 = vld [vmem:[%s14206_s9 + $0x310] sm:$0xf] }
 0x20e   :  { %v7387_v8 = vld [vmem:[%s14206_s9 + $0x148] sm:$0xf0]  ;;  %v9940_v44 = vld [vmem:[%s14206_s9 + $0x444] sm:$0xf0] }
 0x20f   :  { %2650 = vmatpush.bf16.msrb.mxu0 %v7250_v11  ;;  %v7390_v10 = vor.u32 %v9836_v7, %v7387_v8  ;;  %v7961_v11 = vld [vmem:[%s14206_s9 + $0x588] sm:$0xf] }
 0x210   :  { %2676 = vmatpush.bf16.msra.mxu2 %v7254_v12  ;;  %v9988_v12 = vld [vmem:[%s14206_s9 + $0x5c4] sm:$0xf0] }
 0x211   :  { %2663 = vmatpush.bf16.msrb.mxu1 %v7762_v25  ;;  %2689 = vmatpush.bf16.msra.mxu3 %v7766_v26  ;;  %v7962_v14 = vor.u32 %v9988_v12, %v7961_v11  ;;  %v9964_v25 = vld [vmem:[%s14206_s9 + $0x50c] sm:$0xf]  ;;  %v7898_v26 = vor.u32 %v9972_v24, %v7897_v23  ;;  %v10045_v12 = vld [vmem:[%s14206_s9 + $0x794] sm:$0xf]  ;;  %v10037_v23 = vld [vmem:[%s14206_s9 + $0x74c] sm:$0xf0] }
 0x213   :  { %2695 = vmatpush.bf16.msra.mxu0 %v7706_v17  ;;  %v7321_v17 = vld [vmem:[%s14206_s9 + $0x88] sm:$0xf] }
 0x214   :  { %2721 = vmatpush.bf16.msrb.mxu2 %v7710_v18  ;;  %v9828_v18 = vld [vmem:[%s14206_s9 + $0xc4] sm:$0xf0] }
 0x215   :  { %2708 = vmatpush.bf16.msra.mxu1 %v8218_v27  ;;  %2734 = vmatpush.bf16.msrb.mxu3 %v8222_v28  ;;  %v7322_v20 = vor.u32 %v9828_v18, %v7321_v17  ;;  %v7899_v27 = vld [vmem:[%s14206_s9 + $0x548] sm:$0xf0]  ;;  %v7587_v17 = vld [vmem:[%s14206_s9 + $0x2d0] sm:$0xf0] }
 0x216   :  { %v7902_v28 = vor.u32 %v9964_v25, %v7899_v27  ;;  %v10029_v27 = vld [vmem:[%s14206_s9 + $0x714] sm:$0xf] }
 0x217   :  { %2696 = vmatpush.bf16.msra.mxu0 %v7642_v32  ;;  %v7258_v32 = vor.u32 %v9812_v31, %v7257_v29  ;;  %v7521_v29 = vld [vmem:[%s14206_s9 + $0x210] sm:$0xf] }
 0x218   :  { %2722 = vmatpush.bf16.msrb.mxu2 %v7646_v33  ;;  %v9804_v33 = vld [vmem:[%s14206_s9 + $0xc] sm:$0xf]  ;;  %v9877_v31 = vld [vmem:[%s14206_s9 + $0x24c] sm:$0xf0] }
 0x219   :  { %2709 = vmatpush.bf16.msra.mxu1 %v8154_v42  ;;  %2735 = vmatpush.bf16.msrb.mxu3 %v8158_v43  ;;  %v7262_v37 = vor.u32 %v9804_v33, %v7259_v34  ;;  %v7835_v42 = vld [vmem:[%s14206_s9 + $0x4c8] sm:$0xf0]  ;;  %v7523_v33 = vld [vmem:[%s14206_s9 + $0x250] sm:$0xf0] }
 0x21a   :  { %v7838_v43 = vor.u32 %v9948_v40, %v7835_v42  ;;  %v8097_v40 = vld [vmem:[%s14206_s9 + $0x690] sm:$0xf] }
 0x21b   :  { %2697 = vmatpush.bf16.msra.mxu0 %v7578_v45  ;;  %v7770_v45 = vor.u32 %v9940_v44, %v7769_v30  ;;  %v10021_v44 = vld [vmem:[%s14206_s9 + $0x6cc] sm:$0xf0] }
 0x21c   :  { %2723 = vmatpush.bf16.msrb.mxu2 %v7582_v46  ;;  %v9932_v46 = vld [vmem:[%s14206_s9 + $0x40c] sm:$0xf] }
 0x21d   :  { %2710 = vmatpush.bf16.msra.mxu1 %v8090_v53  ;;  %2736 = vmatpush.bf16.msrb.mxu3 %v8094_v54  ;;  %v7774_v48 = vor.u32 %v9932_v46, %v7771_v47  ;;  %v7713_v53 = vld [vmem:[%s14206_s9 + $0x390] sm:$0xf]  ;;  %v8099_v46 = vld [vmem:[%s14206_s9 + $0x6d0] sm:$0xf0] }
 0x21e   :  { %v7714_v60 = vor.u32 %v9925_v55, %v7713_v53 }
 0x21f   :  { %2698 = vmatpush.bf16.msra.mxu0 %v7514_v57  ;;  %v7715_v57 = vld [vmem:[%s14206_s9 + $0x3d0] sm:$0xf0] }
 0x220   :  { %2724 = vmatpush.bf16.msrb.mxu2 %v7518_v58  ;;  %v7718_v61 = vor.u32 %v9917_v56, %v7715_v57  ;;  %v460_v56 = vperm.slane %v11358_v49, 3  ;;  %v8033_v57 = vld [vmem:[%s14206_s9 + $0x610] sm:$0xf] }
 0x221   :  { %2711 = vmatpush.bf16.msra.mxu1 %v8026_v1  ;;  %2737 = vmatpush.bf16.msrb.mxu3 %v8030_v2  ;;  %v9901_v1 = vld [vmem:[%s14206_s9 + $0x314] sm:$0xf] }
 0x222   :  { %v7651_v2 = vld [vmem:[%s14206_s9 + $0x350] sm:$0xf0] }
 0x223   :  { %2699 = vmatpush.bf16.msra.mxu0 %v7450_v3  ;;  %v7654_v11 = vor.u32 %v9901_v1, %v7651_v2  ;;  %v9845_v1 = vld [vmem:[%s14206_s9 + $0x14c] sm:$0xf0]  ;;  %v9837_v2 = vld [vmem:[%s14206_s9 + $0x114] sm:$0xf] }
 0x224   :  { %2725 = vmatpush.bf16.msrb.mxu2 %v7454_v4 }
 0x225   :  { %2712 = vmatpush.bf16.msra.mxu1 %v7962_v14  ;;  %2738 = vmatpush.bf16.msrb.mxu3 %v7966_v16  ;;  %v7585_v14 = vld [vmem:[%s14206_s9 + $0x290] sm:$0xf]  ;;  %v9885_v16 = vld [vmem:[%s14206_s9 + $0x294] sm:$0xf] }
 0x226   :  { %v7586_v25 = vor.u32 %v9893_v15, %v7585_v14  ;;  %v7971_v14 = vld [vmem:[%s14206_s9 + $0x5d0] sm:$0xf0] }
 0x227   :  { %2700 = vmatpush.bf16.msra.mxu0 %v7386_v9 }
 0x228   :  { %2726 = vmatpush.bf16.msrb.mxu2 %v7390_v10  ;;  %v7650_v10 = vor.u32 %v9909_v0, %v7649_v62  ;;  %v7393_v0 = vld [vmem:[%s14206_s9 + $0x110] sm:$0xf] }
 0x229   :  { %2713 = vmatpush.bf16.msra.mxu1 %v7898_v26  ;;  %2739 = vmatpush.bf16.msrb.mxu3 %v7902_v28  ;;  %v7590_v26 = vor.u32 %v9885_v16, %v7587_v17  ;;  %v8163_v28 = vld [vmem:[%s14206_s9 + $0x750] sm:$0xf0]  ;;  %v7394_v15 = vor.u32 %v9845_v1, %v7393_v0  ;;  %v7329_v17 = vld [vmem:[%s14206_s9 + $0x90] sm:$0xf] }
 0x22a   :  { %v8166_v39 = vor.u32 %v10029_v27, %v8163_v28  ;;  %v461_v27 = vperm.slane %v11358_v49, 4  ;;  %v9965_v28 = vld [vmem:[%s14206_s9 + $0x514] sm:$0xf] }
 0x22b   :  { %2701 = vmatpush.bf16.msra.mxu0 %v7322_v20  ;;  %v8230_v20 = vor.u32 %v10045_v12, %v8227_v13  ;;  %v9989_v12 = vld [vmem:[%s14206_s9 + $0x5cc] sm:$0xf0]  ;;  %v9981_v13 = vld [vmem:[%s14206_s9 + $0x594] sm:$0xf] }
 0x22c   :  { %2727 = vmatpush.bf16.msrb.mxu2 %v7326_v22  ;;  %v8161_v22 = vld [vmem:[%s14206_s9 + $0x710] sm:$0xf] }
 0x22d   :  { %2714 = vmatpush.bf16.msra.mxu1 %v7834_v41  ;;  %2740 = vmatpush.bf16.msrb.mxu3 %v7838_v43  ;;  %v8162_v38 = vor.u32 %v10037_v23, %v8161_v22  ;;  %v7522_v43 = vor.u32 %v9877_v31, %v7521_v29  ;;  %v7974_v23 = vor.u32 %v9981_v13, %v7971_v14  ;;  %v7907_v29 = vld [vmem:[%s14206_s9 + $0x550] sm:$0xf0]  ;;  %v7593_v13 = vld [vmem:[%s14206_s9 + $0x298] sm:$0xf] }
 0x22f   :  { %2702 = vmatpush.bf16.msra.mxu0 %v7258_v32  ;;  %v9869_v32 = vld [vmem:[%s14206_s9 + $0x214] sm:$0xf] }
 0x230   :  { %2728 = vmatpush.bf16.msrb.mxu2 %v7262_v37  ;;  %v7526_v30 = vor.u32 %v9869_v32, %v7523_v33  ;;  %v7265_v33 = vld [vmem:[%s14206_s9 + $0x10] sm:$0xf] }
 0x231   :  { %2715 = vmatpush.bf16.msra.mxu1 %v7770_v45  ;;  %2741 = vmatpush.bf16.msrb.mxu3 %v7774_v48  ;;  %v10013_v45 = vld [vmem:[%s14206_s9 + $0x694] sm:$0xf]  ;;  %v7457_v48 = vld [vmem:[%s14206_s9 + $0x190] sm:$0xf] }
 0x232   :  { %v8102_v55 = vor.u32 %v10013_v45, %v8099_v46  ;;  %v7723_v45 = vld [vmem:[%s14206_s9 + $0x3d8] sm:$0xf0]  ;;  %v7841_v46 = vld [vmem:[%s14206_s9 + $0x490] sm:$0xf] }
 0x24e   :  { %v958_v51 = vpop.f32.mrf.mxu0  ;;  %v971_v52 = vpop.f32.mrf.mxu1 }
 0x24f   :  { %v959_v54 = vadd.f32 %v958_v51, %v457_v50  ;;  %v9861_v50 = vld [vmem:[%s14206_s9 + $0x1cc] sm:$0xf0]  ;;  %v9853_v51 = vld [vmem:[%s14206_s9 + $0x194] sm:$0xf] }
 0x251   :  { %v972_v58 = vadd.f32 %v971_v52, %v959_v54  ;;  %v7459_v52 = vld [vmem:[%s14206_s9 + $0x1d0] sm:$0xf0]  ;;  %v8098_v54 = vor.u32 %v10021_v44, %v8097_v40  ;;  %v9926_v40 = vld [vmem:[%s14206_s9 + $0x3d4] sm:$0xf0]  ;;  %v9918_v44 = vld [vmem:[%s14206_s9 + $0x39c] sm:$0xf] }
 0x252   :  { %v7462_v62 = vor.u32 %v9853_v51, %v7459_v52 }
 0x253   :  { %v11377_v63 = vpack.c.bf16 %v972_v58, %v972_v58  ;;  %v10005_v58 = vld [vmem:[%s14206_s9 + $0x64c] sm:$0xf0] }
 0x254   :  { %v8034_v6 = vor.u32 %v10005_v58, %v8033_v57 }
 0x255   :  { %v984_v3 = vpop.f32.mrf.mxu2  ;;  %v997_v4 = vpop.f32.mrf.mxu3  ;;  %2651 = vmatmul.bf16.vlgmr.msrb.gmra.mxu0 %v11377_v63  ;;  %2677 = vmatmul.bf16.vlgmr.msra.gmra.mxu2 %v11377_v63 }
 0x256   :  { %v985_v7 = vadd.f32 %v984_v3, %v458_v59  ;;  %2747 = vmatpush.bf16.msrb.mxu0 %v7714_v60  ;;  %2773 = vmatpush.bf16.msra.mxu2 %v7718_v61  ;;  %v960_v8 = vpop.f32.mrf.mxu0  ;;  %v973_v9 = vpop.f32.mrf.mxu1  ;;  %v9997_v59 = vld [vmem:[%s14206_s9 + $0x614] sm:$0xf]  ;;  %v7458_v61 = vor.u32 %v9861_v50, %v7457_v48 }
 0x257   :  { %v8035_v60 = vld [vmem:[%s14206_s9 + $0x650] sm:$0xf0]  ;;  %v7969_v8 = vld [vmem:[%s14206_s9 + $0x590] sm:$0xf] }
 0x258   :  { %v998_v18 = vadd.f32 %v997_v4, %v985_v7  ;;  %v7395_v3 = vld [vmem:[%s14206_s9 + $0x150] sm:$0xf0]  ;;  %v8038_v7 = vor.u32 %v9997_v59, %v8035_v60  ;;  %v7970_v22 = vor.u32 %v9989_v12, %v7969_v8  ;;  %v7726_v59 = vor.u32 %v9918_v44, %v7723_v45  ;;  %v7657_v60 = vld [vmem:[%s14206_s9 + $0x318] sm:$0xf]  ;;  %v10014_v45 = vld [vmem:[%s14206_s9 + $0x69c] sm:$0xf] }
 0x259   :  { %v7398_v16 = vor.u32 %v9837_v2, %v7395_v3  ;;  %v9949_v48 = vld [vmem:[%s14206_s9 + $0x494] sm:$0xf]  ;;  %v7777_v2 = vld [vmem:[%s14206_s9 + $0x410] sm:$0xf]  ;;  %v10054_v8 = vld [vmem:[%s14206_s9 + $0x7d4] sm:$0xf0] }
 0x25a   :  { %v11421_v24 = vpack.c.bf16 %v998_v18, %v998_v18  ;;  %2748 = vmatpush.bf16.msrb.mxu0 %v7650_v10  ;;  %2774 = vmatpush.bf16.msra.mxu2 %v7654_v11  ;;  %v7843_v50 = vld [vmem:[%s14206_s9 + $0x4d0] sm:$0xf0]  ;;  %v9941_v3 = vld [vmem:[%s14206_s9 + $0x44c] sm:$0xf0]  ;;  %v10022_v44 = vld [vmem:[%s14206_s9 + $0x6d4] sm:$0xf0] }
 0x25b   :  { %v7846_v1 = vor.u32 %v9949_v48, %v7843_v50  ;;  %v7778_v14 = vor.u32 %v9941_v3, %v7777_v2  ;;  %v7465_v50 = vld [vmem:[%s14206_s9 + $0x198] sm:$0xf]  ;;  %v9838_v3 = vld [vmem:[%s14206_s9 + $0x11c] sm:$0xf] }
 0x25c   :  { %2664 = vmatmul.bf16.vlgmr.msrb.gmra.mxu1 %v11421_v24  ;;  %2690 = vmatmul.bf16.vlgmr.msra.gmra.mxu3 %v11421_v24  ;;  %v9846_v2 = vld [vmem:[%s14206_s9 + $0x154] sm:$0xf0] }
 0x25d   :  { %2760 = vmatpush.bf16.msrb.mxu1 %v8226_v19  ;;  %2786 = vmatpush.bf16.msra.mxu3 %v8230_v20  ;;  %v986_v34 = vpop.f32.mrf.mxu2  ;;  %v999_v37 = vpop.f32.mrf.mxu3  ;;  %v9829_v19 = vld [vmem:[%s14206_s9 + $0xcc] sm:$0xf0]  ;;  %v9821_v20 = vld [vmem:[%s14206_s9 + $0x94] sm:$0xf] }
 0x25e   :  { %2749 = vmatpush.bf16.msrb.mxu0 %v7586_v25  ;;  %2775 = vmatpush.bf16.msra.mxu2 %v7590_v26  ;;  %v1010_v41 = vpop.f32.mrf.mxu0  ;;  %v1023_v42 = vpop.f32.mrf.mxu1  ;;  %v7905_v25 = vld [vmem:[%s14206_s9 + $0x510] sm:$0xf]  ;;  %v7330_v31 = vor.u32 %v9829_v19, %v7329_v17  ;;  %v9805_v37 = vld [vmem:[%s14206_s9 + $0x14] sm:$0xf]  ;;  %v9886_v17 = vld [vmem:[%s14206_s9 + $0x29c] sm:$0xf] }
 0x25f   :  { %v1011_v47 = vadd.f32 %v1010_v41, %v459_v21  ;;  %v7331_v21 = vld [vmem:[%s14206_s9 + $0xd0] sm:$0xf0]  ;;  %v9973_v26 = vld [vmem:[%s14206_s9 + $0x54c] sm:$0xf0]  ;;  %v7595_v19 = vld [vmem:[%s14206_s9 + $0x2d8] sm:$0xf0] }
 0x260   :  { %v7334_v32 = vor.u32 %v9821_v20, %v7331_v21  ;;  %v9813_v34 = vld [vmem:[%s14206_s9 + $0x4c] sm:$0xf0] }
 0x261   :  { %v11467_v53 = vadd.f32 %v1023_v42, %v1011_v47  ;;  %2761 = vmatpush.bf16.msrb.mxu1 %v8162_v38  ;;  %2787 = vmatpush.bf16.msra.mxu3 %v8166_v39  ;;  %v7267_v38 = vld [vmem:[%s14206_s9 + $0x50] sm:$0xf0]  ;;  %v7721_v39 = vld [vmem:[%s14206_s9 + $0x398] sm:$0xf]  ;;  %v9957_v47 = vld [vmem:[%s14206_s9 + $0x4cc] sm:$0xf0] }
 0x262   :  { %2750 = vmatpush.bf16.msrb.mxu0 %v7522_v43  ;;  %2776 = vmatpush.bf16.msra.mxu2 %v7526_v30  ;;  %v7906_v43 = vor.u32 %v9973_v26, %v7905_v25  ;;  %v7910_v30 = vor.u32 %v9965_v28, %v7907_v29  ;;  %v7722_v58 = vor.u32 %v9926_v40, %v7721_v39  ;;  %v8169_v25 = vld [vmem:[%s14206_s9 + $0x718] sm:$0xf]  ;;  %v9870_v40 = vld [vmem:[%s14206_s9 + $0x21c] sm:$0xf] }
 0x263   :  { %v7842_v0 = vor.u32 %v9957_v47, %v7841_v46  ;;  %v10038_v29 = vld [vmem:[%s14206_s9 + $0x754] sm:$0xf0]  ;;  %v8107_v46 = vld [vmem:[%s14206_s9 + $0x6d8] sm:$0xf0] }
 0x264   :  { %v9878_v39 = vld [vmem:[%s14206_s9 + $0x254] sm:$0xf0] }
 0x265   :  { %2762 = vmatpush.bf16.msrb.mxu1 %v8098_v54  ;;  %2788 = vmatpush.bf16.msra.mxu3 %v8102_v55  ;;  %v1036_v4 = vpop.f32.mrf.mxu2  ;;  %v1049_v5 = vpop.f32.mrf.mxu3  ;;  %v7266_v54 = vor.u32 %v9813_v34, %v7265_v33  ;;  %v7270_v55 = vor.u32 %v9805_v37, %v7267_v38  ;;  %v7598_v34 = vor.u32 %v9886_v17, %v7595_v19  ;;  %v7529_v37 = vld [vmem:[%s14206_s9 + $0x218] sm:$0xf]  ;;  %v7339_v17 = vld [vmem:[%s14206_s9 + $0xd8] sm:$0xf0] }
 0x266   :  { %v1037_v9 = vadd.f32 %v1036_v4, %v460_v56  ;;  %2703 = vmatmul.bf16.vlgmr.msra.gmra.mxu0 %v11377_v63  ;;  %2729 = vmatmul.bf16.vlgmr.msrb.gmra.mxu2 %v11377_v63  ;;  %v1012_v10 = vpop.f32.mrf.mxu0  ;;  %v1025_v11 = vpop.f32.mrf.mxu1  ;;  %v462_v56 = vperm.slane %v11358_v49, 5  ;;  %v7659_v49 = vld [vmem:[%s14206_s9 + $0x358] sm:$0xf0]  ;;  %v7530_v47 = vor.u32 %v9878_v39, %v7529_v37 }
 0x267   :  { %2751 = vmatpush.bf16.msrb.mxu0 %v7458_v61  ;;  %2777 = vmatpush.bf16.msra.mxu2 %v7462_v62  ;;  %v9910_v61 = vld [vmem:[%s14206_s9 + $0x354] sm:$0xf0]  ;;  %v9902_v62 = vld [vmem:[%s14206_s9 + $0x31c] sm:$0xf] }
 0x268   :  { %v11511_v18 = vadd.f32 %v1049_v5, %v1037_v9  ;;  %v9933_v5 = vld [vmem:[%s14206_s9 + $0x414] sm:$0xf]  ;;  %v10046_v9 = vld [vmem:[%s14206_s9 + $0x79c] sm:$0xf]  ;;  %v7658_v11 = vor.u32 %v9910_v61, %v7657_v60  ;;  %v7662_v12 = vor.u32 %v9902_v62, %v7659_v49  ;;  %v10006_v60 = vld [vmem:[%s14206_s9 + $0x654] sm:$0xf0] }
 0x269   :  { %2763 = vmatpush.bf16.msrb.mxu1 %v8034_v6  ;;  %2789 = vmatpush.bf16.msra.mxu3 %v8038_v7  ;;  %v7779_v6 = vld [vmem:[%s14206_s9 + $0x450] sm:$0xf0]  ;;  %v8233_v7 = vld [vmem:[%s14206_s9 + $0x798] sm:$0xf]  ;;  %v8235_v10 = vld [vmem:[%s14206_s9 + $0x7d8] sm:$0xf0] }
 0x26a   :  { %v9998_v61 = vld [vmem:[%s14206_s9 + $0x61c] sm:$0xf]  ;;  %v7401_v49 = vld [vmem:[%s14206_s9 + $0x118] sm:$0xf] }
 0x26b   :  { %2752 = vmatpush.bf16.msrb.mxu0 %v7394_v15  ;;  %2778 = vmatpush.bf16.msra.mxu2 %v7398_v16  ;;  %v7782_v15 = vor.u32 %v9933_v5, %v7779_v6  ;;  %v9894_v16 = vld [vmem:[%s14206_s9 + $0x2d4] sm:$0xf0]  ;;  %v8043_v62 = vld [vmem:[%s14206_s9 + $0x658] sm:$0xf0] }
 0x26c   :  { %2716 = vmatmul.bf16.vlgmr.msra.gmra.mxu1 %v11421_v24  ;;  %2742 = vmatmul.bf16.vlgmr.msrb.gmra.mxu3 %v11421_v24  ;;  %v7594_v33 = vor.u32 %v9894_v16, %v7593_v13  ;;  %v7403_v5 = vld [vmem:[%s14206_s9 + $0x158] sm:$0xf0] }
 0x26d   :  { %2764 = vmatpush.bf16.msrb.mxu1 %v7970_v22  ;;  %2790 = vmatpush.bf16.msra.mxu3 %v7974_v23  ;;  %v1038_v41 = vpop.f32.mrf.mxu2  ;;  %v1051_v42 = vpop.f32.mrf.mxu3  ;;  %v8234_v22 = vor.u32 %v10054_v8, %v8233_v7  ;;  %v8238_v23 = vor.u32 %v10046_v9, %v8235_v10  ;;  %v8046_v7 = vor.u32 %v9998_v61, %v8043_v62  ;;  %v7977_v8 = vld [vmem:[%s14206_s9 + $0x598] sm:$0xf]  ;;  %v9982_v10 = vld [vmem:[%s14206_s9 + $0x59c] sm:$0xf]  ;;  %v8241_v61 = vld [vmem:[%s14206_s9 + $0x7a0] sm:$0xf] }
 0x26e   :  { %v7531_v41 = vld [vmem:[%s14206_s9 + $0x258] sm:$0xf0]  ;;  %v8170_v42 = vor.u32 %v10038_v29, %v8169_v25  ;;  %v9990_v9 = vld [vmem:[%s14206_s9 + $0x5d4] sm:$0xf0]  ;;  %v7406_v13 = vor.u32 %v9838_v3, %v7403_v5  ;;  %v10055_v62 = vld [vmem:[%s14206_s9 + $0x7dc] sm:$0xf0] }
 0x26f   :  { %2753 = vmatpush.bf16.msrb.mxu0 %v7330_v31  ;;  %2779 = vmatpush.bf16.msra.mxu2 %v7334_v32  ;;  %v1062_v51 = vpop.f32.mrf.mxu0  ;;  %v1075_v52 = vpop.f32.mrf.mxu1  ;;  %v10030_v31 = vld [vmem:[%s14206_s9 + $0x71c] sm:$0xf]  ;;  %v7534_v48 = vor.u32 %v9870_v40, %v7531_v41  ;;  %v7978_v19 = vor.u32 %v9990_v9, %v7977_v8  ;;  %v9814_v29 = vld [vmem:[%s14206_s9 + $0x54] sm:$0xf0]  ;;  %v9919_v40 = vld [vmem:[%s14206_s9 + $0x3a4] sm:$0xf]  ;;  %v8242_v8 = vor.u32 %v10055_v62, %v8241_v61 }
 0x270   :  { %v1063_v57 = vadd.f32 %v1062_v51, %v461_v27  ;;  %v8171_v32 = vld [vmem:[%s14206_s9 + $0x758] sm:$0xf0]  ;;  %v9862_v51 = vld [vmem:[%s14206_s9 + $0x1d4] sm:$0xf0]  ;;  %v7731_v41 = vld [vmem:[%s14206_s9 + $0x3e0] sm:$0xf0] }
 0x271   :  { %2765 = vmatpush.bf16.msrb.mxu1 %v7906_v43  ;;  %2791 = vmatpush.bf16.msra.mxu3 %v7910_v30  ;;  %v8174_v43 = vor.u32 %v10030_v31, %v8171_v32  ;;  %v8105_v30 = vld [vmem:[%s14206_s9 + $0x698] sm:$0xf]  ;;  %v9822_v16 = vld [vmem:[%s14206_s9 + $0x9c] sm:$0xf]  ;;  %v7345_v61 = vld [vmem:[%s14206_s9 + $0xa0] sm:$0xf] }
 0x272   :  { %v11592_v4 = vadd.f32 %v1075_v52, %v1063_v57  ;;  %v9854_v52 = vld [vmem:[%s14206_s9 + $0x19c] sm:$0xf]  ;;  %v8106_v57 = vor.u32 %v10022_v44, %v8105_v30  ;;  %v9831_v62 = vld [vmem:[%s14206_s9 + $0xdc] sm:$0xf0] }
 0x273   :  { %2754 = vmatpush.bf16.msrb.mxu0 %v7266_v54  ;;  %2780 = vmatpush.bf16.msra.mxu2 %v7270_v55  ;;  %v7467_v54 = vld [vmem:[%s14206_s9 + $0x1d8] sm:$0xf0] }
 0x274   :  { %v7915_v25 = vld [vmem:[%s14206_s9 + $0x558] sm:$0xf0] }
 0x275   :  { %2766 = vmatpush.bf16.msrb.mxu1 %v7842_v0  ;;  %2792 = vmatpush.bf16.msra.mxu3 %v7846_v1  ;;  %v7466_v0 = vor.u32 %v9862_v51, %v7465_v50  ;;  %v7470_v1 = vor.u32 %v9854_v52, %v7467_v54  ;;  %v9806_v31 = vld [vmem:[%s14206_s9 + $0x1c] sm:$0xf]  ;;  %v7665_v50 = vld [vmem:[%s14206_s9 + $0x320] sm:$0xf]  ;;  %v9903_v52 = vld [vmem:[%s14206_s9 + $0x324] sm:$0xf] }
 0x276   :  { %v1088_v20 = vpop.f32.mrf.mxu2  ;;  %2755 = vmatmul.bf16.vlgmr.msrb.gmra.mxu0 %v11377_v63  ;;  %2781 = vmatmul.bf16.vlgmr.msra.gmra.mxu2 %v11377_v63  ;;  %v7275_v32 = vld [vmem:[%s14206_s9 + $0x58] sm:$0xf0]  ;;  %v9911_v51 = vld [vmem:[%s14206_s9 + $0x35c] sm:$0xf0] }
 0x277   :  { %2799 = vmatpush.bf16.msra.mxu0 %v7722_v58  ;;  %2825 = vmatpush.bf16.msrb.mxu2 %v7726_v59  ;;  %v1101_v21 = vpop.f32.mrf.mxu3  ;;  %v1089_v26 = vadd.f32 %v1088_v20, %v462_v56  ;;  %v1064_v27 = vpop.f32.mrf.mxu0  ;;  %v8110_v58 = vor.u32 %v10014_v45, %v8107_v46  ;;  %v8041_v59 = vld [vmem:[%s14206_s9 + $0x618] sm:$0xf]  ;;  %v9950_v30 = vld [vmem:[%s14206_s9 + $0x49c] sm:$0xf]  ;;  %v7278_v46 = vor.u32 %v9806_v31, %v7275_v32 }
 0x278   :  { %v1077_v28 = vpop.f32.mrf.mxu1  ;;  %v8042_v6 = vor.u32 %v10006_v60, %v8041_v59  ;;  %v7342_v27 = vor.u32 %v9822_v16, %v7339_v17  ;;  %v7851_v44 = vld [vmem:[%s14206_s9 + $0x4d8] sm:$0xf0] }
 0x279   :  { %v11641_v38 = vadd.f32 %v1101_v21, %v1089_v26  ;;  %2767 = vmatpush.bf16.msrb.mxu1 %v7778_v14  ;;  %2793 = vmatpush.bf16.msra.mxu3 %v7782_v15  ;;  %v7337_v14 = vld [vmem:[%s14206_s9 + $0x98] sm:$0xf]  ;;  %v9934_v59 = vld [vmem:[%s14206_s9 + $0x41c] sm:$0xf] }
 0x27a   :  { %v9830_v15 = vld [vmem:[%s14206_s9 + $0xd4] sm:$0xf0]  ;;  %v7787_v60 = vld [vmem:[%s14206_s9 + $0x458] sm:$0xf0] }
 0x27b   :  { %2800 = vmatpush.bf16.msra.mxu0 %v7658_v11  ;;  %2826 = vmatpush.bf16.msrb.mxu2 %v7662_v12  ;;  %v7979_v11 = vld [vmem:[%s14206_s9 + $0x5d8] sm:$0xf0]  ;;  %v7402_v12 = vor.u32 %v9846_v2, %v7401_v49  ;;  %v7913_v21 = vld [vmem:[%s14206_s9 + $0x518] sm:$0xf]  ;;  %v7338_v26 = vor.u32 %v9830_v15, %v7337_v14  ;;  %v7666_v49 = vor.u32 %v9911_v51, %v7665_v50  ;;  %v10031_v14 = vld [vmem:[%s14206_s9 + $0x724] sm:$0xf] }
 0x27c   :  { %2768 = vmatmul.bf16.vlgmr.msrb.gmra.mxu1 %v11421_v24  ;;  %2794 = vmatmul.bf16.vlgmr.msra.gmra.mxu3 %v11421_v24  ;;  %v7982_v20 = vor.u32 %v9982_v10, %v7979_v11  ;;  %v7273_v28 = vld [vmem:[%s14206_s9 + $0x18] sm:$0xf]  ;;  %v7790_v5 = vor.u32 %v9934_v59, %v7787_v60  ;;  %v9887_v10 = vld [vmem:[%s14206_s9 + $0x2a4] sm:$0xf] }
 0x27d   :  { %2812 = vmatpush.bf16.msra.mxu1 %v8234_v22  ;;  %2838 = vmatpush.bf16.msrb.mxu3 %v8238_v23  ;;  %v9974_v22 = vld [vmem:[%s14206_s9 + $0x554] sm:$0xf0]  ;;  %v9966_v23 = vld [vmem:[%s14206_s9 + $0x51c] sm:$0xf]  ;;  %v7274_v45 = vor.u32 %v9814_v29, %v7273_v28  ;;  %v7603_v11 = vld [vmem:[%s14206_s9 + $0x2e0] sm:$0xf0] }
 0x27e   :  { %v1090_v55 = vpop.f32.mrf.mxu2  ;;  %v7914_v37 = vor.u32 %v9974_v22, %v7913_v21  ;;  %v7918_v39 = vor.u32 %v9966_v23, %v7915_v25  ;;  %v8179_v15 = vld [vmem:[%s14206_s9 + $0x760] sm:$0xf0]  ;;  %v7606_v17 = vor.u32 %v9887_v10, %v7603_v11  ;;  %v7281_v10 = vld [vmem:[%s14206_s9 + $0x20] sm:$0xf] }
 0x27f   :  { %2801 = vmatpush.bf16.msra.mxu0 %v7594_v33  ;;  %2827 = vmatpush.bf16.msrb.mxu2 %v7598_v34  ;;  %v1103_v56 = vpop.f32.mrf.mxu3  ;;  %v7729_v33 = vld [vmem:[%s14206_s9 + $0x3a0] sm:$0xf]  ;;  %v7854_v55 = vor.u32 %v9950_v30, %v7851_v44  ;;  %v8182_v22 = vor.u32 %v10031_v14, %v8179_v15  ;;  %v9871_v23 = vld [vmem:[%s14206_s9 + $0x224] sm:$0xf] }
 0x280   :  { %v9927_v34 = vld [vmem:[%s14206_s9 + $0x3dc] sm:$0xf0]  ;;  %v7667_v56 = vld [vmem:[%s14206_s9 + $0x360] sm:$0xf0] }
 0x281   :  { %2813 = vmatpush.bf16.msra.mxu1 %v8170_v42  ;;  %2839 = vmatpush.bf16.msrb.mxu3 %v8174_v43  ;;  %v7849_v42 = vld [vmem:[%s14206_s9 + $0x498] sm:$0xf]  ;;  %v7670_v2 = vor.u32 %v9903_v52, %v7667_v56  ;;  %v7539_v25 = vld [vmem:[%s14206_s9 + $0x260] sm:$0xf0]  ;;  %v9991_v56 = vld [vmem:[%s14206_s9 + $0x5dc] sm:$0xf0] }
 0x282   :  { %v9958_v43 = vld [vmem:[%s14206_s9 + $0x4d4] sm:$0xf0]  ;;  %v10015_v28 = vld [vmem:[%s14206_s9 + $0x6a4] sm:$0xf]  ;;  %v7542_v32 = vor.u32 %v9871_v23, %v7539_v25  ;;  %v9815_v11 = vld [vmem:[%s14206_s9 + $0x5c] sm:$0xf0] }
 0x283   :  { %2802 = vmatpush.bf16.msra.mxu0 %v7530_v47  ;;  %2828 = vmatpush.bf16.msrb.mxu2 %v7534_v48  ;;  %v7730_v47 = vor.u32 %v9927_v34, %v7729_v33  ;;  %v7734_v48 = vor.u32 %v9919_v40, %v7731_v41  ;;  %v7850_v54 = vor.u32 %v9958_v43, %v7849_v42  ;;  %v8115_v29 = vld [vmem:[%s14206_s9 + $0x6e0] sm:$0xf0]  ;;  %v7473_v33 = vld [vmem:[%s14206_s9 + $0x1a0] sm:$0xf] }
 0x284   :  { %v9863_v34 = vld [vmem:[%s14206_s9 + $0x1dc] sm:$0xf0]  ;;  %v9855_v40 = vld [vmem:[%s14206_s9 + $0x1a4] sm:$0xf] }
 0x285   :  { %2814 = vmatpush.bf16.msra.mxu1 %v8106_v57  ;;  %2840 = vmatpush.bf16.msrb.mxu3 %v8110_v58  ;;  %v7785_v57 = vld [vmem:[%s14206_s9 + $0x418] sm:$0xf]  ;;  %v7475_v41 = vld [vmem:[%s14206_s9 + $0x1e0] sm:$0xf0]  ;;  %v8049_v42 = vld [vmem:[%s14206_s9 + $0x620] sm:$0xf] }
 0x286   :  { %v9942_v58 = vld [vmem:[%s14206_s9 + $0x454] sm:$0xf0]  ;;  %v10007_v43 = vld [vmem:[%s14206_s9 + $0x65c] sm:$0xf0]  ;;  %v9999_v30 = vld [vmem:[%s14206_s9 + $0x624] sm:$0xf] }
 0x287   :  { %2803 = vmatpush.bf16.msra.mxu0 %v7466_v0  ;;  %2829 = vmatpush.bf16.msrb.mxu2 %v7470_v1  ;;  %v10047_v0 = vld [vmem:[%s14206_s9 + $0x7a4] sm:$0xf]  ;;  %v7786_v3 = vor.u32 %v9942_v58, %v7785_v57  ;;  %v8050_v50 = vor.u32 %v10007_v43, %v8049_v42 }
 0x288   :  { %v8243_v1 = vld [vmem:[%s14206_s9 + $0x7e0] sm:$0xf0] }
 0x289   :  { %2815 = vmatpush.bf16.msra.mxu1 %v8042_v6  ;;  %2841 = vmatpush.bf16.msrb.mxu3 %v8046_v7  ;;  %v7601_v6 = vld [vmem:[%s14206_s9 + $0x2a0] sm:$0xf]  ;;  %v8246_v9 = vor.u32 %v10047_v0, %v8243_v1  ;;  %v8051_v44 = vld [vmem:[%s14206_s9 + $0x660] sm:$0xf0] }
 0x28a   :  { %v9895_v7 = vld [vmem:[%s14206_s9 + $0x2dc] sm:$0xf0]  ;;  %v8054_v51 = vor.u32 %v9999_v30, %v8051_v44  ;;  %v9839_v52 = vld [vmem:[%s14206_s9 + $0x124] sm:$0xf]  ;;  %v8249_v30 = vld [vmem:[%s14206_s9 + $0x7a8] sm:$0xf] }
 0x28b   :  { %2804 = vmatpush.bf16.msra.mxu0 %v7402_v12  ;;  %2830 = vmatpush.bf16.msrb.mxu2 %v7406_v13  ;;  %v8177_v12 = vld [vmem:[%s14206_s9 + $0x720] sm:$0xf]  ;;  %v7602_v16 = vor.u32 %v9895_v7, %v7601_v6  ;;  %v9983_v57 = vld [vmem:[%s14206_s9 + $0x5a4] sm:$0xf]  ;;  %v10056_v44 = vld [vmem:[%s14206_s9 + $0x7e4] sm:$0xf0] }
 0x28c   :  { %v10039_v13 = vld [vmem:[%s14206_s9 + $0x75c] sm:$0xf0]  ;;  %v7987_v58 = vld [vmem:[%s14206_s9 + $0x5e0] sm:$0xf0] }
 0x28d   :  { %2816 = vmatpush.bf16.msra.mxu1 %v7978_v19  ;;  %2842 = vmatpush.bf16.msrb.mxu3 %v7982_v20  ;;  %v7537_v19 = vld [vmem:[%s14206_s9 + $0x220] sm:$0xf]  ;;  %v8178_v21 = vor.u32 %v10039_v13, %v8177_v12  ;;  %v7990_v1 = vor.u32 %v9983_v57, %v7987_v58  ;;  %v9967_v6 = vld [vmem:[%s14206_s9 + $0x524] sm:$0xf]  ;;  %v9888_v57 = vld [vmem:[%s14206_s9 + $0x2ac] sm:$0xf] }
 0x28e   :  { %v9879_v20 = vld [vmem:[%s14206_s9 + $0x25c] sm:$0xf0]  ;;  %v7923_v7 = vld [vmem:[%s14206_s9 + $0x560] sm:$0xf0]  ;;  %v7611_v58 = vld [vmem:[%s14206_s9 + $0x2e8] sm:$0xf0] }
 0x28f   :  { %2805 = vmatpush.bf16.msra.mxu0 %v7338_v26  ;;  %2831 = vmatpush.bf16.msrb.mxu2 %v7342_v27  ;;  %v8113_v26 = vld [vmem:[%s14206_s9 + $0x6a0] sm:$0xf]  ;;  %v7538_v31 = vor.u32 %v9879_v20, %v7537_v19  ;;  %v9807_v12 = vld [vmem:[%s14206_s9 + $0x24] sm:$0xf]  ;;  %v7926_v14 = vor.u32 %v9967_v6, %v7923_v7  ;;  %v9920_v19 = vld [vmem:[%s14206_s9 + $0x3ac] sm:$0xf] }
 0x290   :  { %v10023_v27 = vld [vmem:[%s14206_s9 + $0x6dc] sm:$0xf0]  ;;  %v7283_v15 = vld [vmem:[%s14206_s9 + $0x60] sm:$0xf0]  ;;  %v7739_v20 = vld [vmem:[%s14206_s9 + $0x3e8] sm:$0xf0] }
 0x291   :  { %2817 = vmatpush.bf16.msra.mxu1 %v7914_v37  ;;  %2843 = vmatpush.bf16.msrb.mxu3 %v7918_v39  ;;  %v8114_v37 = vor.u32 %v10023_v27, %v8113_v26  ;;  %v8118_v39 = vor.u32 %v10015_v28, %v8115_v29  ;;  %v9951_v23 = vld [vmem:[%s14206_s9 + $0x4a4] sm:$0xf]  ;;  %v7282_v26 = vor.u32 %v9815_v11, %v7281_v10  ;;  %v9872_v6 = vld [vmem:[%s14206_s9 + $0x22c] sm:$0xf] }
 0x292   :  { %v7859_v25 = vld [vmem:[%s14206_s9 + $0x4e0] sm:$0xf0]  ;;  %v7286_v27 = vor.u32 %v9807_v12, %v7283_v15  ;;  %v7742_v29 = vor.u32 %v9920_v19, %v7739_v20  ;;  %v7547_v7 = vld [vmem:[%s14206_s9 + $0x268] sm:$0xf0]  ;;  %v9864_v15 = vld [vmem:[%s14206_s9 + $0x1e4] sm:$0xf0] }
 0x293   :  { %2806 = vmatpush.bf16.msra.mxu0 %v7274_v45  ;;  %2832 = vmatpush.bf16.msrb.mxu2 %v7278_v46  ;;  %v7474_v45 = vor.u32 %v9863_v34, %v7473_v33  ;;  %v7478_v46 = vor.u32 %v9855_v40, %v7475_v41  ;;  %v9904_v33 = vld [vmem:[%s14206_s9 + $0x32c] sm:$0xf]  ;;  %v7793_v40 = vld [vmem:[%s14206_s9 + $0x420] sm:$0xf]  ;;  %v9935_v42 = vld [vmem:[%s14206_s9 + $0x424] sm:$0xf] }
 0x294   :  { %v9943_v41 = vld [vmem:[%s14206_s9 + $0x45c] sm:$0xf0]  ;;  %v7795_v43 = vld [vmem:[%s14206_s9 + $0x460] sm:$0xf0]  ;;  %v10016_v10 = vld [vmem:[%s14206_s9 + $0x6ac] sm:$0xf] }
 0x295   :  { %2818 = vmatpush.bf16.msra.mxu1 %v7850_v54  ;;  %2844 = vmatpush.bf16.msrb.mxu3 %v7854_v55  ;;  %v7411_v54 = vld [vmem:[%s14206_s9 + $0x160] sm:$0xf0]  ;;  %v7985_v55 = vld [vmem:[%s14206_s9 + $0x5a0] sm:$0xf]  ;;  %v8123_v11 = vld [vmem:[%s14206_s9 + $0x6e8] sm:$0xf0] }
 0x296   :  { %2807 = vmatmul.bf16.vlgmr.msra.gmra.mxu0 %v11377_v63  ;;  %2833 = vmatmul.bf16.vlgmr.msrb.gmra.mxu2 %v11377_v63  ;;  %v7414_v60 = vor.u32 %v9839_v52, %v7411_v54  ;;  %v7986_v0 = vor.u32 %v9991_v56, %v7985_v55  ;;  %v7609_v52 = vld [vmem:[%s14206_s9 + $0x2a8] sm:$0xf]  ;;  %v8250_v55 = vor.u32 %v10056_v44, %v8249_v30  ;;  %v9856_v19 = vld [vmem:[%s14206_s9 + $0x1ac] sm:$0xf] }
 0x297   :  { %2851 = vmatpush.bf16.msrb.mxu0 %v7730_v47  ;;  %2877 = vmatpush.bf16.msra.mxu2 %v7734_v48  ;;  %v7409_v47 = vld [vmem:[%s14206_s9 + $0x120] sm:$0xf]  ;;  %v9896_v54 = vld [vmem:[%s14206_s9 + $0x2e4] sm:$0xf0]  ;;  %v7483_v20 = vld [vmem:[%s14206_s9 + $0x1e8] sm:$0xf0] }
 0x298   :  { %v9847_v48 = vld [vmem:[%s14206_s9 + $0x15c] sm:$0xf0]  ;;  %v7353_v30 = vld [vmem:[%s14206_s9 + $0xa8] sm:$0xf] }
 0x299   :  { %2819 = vmatpush.bf16.msra.mxu1 %v7786_v3  ;;  %2845 = vmatpush.bf16.msrb.mxu3 %v7790_v5  ;;  %v7410_v59 = vor.u32 %v9847_v48, %v7409_v47  ;;  %v7921_v3 = vld [vmem:[%s14206_s9 + $0x520] sm:$0xf]  ;;  %v9832_v44 = vld [vmem:[%s14206_s9 + $0xe4] sm:$0xf0] }
 0x29a   :  { %v9975_v5 = vld [vmem:[%s14206_s9 + $0x55c] sm:$0xf0] }
 0x29b   :  { %2852 = vmatpush.bf16.msrb.mxu0 %v7666_v49  ;;  %2878 = vmatpush.bf16.msra.mxu2 %v7670_v2  ;;  %v9823_v49 = vld [vmem:[%s14206_s9 + $0xa4] sm:$0xf]  ;;  %v7922_v13 = vor.u32 %v9975_v5, %v7921_v3 }
 0x29c   :  { %2820 = vmatmul.bf16.vlgmr.msra.gmra.mxu1 %v11421_v24  ;;  %2846 = vmatmul.bf16.vlgmr.msrb.gmra.mxu3 %v11421_v24  ;;  %v7347_v2 = vld [vmem:[%s14206_s9 + $0xe0] sm:$0xf0] }
 0x29d   :  { %2864 = vmatpush.bf16.msrb.mxu1 %v8242_v8  ;;  %2890 = vmatpush.bf16.msra.mxu3 %v8246_v9  ;;  %v7346_v8 = vor.u32 %v9831_v62, %v7345_v61  ;;  %v7350_v9 = vor.u32 %v9823_v49, %v7347_v2  ;;  %v10032_v61 = vld [vmem:[%s14206_s9 + $0x72c] sm:$0xf]  ;;  %v7545_v49 = vld [vmem:[%s14206_s9 + $0x228] sm:$0xf] }
 0x29e   :  { %v8187_v62 = vld [vmem:[%s14206_s9 + $0x768] sm:$0xf0]  ;;  %v9880_v2 = vld [vmem:[%s14206_s9 + $0x264] sm:$0xf0] }
 0x29f   :  { %2853 = vmatpush.bf16.msrb.mxu0 %v7602_v16  ;;  %2879 = vmatpush.bf16.msra.mxu2 %v7606_v17  ;;  %v7737_v16 = vld [vmem:[%s14206_s9 + $0x3a8] sm:$0xf]  ;;  %v8190_v5 = vor.u32 %v10032_v61, %v8187_v62  ;;  %v7546_v12 = vor.u32 %v9880_v2, %v7545_v49  ;;  %v7291_v62 = vld [vmem:[%s14206_s9 + $0x68] sm:$0xf0]  ;;  %v9921_v49 = vld [vmem:[%s14206_s9 + $0x3b4] sm:$0xf] }
 0x2a0   :  { %v9928_v17 = vld [vmem:[%s14206_s9 + $0x3e4] sm:$0xf0]  ;;  %v7747_v2 = vld [vmem:[%s14206_s9 + $0x3f0] sm:$0xf0] }
 0x2a1   :  { %2865 = vmatpush.bf16.msrb.mxu1 %v8178_v21  ;;  %2891 = vmatpush.bf16.msra.mxu3 %v8182_v22  ;;  %v7857_v21 = vld [vmem:[%s14206_s9 + $0x4a0] sm:$0xf]  ;;  %v7738_v28 = vor.u32 %v9928_v17, %v7737_v16  ;;  %v8126_v17 = vor.u32 %v10016_v10, %v8123_v11  ;;  %v7750_v11 = vor.u32 %v9921_v49, %v7747_v2  ;;  %v9857_v2 = vld [vmem:[%s14206_s9 + $0x1b4] sm:$0xf] }
 0x2a2   :  { %v9959_v22 = vld [vmem:[%s14206_s9 + $0x4dc] sm:$0xf0] }
 0x2a3   :  { %2854 = vmatpush.bf16.msrb.mxu0 %v7538_v31  ;;  %2880 = vmatpush.bf16.msra.mxu2 %v7542_v32  ;;  %v7673_v31 = vld [vmem:[%s14206_s9 + $0x328] sm:$0xf]  ;;  %v7858_v34 = vor.u32 %v9959_v22, %v7857_v21 }
 0x2a4   :  { %v9912_v32 = vld [vmem:[%s14206_s9 + $0x364] sm:$0xf0] }
 0x2a5   :  { %2866 = vmatpush.bf16.msrb.mxu1 %v8114_v37  ;;  %2892 = vmatpush.bf16.msra.mxu3 %v8118_v39  ;;  %v7862_v37 = vor.u32 %v9951_v23, %v7859_v25  ;;  %v7675_v39 = vld [vmem:[%s14206_s9 + $0x368] sm:$0xf0]  ;;  %v7674_v47 = vor.u32 %v9912_v32, %v7673_v31  ;;  %v8057_v21 = vld [vmem:[%s14206_s9 + $0x628] sm:$0xf] }
 0x2a6   :  { %v7678_v48 = vor.u32 %v9904_v33, %v7675_v39  ;;  %v10008_v22 = vld [vmem:[%s14206_s9 + $0x664] sm:$0xf0]  ;;  %v10000_v23 = vld [vmem:[%s14206_s9 + $0x62c] sm:$0xf] }
 0x2a7   :  { %2855 = vmatpush.bf16.msrb.mxu0 %v7474_v45  ;;  %2881 = vmatpush.bf16.msra.mxu2 %v7478_v46  ;;  %v10048_v45 = vld [vmem:[%s14206_s9 + $0x7ac] sm:$0xf]  ;;  %v8058_v31 = vor.u32 %v10008_v22, %v8057_v21  ;;  %v9992_v39 = vld [vmem:[%s14206_s9 + $0x5e4] sm:$0xf0] }
 0x2a8   :  { %v8251_v46 = vld [vmem:[%s14206_s9 + $0x7e8] sm:$0xf0] }
 0x2a9   :  { %2867 = vmatpush.bf16.msrb.mxu1 %v8050_v50  ;;  %2893 = vmatpush.bf16.msra.mxu3 %v8054_v51  ;;  %v7794_v50 = vor.u32 %v9943_v41, %v7793_v40  ;;  %v7798_v51 = vor.u32 %v9935_v42, %v7795_v43  ;;  %v8254_v56 = vor.u32 %v10048_v45, %v8251_v46  ;;  %v8059_v25 = vld [vmem:[%s14206_s9 + $0x668] sm:$0xf0] }
 0x2aa   :  { %v8062_v32 = vor.u32 %v10000_v23, %v8059_v25  ;;  %v9840_v33 = vld [vmem:[%s14206_s9 + $0x12c] sm:$0xf]  ;;  %v8257_v23 = vld [vmem:[%s14206_s9 + $0x7b0] sm:$0xf] }
 0x2ab   :  { %2856 = vmatpush.bf16.msrb.mxu0 %v7410_v59  ;;  %2882 = vmatpush.bf16.msra.mxu2 %v7414_v60  ;;  %v8185_v59 = vld [vmem:[%s14206_s9 + $0x728] sm:$0xf]  ;;  %v9984_v40 = vld [vmem:[%s14206_s9 + $0x5ac] sm:$0xf]  ;;  %v10057_v25 = vld [vmem:[%s14206_s9 + $0x7ec] sm:$0xf0] }
 0x2ac   :  { %v10040_v60 = vld [vmem:[%s14206_s9 + $0x764] sm:$0xf0]  ;;  %v7995_v41 = vld [vmem:[%s14206_s9 + $0x5e8] sm:$0xf0] }
 0x2ad   :  { %2868 = vmatpush.bf16.msrb.mxu1 %v7986_v0  ;;  %2894 = vmatpush.bf16.msra.mxu3 %v7990_v1  ;;  %v7610_v0 = vor.u32 %v9896_v54, %v7609_v52  ;;  %v7614_v1 = vor.u32 %v9888_v57, %v7611_v58  ;;  %v8186_v3 = vor.u32 %v10040_v60, %v8185_v59  ;;  %v9968_v52 = vld [vmem:[%s14206_s9 + $0x52c] sm:$0xf]  ;;  %v7289_v57 = vld [vmem:[%s14206_s9 + $0x28] sm:$0xf] }
 0x2ae   :  { %v7998_v46 = vor.u32 %v9984_v40, %v7995_v41  ;;  %v7931_v54 = vld [vmem:[%s14206_s9 + $0x568] sm:$0xf0]  ;;  %v9816_v58 = vld [vmem:[%s14206_s9 + $0x64] sm:$0xf0]  ;;  %v9889_v40 = vld [vmem:[%s14206_s9 + $0x2b4] sm:$0xf] }
 0x2af   :  { %2857 = vmatpush.bf16.msrb.mxu0 %v7346_v8  ;;  %2883 = vmatpush.bf16.msra.mxu2 %v7350_v9  ;;  %v8121_v8 = vld [vmem:[%s14206_s9 + $0x6a8] sm:$0xf]  ;;  %v9808_v59 = vld [vmem:[%s14206_s9 + $0x2c] sm:$0xf]  ;;  %v7934_v61 = vor.u32 %v9968_v52, %v7931_v54  ;;  %v7619_v41 = vld [vmem:[%s14206_s9 + $0x2f0] sm:$0xf0] }
 0x2b0   :  { %v10024_v9 = vld [vmem:[%s14206_s9 + $0x6e4] sm:$0xf0]  ;;  %v9936_v21 = vld [vmem:[%s14206_s9 + $0x42c] sm:$0xf]  ;;  %v9873_v54 = vld [vmem:[%s14206_s9 + $0x234] sm:$0xf] }
 0x2b1   :  { %2869 = vmatpush.bf16.msrb.mxu1 %v7922_v13  ;;  %2895 = vmatpush.bf16.msra.mxu3 %v7926_v14  ;;  %v7550_v13 = vor.u32 %v9872_v6, %v7547_v7  ;;  %v7481_v14 = vld [vmem:[%s14206_s9 + $0x1a8] sm:$0xf]  ;;  %v8122_v16 = vor.u32 %v10024_v9, %v8121_v8  ;;  %v9952_v6 = vld [vmem:[%s14206_s9 + $0x4ac] sm:$0xf]  ;;  %v7290_v8 = vor.u32 %v9816_v58, %v7289_v57  ;;  %v10025_v57 = vld [vmem:[%s14206_s9 + $0x6ec] sm:$0xf0] }
 0x2b2   :  { %v7867_v7 = vld [vmem:[%s14206_s9 + $0x4e8] sm:$0xf0]  ;;  %v7294_v9 = vor.u32 %v9808_v59, %v7291_v62  ;;  %v10017_v58 = vld [vmem:[%s14206_s9 + $0x6b4] sm:$0xf]  ;;  %v7489_v62 = vld [vmem:[%s14206_s9 + $0x1b0] sm:$0xf] }
 0x2b3   :  { %2858 = vmatpush.bf16.msrb.mxu0 %v7282_v26  ;;  %2884 = vmatpush.bf16.msra.mxu2 %v7286_v27  ;;  %v7482_v26 = vor.u32 %v9864_v15, %v7481_v14  ;;  %v7486_v27 = vor.u32 %v9856_v19, %v7483_v20  ;;  %v9905_v14 = vld [vmem:[%s14206_s9 + $0x334] sm:$0xf]  ;;  %v7801_v19 = vld [vmem:[%s14206_s9 + $0x428] sm:$0xf]  ;;  %v7803_v22 = vld [vmem:[%s14206_s9 + $0x468] sm:$0xf0] }
 0x2b4   :  { %v9944_v20 = vld [vmem:[%s14206_s9 + $0x464] sm:$0xf0]  ;;  %v8131_v59 = vld [vmem:[%s14206_s9 + $0x6f0] sm:$0xf0] }
 0x2b5   :  { %2870 = vmatpush.bf16.msrb.mxu1 %v7858_v34  ;;  %2896 = vmatpush.bf16.msra.mxu3 %v7862_v37  ;;  %v7419_v34 = vld [vmem:[%s14206_s9 + $0x168] sm:$0xf0]  ;;  %v7993_v37 = vld [vmem:[%s14206_s9 + $0x5a8] sm:$0xf]  ;;  %v8134_v49 = vor.u32 %v10017_v58, %v8131_v59  ;;  %v9930_v58 = vld [vmem:[%s14206_s9 + $0x3f4] sm:$0xf0] }
 0x2b6   :  { %2859 = vmatmul.bf16.vlgmr.msrb.gmra.mxu0 %v11377_v63  ;;  %2885 = vmatmul.bf16.vlgmr.msra.gmra.mxu2 %v11377_v63  ;;  %v7422_v43 = vor.u32 %v9840_v33, %v7419_v34  ;;  %v7994_v45 = vor.u32 %v9992_v39, %v7993_v37  ;;  %v7617_v33 = vld [vmem:[%s14206_s9 + $0x2b0] sm:$0xf]  ;;  %v8258_v37 = vor.u32 %v10057_v25, %v8257_v23  ;;  %v9985_v23 = vld [vmem:[%s14206_s9 + $0x5b4] sm:$0xf]  ;;  %v9922_v59 = vld [vmem:[%s14206_s9 + $0x3bc] sm:$0xf] }
 0x2b7   :  { %2903 = vmatpush.bf16.msra.mxu0 %v7738_v28  ;;  %2929 = vmatpush.bf16.msrb.mxu2 %v7742_v29  ;;  %v7417_v28 = vld [vmem:[%s14206_s9 + $0x128] sm:$0xf]  ;;  %v9897_v34 = vld [vmem:[%s14206_s9 + $0x2ec] sm:$0xf0]  ;;  %v8003_v25 = vld [vmem:[%s14206_s9 + $0x5f0] sm:$0xf0] }
 0x2b8   :  { %v9848_v29 = vld [vmem:[%s14206_s9 + $0x164] sm:$0xf0] }
 0x2b9   :  { %2871 = vmatpush.bf16.msrb.mxu1 %v7794_v50  ;;  %2897 = vmatpush.bf16.msra.mxu3 %v7798_v51  ;;  %v7418_v42 = vor.u32 %v9848_v29, %v7417_v28  ;;  %v7929_v50 = vld [vmem:[%s14206_s9 + $0x528] sm:$0xf] }
 0x2ba   :  { %v9976_v51 = vld [vmem:[%s14206_s9 + $0x564] sm:$0xf0] }
 0x2bb   :  { %2904 = vmatpush.bf16.msra.mxu0 %v7674_v47  ;;  %2930 = vmatpush.bf16.msrb.mxu2 %v7678_v48  ;;  %v9824_v47 = vld [vmem:[%s14206_s9 + $0xac] sm:$0xf]  ;;  %v7930_v60 = vor.u32 %v9976_v51, %v7929_v50  ;;  %v9881_v50 = vld [vmem:[%s14206_s9 + $0x26c] sm:$0xf0] }
 0x2bc   :  { %2872 = vmatmul.bf16.vlgmr.msrb.gmra.mxu1 %v11421_v24  ;;  %2898 = vmatmul.bf16.vlgmr.msra.gmra.mxu3 %v11421_v24  ;;  %v7355_v48 = vld [vmem:[%s14206_s9 + $0xe8] sm:$0xf0] }
 0x2bd   :  { %2916 = vmatpush.bf16.msra.mxu1 %v8250_v55  ;;  %2942 = vmatpush.bf16.msrb.mxu3 %v8254_v56  ;;  %v7354_v55 = vor.u32 %v9832_v44, %v7353_v30  ;;  %v7358_v56 = vor.u32 %v9824_v47, %v7355_v48  ;;  %v10033_v30 = vld [vmem:[%s14206_s9 + $0x734] sm:$0xf]  ;;  %v7553_v48 = vld [vmem:[%s14206_s9 + $0x230] sm:$0xf] }
 0x2be   :  { %v8195_v44 = vld [vmem:[%s14206_s9 + $0x770] sm:$0xf0] }
 0x2bf   :  { %2905 = vmatpush.bf16.msra.mxu0 %v7610_v0  ;;  %2931 = vmatpush.bf16.msrb.mxu2 %v7614_v1  ;;  %v7745_v0 = vld [vmem:[%s14206_s9 + $0x3b0] sm:$0xf]  ;;  %v8198_v52 = vor.u32 %v10033_v30, %v8195_v44  ;;  %v7939_v30 = vld [vmem:[%s14206_s9 + $0x570] sm:$0xf0] }
 0x2c0   :  { %v9929_v1 = vld [vmem:[%s14206_s9 + $0x3ec] sm:$0xf0] }
 0x2c1   :  { %2917 = vmatpush.bf16.msra.mxu1 %v8186_v3  ;;  %2943 = vmatpush.bf16.msrb.mxu3 %v8190_v5  ;;  %v7865_v3 = vld [vmem:[%s14206_s9 + $0x4a8] sm:$0xf]  ;;  %v7746_v10 = vor.u32 %v9929_v1, %v7745_v0  ;;  %v9865_v0 = vld [vmem:[%s14206_s9 + $0x1ec] sm:$0xf0] }
 0x2c2   :  { %v9960_v5 = vld [vmem:[%s14206_s9 + $0x4e4] sm:$0xf0] }
 0x2c3   :  { %2906 = vmatpush.bf16.msra.mxu0 %v7546_v12  ;;  %2932 = vmatpush.bf16.msrb.mxu2 %v7550_v13  ;;  %v7681_v12 = vld [vmem:[%s14206_s9 + $0x330] sm:$0xf]  ;;  %v7866_v15 = vor.u32 %v9960_v5, %v7865_v3  ;;  %v7491_v3 = vld [vmem:[%s14206_s9 + $0x1f0] sm:$0xf0] }
 0x2c4   :  { %v9913_v13 = vld [vmem:[%s14206_s9 + $0x36c] sm:$0xf0] }
 0x2c5   :  { %2918 = vmatpush.bf16.msra.mxu1 %v8122_v16  ;;  %2944 = vmatpush.bf16.msrb.mxu3 %v8126_v17  ;;  %v7870_v16 = vor.u32 %v9952_v6, %v7867_v7  ;;  %v7683_v17 = vld [vmem:[%s14206_s9 + $0x370] sm:$0xf0]  ;;  %v7682_v28 = vor.u32 %v9913_v13, %v7681_v12  ;;  %v8065_v5 = vld [vmem:[%s14206_s9 + $0x630] sm:$0xf]  ;;  %v7494_v12 = vor.u32 %v9857_v2, %v7491_v3 }
 0x2c6   :  { %v7686_v29 = vor.u32 %v9905_v14, %v7683_v17  ;;  %v10009_v7 = vld [vmem:[%s14206_s9 + $0x66c] sm:$0xf0] }
 0x2c7   :  { %2907 = vmatpush.bf16.msra.mxu0 %v7482_v26  ;;  %2933 = vmatpush.bf16.msrb.mxu2 %v7486_v27  ;;  %v10049_v26 = vld [vmem:[%s14206_s9 + $0x7b4] sm:$0xf]  ;;  %v7425_v14 = vld [vmem:[%s14206_s9 + $0x130] sm:$0xf] }
 0x2c8   :  { %v8259_v27 = vld [vmem:[%s14206_s9 + $0x7f0] sm:$0xf0] }
 0x2c9   :  { %2919 = vmatpush.bf16.msra.mxu1 %v8058_v31  ;;  %2945 = vmatpush.bf16.msrb.mxu3 %v8062_v32  ;;  %v7802_v31 = vor.u32 %v9944_v20, %v7801_v19  ;;  %v7806_v32 = vor.u32 %v9936_v21, %v7803_v22  ;;  %v8262_v39 = vor.u32 %v10049_v26, %v8259_v27  ;;  %v9841_v19 = vld [vmem:[%s14206_s9 + $0x134] sm:$0xf]  ;;  %v8001_v21 = vld [vmem:[%s14206_s9 + $0x5b0] sm:$0xf] }
 0x2ca   :  { %v7427_v20 = vld [vmem:[%s14206_s9 + $0x170] sm:$0xf0]  ;;  %v9993_v22 = vld [vmem:[%s14206_s9 + $0x5ec] sm:$0xf0] }
 0x2cb   :  { %2908 = vmatpush.bf16.msra.mxu0 %v7418_v42  ;;  %2934 = vmatpush.bf16.msrb.mxu2 %v7422_v43  ;;  %v8193_v42 = vld [vmem:[%s14206_s9 + $0x730] sm:$0xf]  ;;  %v7430_v27 = vor.u32 %v9841_v19, %v7427_v20  ;;  %v9937_v19 = vld [vmem:[%s14206_s9 + $0x434] sm:$0xf] }
 0x2cc   :  { %v10041_v43 = vld [vmem:[%s14206_s9 + $0x76c] sm:$0xf0]  ;;  %v7811_v20 = vld [vmem:[%s14206_s9 + $0x470] sm:$0xf0] }
 0x2cd   :  { %2920 = vmatpush.bf16.msra.mxu1 %v7994_v45  ;;  %2946 = vmatpush.bf16.msrb.mxu3 %v7998_v46  ;;  %v7618_v45 = vor.u32 %v9897_v34, %v7617_v33  ;;  %v7622_v46 = vor.u32 %v9889_v40, %v7619_v41  ;;  %v8194_v51 = vor.u32 %v10041_v43, %v8193_v42  ;;  %v9825_v34 = vld [vmem:[%s14206_s9 + $0xb4] sm:$0xf]  ;;  %v9977_v42 = vld [vmem:[%s14206_s9 + $0x56c] sm:$0xf0] }
 0x2ce   :  { %v8006_v33 = vor.u32 %v9985_v23, %v8003_v25  ;;  %v9969_v43 = vld [vmem:[%s14206_s9 + $0x534] sm:$0xf]  ;;  %v10050_v23 = vld [vmem:[%s14206_s9 + $0x7bc] sm:$0xf] }
 0x2cf   :  { %2909 = vmatpush.bf16.msra.mxu0 %v7354_v55  ;;  %2935 = vmatpush.bf16.msrb.mxu2 %v7358_v56  ;;  %v7555_v55 = vld [vmem:[%s14206_s9 + $0x270] sm:$0xf0]  ;;  %v8129_v56 = vld [vmem:[%s14206_s9 + $0x6b0] sm:$0xf]  ;;  %v8267_v25 = vld [vmem:[%s14206_s9 + $0x7f8] sm:$0xf0] }
 0x2d0   :  { %v8130_v1 = vor.u32 %v10025_v57, %v8129_v56  ;;  %v7299_v56 = vld [vmem:[%s14206_s9 + $0x70] sm:$0xf0]  ;;  %v7753_v57 = vld [vmem:[%s14206_s9 + $0x3b8] sm:$0xf] }
 0x2d1   :  { %2921 = vmatpush.bf16.msra.mxu1 %v7930_v60  ;;  %2947 = vmatpush.bf16.msrb.mxu3 %v7934_v61  ;;  %v7554_v60 = vor.u32 %v9881_v50, %v7553_v48  ;;  %v7558_v61 = vor.u32 %v9873_v54, %v7555_v55  ;;  %v7297_v48 = vld [vmem:[%s14206_s9 + $0x30] sm:$0xf]  ;;  %v7942_v55 = vor.u32 %v9969_v43, %v7939_v30  ;;  %v10042_v43 = vld [vmem:[%s14206_s9 + $0x774] sm:$0xf0]  ;;  %v10034_v30 = vld [vmem:[%s14206_s9 + $0x73c] sm:$0xf] }
 0x2d2   :  { %v12228_v47 = vpop.f32.mrf.mxu0  ;;  %v9817_v50 = vld [vmem:[%s14206_s9 + $0x6c] sm:$0xf0] }
 0x2d3   :  { %2910 = vmatpush.bf16.msra.mxu0 %v7290_v8  ;;  %2936 = vmatpush.bf16.msrb.mxu2 %v7294_v9  ;;  %v10001_v8 = vld [vmem:[%s14206_s9 + $0x634] sm:$0xf] }
 0x2d4   :  { %v8067_v9 = vld [vmem:[%s14206_s9 + $0x670] sm:$0xf0] }
 0x2d5   :  { %2922 = vmatpush.bf16.msra.mxu1 %v7866_v15  ;;  %2948 = vmatpush.bf16.msrb.mxu3 %v7870_v16  ;;  %v9849_v15 = vld [vmem:[%s14206_s9 + $0x16c] sm:$0xf0]  ;;  %v8066_v16 = vor.u32 %v10009_v7, %v8065_v5  ;;  %v8070_v17 = vor.u32 %v10001_v8, %v8067_v9  ;;  %v7754_v5 = vor.u32 %v9930_v58, %v7753_v57  ;;  %v7689_v7 = vld [vmem:[%s14206_s9 + $0x338] sm:$0xf]  ;;  %v9906_v9 = vld [vmem:[%s14206_s9 + $0x33c] sm:$0xf] }
 0x2d6   :  { %2911 = vmatmul.bf16.vlgmr.msra.gmra.mxu0 %v11377_v63  ;;  %2937 = vmatmul.bf16.vlgmr.msrb.gmra.mxu2 %v11377_v63  ;;  %v7426_v26 = vor.u32 %v9849_v15, %v7425_v14  ;;  %v9914_v8 = vld [vmem:[%s14206_s9 + $0x374] sm:$0xf0]  ;;  %v7809_v14 = vld [vmem:[%s14206_s9 + $0x430] sm:$0xf]  ;;  %v9874_v58 = vld [vmem:[%s14206_s9 + $0x23c] sm:$0xf] }
 0x2d7   :  { %2955 = vmatpush.bf16.msrb.mxu0 %v7746_v10  ;;  %2981 = vmatpush.bf16.msra.mxu2 %v7750_v11  ;;  %v7490_v11 = vor.u32 %v9865_v0, %v7489_v62  ;;  %v9961_v62 = vld [vmem:[%s14206_s9 + $0x4ec] sm:$0xf0]  ;;  %v9953_v0 = vld [vmem:[%s14206_s9 + $0x4b4] sm:$0xf] }
 0x2d8   :  { %v2678_v6 = vpop.f32.mrf.mxu2  ;;  %v9945_v15 = vld [vmem:[%s14206_s9 + $0x46c] sm:$0xf0] }
 0x2d9   :  { %2923 = vmatpush.bf16.msra.mxu1 %v7802_v31  ;;  %2949 = vmatpush.bf16.msrb.mxu3 %v7806_v32  ;;  %v12280_v10 = vpop.f32.mrf.mxu1  ;;  %v8002_v32 = vor.u32 %v9993_v22, %v8001_v21  ;;  %v8265_v21 = vld [vmem:[%s14206_s9 + $0x7b8] sm:$0xf] }
 0x2da   :  { %v2654_v13 = vpop.f32.mrf.mxu0  ;;  %v10058_v22 = vld [vmem:[%s14206_s9 + $0x7f4] sm:$0xf0] }
 0x2db   :  { %2956 = vmatpush.bf16.msrb.mxu0 %v7682_v28  ;;  %2982 = vmatpush.bf16.msra.mxu2 %v7686_v29  ;;  %v7361_v28 = vld [vmem:[%s14206_s9 + $0xb0] sm:$0xf]  ;;  %v7691_v13 = vld [vmem:[%s14206_s9 + $0x378] sm:$0xf0] }
 0x2dc   :  { %2924 = vmatmul.bf16.vlgmr.msra.gmra.mxu1 %v11421_v24  ;;  %2950 = vmatmul.bf16.vlgmr.msrb.gmra.mxu3 %v11421_v24  ;;  %v9833_v29 = vld [vmem:[%s14206_s9 + $0xec] sm:$0xf0] }
 0x2dd   :  { %2968 = vmatpush.bf16.msrb.mxu1 %v8258_v37  ;;  %2994 = vmatpush.bf16.msra.mxu3 %v8262_v39  ;;  %v7363_v37 = vld [vmem:[%s14206_s9 + $0xf0] sm:$0xf0]  ;;  %v7937_v39 = vld [vmem:[%s14206_s9 + $0x530] sm:$0xf] }
 0x2de   :  { %v7938_v54 = vor.u32 %v9977_v42, %v7937_v39  ;;  %v9890_v39 = vld [vmem:[%s14206_s9 + $0x2bc] sm:$0xf]  ;;  %v8201_v42 = vld [vmem:[%s14206_s9 + $0x738] sm:$0xf] }
 0x2df   :  { %2957 = vmatpush.bf16.msrb.mxu0 %v7618_v45  ;;  %2983 = vmatpush.bf16.msra.mxu2 %v7622_v46  ;;  %v2691_v31 = vpop.f32.mrf.mxu3  ;;  %v7362_v45 = vor.u32 %v9833_v29, %v7361_v28  ;;  %v7366_v46 = vor.u32 %v9825_v34, %v7363_v37  ;;  %v7694_v28 = vor.u32 %v9906_v9, %v7691_v13  ;;  %v7499_v9 = vld [vmem:[%s14206_s9 + $0x1f8] sm:$0xf0] }
 0x2e0   :  { %v12321_v40 = vadd.f32 %v2691_v31, %v2678_v6  ;;  %v2680_v41 = vpop.f32.mrf.mxu2  ;;  %v7810_v29 = vor.u32 %v9945_v15, %v7809_v14  ;;  %v7814_v31 = vor.u32 %v9937_v19, %v7811_v20  ;;  %v8266_v34 = vor.u32 %v10058_v22, %v8265_v21  ;;  %v10002_v13 = vld [vmem:[%s14206_s9 + $0x63c] sm:$0xf]  ;;  %v7433_v21 = vld [vmem:[%s14206_s9 + $0x138] sm:$0xf] }
 0x2e1   :  { %2969 = vmatpush.bf16.msrb.mxu1 %v8194_v51  ;;  %2995 = vmatpush.bf16.msra.mxu3 %v8198_v52  ;;  %v2667_v44 = vpop.f32.mrf.mxu1  ;;  %v9809_v51 = vld [vmem:[%s14206_s9 + $0x34] sm:$0xf]  ;;  %v8270_v37 = vor.u32 %v10050_v23, %v8267_v25  ;;  %v7627_v41 = vld [vmem:[%s14206_s9 + $0x2f8] sm:$0xf0]  ;;  %v9850_v22 = vld [vmem:[%s14206_s9 + $0x174] sm:$0xf0] }
 0x2e2   :  { %v7302_v2 = vor.u32 %v9809_v51, %v7299_v56  ;;  %v8203_v44 = vld [vmem:[%s14206_s9 + $0x778] sm:$0xf0]  ;;  %v9882_v51 = vld [vmem:[%s14206_s9 + $0x274] sm:$0xf0]  ;;  %v8202_v56 = vor.u32 %v10042_v43, %v8201_v42 }
 0x2e3   :  { %2958 = vmatpush.bf16.msrb.mxu0 %v7554_v60  ;;  %2984 = vmatpush.bf16.msra.mxu2 %v7558_v61  ;;  %v12341_v52 = vpop.f32.mrf.mxu0  ;;  %v7755_v60 = vld [vmem:[%s14206_s9 + $0x3f8] sm:$0xf0]  ;;  %v7873_v61 = vld [vmem:[%s14206_s9 + $0x4b0] sm:$0xf]  ;;  %v8206_v57 = vor.u32 %v10034_v30, %v8203_v44  ;;  %v7369_v42 = vld [vmem:[%s14206_s9 + $0xb8] sm:$0xf] }
 0x2e4   :  { %v7758_v6 = vor.u32 %v9922_v59, %v7755_v60  ;;  %v7563_v59 = vld [vmem:[%s14206_s9 + $0x278] sm:$0xf0]  ;;  %v8137_v60 = vld [vmem:[%s14206_s9 + $0x6b8] sm:$0xf] }
 0x2e5   :  { %2970 = vmatpush.bf16.msrb.mxu1 %v8130_v1  ;;  %2996 = vmatpush.bf16.msra.mxu3 %v8134_v49  ;;  %v7875_v1 = vld [vmem:[%s14206_s9 + $0x4f0] sm:$0xf0]  ;;  %v7298_v49 = vor.u32 %v9817_v50, %v7297_v48  ;;  %v7630_v48 = vor.u32 %v9890_v39, %v7627_v41  ;;  %v7561_v50 = vld [vmem:[%s14206_s9 + $0x238] sm:$0xf]  ;;  %v8075_v14 = vld [vmem:[%s14206_s9 + $0x678] sm:$0xf0]  ;;  %v7434_v39 = vor.u32 %v9850_v22, %v7433_v21 }
 0x2e6   :  { %v9834_v43 = vld [vmem:[%s14206_s9 + $0xf4] sm:$0xf0]  ;;  %v9938_v22 = vld [vmem:[%s14206_s9 + $0x43c] sm:$0xf] }
 0x2e7   :  { %2959 = vmatpush.bf16.msrb.mxu0 %v7490_v11  ;;  %2985 = vmatpush.bf16.msra.mxu2 %v7494_v12  ;;  %v2693_v3 = vpop.f32.mrf.mxu3  ;;  %v7874_v11 = vor.u32 %v9961_v62, %v7873_v61  ;;  %v7878_v12 = vor.u32 %v9953_v0, %v7875_v1  ;;  %v10026_v61 = vld [vmem:[%s14206_s9 + $0x6f4] sm:$0xf0]  ;;  %v10018_v62 = vld [vmem:[%s14206_s9 + $0x6bc] sm:$0xf] }
 0x2e8   :  { %v8139_v0 = vld [vmem:[%s14206_s9 + $0x6f8] sm:$0xf0]  ;;  %v7497_v3 = vld [vmem:[%s14206_s9 + $0x1b8] sm:$0xf] }
 0x2e9   :  { %2971 = vmatpush.bf16.msrb.mxu1 %v8066_v16  ;;  %2997 = vmatpush.bf16.msra.mxu3 %v8070_v17  ;;  %v12388_v16 = vpop.f32.mrf.mxu1  ;;  %v12390_v17 = vpop.f32.mrf.mxu2  ;;  %v9946_v21 = vld [vmem:[%s14206_s9 + $0x474] sm:$0xf0] }
 0x2eb   :  { %2960 = vmatpush.bf16.msrb.mxu0 %v7426_v26  ;;  %2986 = vmatpush.bf16.msra.mxu2 %v7430_v27  ;;  %v2706_v26 = vpop.f32.mrf.mxu0  ;;  %v7690_v27 = vor.u32 %v9914_v8, %v7689_v7  ;;  %v8142_v7 = vor.u32 %v10018_v62, %v8139_v0  ;;  %v9858_v8 = vld [vmem:[%s14206_s9 + $0x1bc] sm:$0xf] }
 0x2ec   :  { %v7502_v20 = vor.u32 %v9858_v8, %v7499_v9  ;;  %v8078_v26 = vor.u32 %v10002_v13, %v8075_v14  ;;  %v9954_v8 = vld [vmem:[%s14206_s9 + $0x4bc] sm:$0xf] }
 0x2ed   :  { %2972 = vmatpush.bf16.msrb.mxu1 %v8002_v32  ;;  %2998 = vmatpush.bf16.msra.mxu3 %v8006_v33  ;;  %v7625_v32 = vld [vmem:[%s14206_s9 + $0x2b8] sm:$0xf]  ;;  %v7883_v9 = vld [vmem:[%s14206_s9 + $0x4f8] sm:$0xf0] }
 0x2ee   :  { %v9898_v33 = vld [vmem:[%s14206_s9 + $0x2f4] sm:$0xf0] }
 0x2ef   :  { %2961 = vmatpush.bf16.msrb.mxu0 %v7362_v45  ;;  %2987 = vmatpush.bf16.msra.mxu2 %v7366_v46  ;;  %v12436_v45 = vpop.f32.mrf.mxu3  ;;  %v7626_v46 = vor.u32 %v9898_v33, %v7625_v32  ;;  %v9994_v32 = vld [vmem:[%s14206_s9 + $0x5f4] sm:$0xf0]  ;;  %v9986_v33 = vld [vmem:[%s14206_s9 + $0x5bc] sm:$0xf] }
 0x2f0   :  { %v10066_v13 = vld [vmem:[%s14207_s18 + $0x38] sm:$0xff] }
 0x2f1   :  { %2973 = vmatpush.bf16.msrb.mxu1 %v7938_v54  ;;  %2999 = vmatpush.bf16.msra.mxu3 %v7942_v55  ;;  %v2719_v54 = vpop.f32.mrf.mxu1  ;;  %v2732_v55 = vpop.f32.mrf.mxu2  ;;  %v10082_v14 = vld [vmem:[%s14207_s18 + $0xb8] sm:$0xff] }
 0x2f2   :  { %v9970_v54 = vld [vmem:[%s14206_s9 + $0x53c] sm:$0xf] }
 0x2f3   :  { %2962 = vmatpush.bf16.msrb.mxu0 %v7298_v49  ;;  %2988 = vmatpush.bf16.msra.mxu2 %v7302_v2  ;;  %v12464_v1 = vpop.f32.mrf.mxu0  ;;  %v7562_v49 = vor.u32 %v9882_v51, %v7561_v50  ;;  %v7566_v2 = vor.u32 %v9874_v58, %v7563_v59  ;;  %v7945_v50 = vld [vmem:[%s14206_s9 + $0x538] sm:$0xf]  ;;  %v7947_v55 = vld [vmem:[%s14206_s9 + $0x578] sm:$0xf0] }
 0x2f4   :  { %v9978_v51 = vld [vmem:[%s14206_s9 + $0x574] sm:$0xf0]  ;;  %v7950_v0 = vor.u32 %v9970_v54, %v7947_v55  ;;  %v10087_v54 = vld [vmem:[%s14207_s18 + $0xe0] sm:$0xff] }
 0x2f5   :  { %2974 = vmatpush.bf16.msrb.mxu1 %v7874_v11  ;;  %3000 = vmatpush.bf16.msra.mxu3 %v7878_v12  ;;  %v8073_v11 = vld [vmem:[%s14206_s9 + $0x638] sm:$0xf]  ;;  %v7946_v62 = vor.u32 %v9978_v51, %v7945_v50  ;;  %v10071_v51 = vld [vmem:[%s14207_s18 + $0x60] sm:$0xff] }
 0x2f6   :  { %2963 = vmatmul.bf16.vlgmr.msrb.gmra.mxu0 %v11377_v63  ;;  %2989 = vmatmul.bf16.vlgmr.msra.gmra.mxu2 %v11377_v63  ;;  %v10010_v12 = vld [vmem:[%s14206_s9 + $0x674] sm:$0xf0] }
 0x2f7   :  { %3007 = vmatpush.bf16.msra.mxu0 %v7754_v5  ;;  %3033 = vmatpush.bf16.msrb.mxu2 %v7758_v6  ;;  %v9866_v5 = vld [vmem:[%s14206_s9 + $0x1f4] sm:$0xf0]  ;;  %v8138_v6 = vor.u32 %v10026_v61, %v8137_v60  ;;  %v2745_v15 = vpop.f32.mrf.mxu3  ;;  %v8074_v25 = vor.u32 %v10010_v12, %v8073_v11 }
 0x2f8   :  { %v7498_v19 = vor.u32 %v9866_v5, %v7497_v3  ;;  %v7305_v59 = vld [vmem:[%s14206_s9 + $0x38] sm:$0xf]  ;;  %v7307_v3 = vld [vmem:[%s14206_s9 + $0x78] sm:$0xf0] }
 0x2f9   :  { %2975 = vmatpush.bf16.msrb.mxu1 %v7810_v29  ;;  %3001 = vmatpush.bf16.msra.mxu3 %v7814_v31  ;;  %v2782_v23 = vpop.f32.mrf.mxu2  ;;  %v8009_v29 = vld [vmem:[%s14206_s9 + $0x5b8] sm:$0xf]  ;;  %v12505_v31 = vpop.f32.mrf.mxu1 }
 0x2fa   :  { %v8010_v30 = vor.u32 %v9994_v32, %v8009_v29  ;;  %v10074_v32 = vld [vmem:[%s14207_s18 + $0x78] sm:$0xff] }
 0x2fb   :  { %3008 = vmatpush.bf16.msra.mxu0 %v7690_v27  ;;  %3034 = vmatpush.bf16.msrb.mxu2 %v7694_v28  ;;  %v9842_v27 = vld [vmem:[%s14206_s9 + $0x13c] sm:$0xf] }
 0x2fc   :  { %2976 = vmatmul.bf16.vlgmr.msrb.gmra.mxu1 %v11421_v24  ;;  %3002 = vmatmul.bf16.vlgmr.msra.gmra.mxu3 %v11421_v24  ;;  %v7435_v28 = vld [vmem:[%s14206_s9 + $0x178] sm:$0xf0] }
 0x2fd   :  { %3020 = vmatpush.bf16.msra.mxu1 %v8266_v34  ;;  %3046 = vmatpush.bf16.msrb.mxu3 %v8270_v37  ;;  %v8011_v34 = vld [vmem:[%s14206_s9 + $0x5f8] sm:$0xf0]  ;;  %v2758_v37 = vpop.f32.mrf.mxu0  ;;  %v7438_v41 = vor.u32 %v9842_v27, %v7435_v28  ;;  %v10081_v27 = vld [vmem:[%s14207_s18 + $0xb0] sm:$0xff] }
 0x2fe   :  { %v8014_v44 = vor.u32 %v9986_v33, %v8011_v34  ;;  %v10090_v33 = vld [vmem:[%s14207_s18 + $0xf8] sm:$0xff]  ;;  %v10064_v34 = vld [vmem:[%s14207_s18 + $0x28] sm:$0xff]  ;;  %v10073_v37 = vld [vmem:[%s14207_s18 + $0x70] sm:$0xff] }
 0x2ff   :  { %3009 = vmatpush.bf16.msra.mxu0 %v7626_v46  ;;  %3035 = vmatpush.bf16.msrb.mxu2 %v7630_v48  ;;  %v9826_v46 = vld [vmem:[%s14206_s9 + $0xbc] sm:$0xf] }
 0x300   :  { %v7371_v48 = vld [vmem:[%s14206_s9 + $0xf8] sm:$0xf0] }
 0x301   :  { %3021 = vmatpush.bf16.msra.mxu1 %v8202_v56  ;;  %3047 = vmatpush.bf16.msrb.mxu3 %v8206_v57  ;;  %v2795_v56 = vpop.f32.mrf.mxu3  ;;  %v7370_v57 = vor.u32 %v9834_v43, %v7369_v42  ;;  %v7374_v58 = vor.u32 %v9826_v46, %v7371_v48  ;;  %v2784_v61 = vpop.f32.mrf.mxu2  ;;  %v10063_v42 = vld [vmem:[%s14207_s18 + $0x20] sm:$0xff]  ;;  %v10078_v46 = vld [vmem:[%s14207_s18 + $0x98] sm:$0xff] }
 0x302   :  { %v12543_v60 = vadd.f32 %v2795_v56, %v2782_v23  ;;  %v2771_v5 = vpop.f32.mrf.mxu1  ;;  %v7819_v23 = vld [vmem:[%s14206_s9 + $0x478] sm:$0xf0]  ;;  %v10079_v43 = vld [vmem:[%s14207_s18 + $0xa0] sm:$0xff]  ;;  %v10061_v56 = vld [vmem:[%s14207_s18 + $0x10] sm:$0xff] }
 0x303   :  { %3010 = vmatpush.bf16.msra.mxu0 %v7562_v49  ;;  %3036 = vmatpush.bf16.msrb.mxu2 %v7566_v2  ;;  %v9818_v49 = vld [vmem:[%s14206_s9 + $0x74] sm:$0xf0]  ;;  %v9810_v2 = vld [vmem:[%s14206_s9 + $0x3c] sm:$0xf]  ;;  %v7822_v29 = vor.u32 %v9938_v22, %v7819_v23  ;;  %v2718_v5 = vadd.f32 %v12388_v16, %v12341_v52  ;;  %v3060_v22 = vmul.f32 %v12321_v40, %v11511_v18  ;;  %v10096_v40 = vld [vmem:[%s14207_s18 + $0x128] sm:$0xff] }
 0x304   :  { %v7306_v11 = vor.u32 %v9818_v49, %v7305_v59  ;;  %v7310_v12 = vor.u32 %v9810_v2, %v7307_v3  ;;  %v10086_v59 = vld [vmem:[%s14207_s18 + $0xd8] sm:$0xff]  ;;  %v2666_v3 = vadd.f32 %v12280_v10, %v12228_v47  ;;  %v10075_v47 = vld [vmem:[%s14207_s18 + $0x80] sm:$0xff] }
 0x305   :  { %3022 = vmatpush.bf16.msra.mxu1 %v8138_v6  ;;  %3048 = vmatpush.bf16.msrb.mxu3 %v8142_v7  ;;  %v7881_v6 = vld [vmem:[%s14206_s9 + $0x4b8] sm:$0xf]  ;;  %v3061_v52 = vmul.f32 %v2718_v5, %v11467_v53 }
 0x306   :  { %v9962_v7 = vld [vmem:[%s14206_s9 + $0x4f4] sm:$0xf0]  ;;  %v3059_v10 = vmul.f32 %v2666_v3, %v11467_v53  ;;  %v2770_v3 = vadd.f32 %v12505_v31, %v12464_v1  ;;  %v10107_v1 = vld [vmem:[%s14207_s18 + $0x180] sm:$0xff] }
 0x307   :  { %3011 = vmatpush.bf16.msra.mxu0 %v7498_v19  ;;  %3037 = vmatpush.bf16.msrb.mxu2 %v7502_v20  ;;  %v7882_v15 = vor.u32 %v9962_v7, %v7881_v6  ;;  %v7886_v19 = vor.u32 %v9954_v8, %v7883_v9  ;;  %v7817_v20 = vld [vmem:[%s14206_s9 + $0x438] sm:$0xf]  ;;  %v10069_v6 = vld [vmem:[%s14207_s18 + $0x50] sm:$0xff]  ;;  %v10059_v8 = vld [vmem:[%s14207_s18] sm:$0xff]  ;;  %s14209_s9 = sld [smem:[#allocation25_spill]] }
 0x308   :  { %v7818_v28 = vor.u32 %v9946_v21, %v7817_v20  ;;  %v10085_v7 = vld [vmem:[%s14207_s18 + $0xd0] sm:$0xff]  ;;  %v10098_v16 = vld [vmem:[%s14207_s18 + $0x138] sm:$0xff]  ;;  %v3063_v31 = vmul.f32 %v2770_v3, %v11467_v53 }
 0x309   :  { %3023 = vmatpush.bf16.msra.mxu1 %v8074_v25  ;;  %3049 = vmatpush.bf16.msrb.mxu3 %v8078_v26  ;;  %v2797_v25 = vpop.f32.mrf.mxu3  ;;  %v10065_v26 = vld [vmem:[%s14207_s18 + $0x30] sm:$0xff]  ;;  %v10114_v9 = vld [vmem:[%s14207_s18 + $0x1b8] sm:$0xff] }
 0x30a   :  { %v10097_v20 = vld [vmem:[%s14207_s18 + $0x130] sm:$0xff]  ;;  %v10106_v25 = vld [vmem:[%s14207_s18 + $0x178] sm:$0xff] }
 0x30b   :  { %3012 = vmatpush.bf16.msra.mxu0 %v7434_v39  ;;  %3038 = vmatpush.bf16.msrb.mxu2 %v7438_v41  ;;  %v10089_v39 = vld [vmem:[%s14207_s18 + $0xf0] sm:$0xff] }
 0x30c   :  { %v10113_v21 = vld [vmem:[%s14207_s18 + $0x1b0] sm:$0xff] }
 0x30d   :  { %3024 = vmatpush.bf16.msra.mxu1 %v8010_v30  ;;  %3050 = vmatpush.bf16.msrb.mxu3 %v8014_v44  ;;  %v10072_v30 = vld [vmem:[%s14207_s18 + $0x68] sm:$0xff]  ;;  %v10062_v44 = vld [vmem:[%s14207_s18 + $0x18] sm:$0xff]  ;;  %v10149_v3 = vld [vmem:[%s14207_s18 + $0x2d0] sm:$0xff] }
 0x30f   :  { %3013 = vmatpush.bf16.msra.mxu0 %v7370_v57  ;;  %3039 = vmatpush.bf16.msrb.mxu2 %v7374_v58  ;;  %v10077_v57 = vld [vmem:[%s14207_s18 + $0x90] sm:$0xff]  ;;  %v10070_v58 = vld [vmem:[%s14207_s18 + $0x58] sm:$0xff] }
 0x311   :  { %3025 = vmatpush.bf16.msra.mxu1 %v7946_v62  ;;  %3051 = vmatpush.bf16.msrb.mxu3 %v7950_v0  ;;  %v10060_v62 = vld [vmem:[%s14207_s18 + $0x8] sm:$0xff] }
 0x312   :  { %v10076_v0 = vld [vmem:[%s14207_s18 + $0x88] sm:$0xff] }
 0x313   :  { %3014 = vmatpush.bf16.msra.mxu0 %v7306_v11  ;;  %3040 = vmatpush.bf16.msrb.mxu2 %v7310_v12  ;;  %v12610_v41 = vpop.f32.mrf.mxu0  ;;  %v10068_v11 = vld [vmem:[%s14207_s18 + $0x48] sm:$0xff] }
 0x314   :  { %v10084_v12 = vld [vmem:[%s14207_s18 + $0xc8] sm:$0xff] }
 0x315   :  { %3026 = vmatpush.bf16.msra.mxu1 %v7882_v15  ;;  %3052 = vmatpush.bf16.msrb.mxu3 %v7886_v19  ;;  %v3075_v15 = vpack.c.bf16 %v3059_v10, %v3059_v10  ;;  %v3077_v19 = vpack.c.bf16 %v3061_v52, %v3061_v52  ;;  %v10100_v10 = vld [vmem:[%s14207_s18 + $0x148] sm:$0xff] }
 0x316   :  { %3015 = vmatmul.bf16.vlgmr.msra.gmra.mxu0 %v11377_v63  ;;  %3041 = vmatmul.bf16.vlgmr.msrb.gmra.mxu2 %v11377_v63  ;;  %v10080_v63 = vld [vmem:[%s14207_s18 + $0xa8] sm:$0xff] }
 0x317   :  { %4115 = vmatpush.bf16.msrb.mxu0 %v10066_v13  ;;  %4141 = vmatpush.bf16.msra.mxu2 %v10082_v14  ;;  %v2744_v14 = vadd.f32 %v12436_v45, %v12390_v17  ;;  %v10067_v17 = vld [vmem:[%s14207_s18 + $0x40] sm:$0xff]  ;;  %v10116_v52 = vld [vmem:[%s14207_s18 + $0x1c8] sm:$0xff] }
 0x318   :  { %v10083_v45 = vld [vmem:[%s14207_s18 + $0xc0] sm:$0xff] }
 0x319   :  { %3027 = vmatpush.bf16.msra.mxu1 %v7818_v28  ;;  %3053 = vmatpush.bf16.msrb.mxu3 %v7822_v29  ;;  %v12632_v48 = vpop.f32.mrf.mxu1  ;;  %v12634_v50 = vpop.f32.mrf.mxu2  ;;  %v3062_v23 = vmul.f32 %v2744_v14, %v11511_v18  ;;  %v3076_v28 = vpack.c.bf16 %v3060_v22, %v3060_v22  ;;  %v10145_v14 = vld [vmem:[%s14207_s18 + $0x2b0] sm:$0xff] }
 0x31a   :  { %v2822_v5 = vadd.f32 %v12632_v48, %v12610_v41  ;;  %v10130_v48 = vld [vmem:[%s14207_s18 + $0x238] sm:$0xff] }
 0x31b   :  { %4116 = vmatpush.bf16.msrb.mxu0 %v10065_v26  ;;  %4142 = vmatpush.bf16.msra.mxu2 %v10081_v27  ;;  %v2810_v55 = vpop.f32.mrf.mxu0  ;;  %v10122_v26 = vld [vmem:[%s14207_s18 + $0x1f8] sm:$0xff]  ;;  %v10112_v27 = vld [vmem:[%s14207_s18 + $0x1a8] sm:$0xff]  ;;  %v3078_v29 = vpack.c.bf16 %v3062_v23, %v3062_v23  ;;  %v10137_v23 = vld [vmem:[%s14207_s18 + $0x270] sm:$0xff] }
 0x31c   :  { %3028 = vmatmul.bf16.vlgmr.msra.gmra.mxu1 %v11421_v24  ;;  %3054 = vmatmul.bf16.vlgmr.msrb.gmra.mxu3 %v11421_v24  ;;  %v10088_v24 = vld [vmem:[%s14207_s18 + $0xe8] sm:$0xff]  ;;  %v10093_v55 = vld [vmem:[%s14207_s18 + $0x110] sm:$0xff]  ;;  %v3065_v41 = vmul.f32 %v2822_v5, %v11467_v53  ;;  %v10123_v5 = vld [vmem:[%s14207_s18 + $0x200] sm:$0xff] }
 0x31d   :  { %4128 = vmatpush.bf16.msrb.mxu1 %v10074_v32  ;;  %4154 = vmatpush.bf16.msra.mxu3 %v10090_v33  ;;  %v10105_v32 = vld [vmem:[%s14207_s18 + $0x170] sm:$0xff] }
 0x31e   :  { %v10121_v33 = vld [vmem:[%s14207_s18 + $0x1f0] sm:$0xff] }
 0x31f   :  { %4117 = vmatpush.bf16.msrb.mxu0 %v10064_v34  ;;  %4143 = vmatpush.bf16.msra.mxu2 %v10080_v63  ;;  %v12654_v61 = vpop.f32.mrf.mxu3  ;;  %v10095_v63 = vld [vmem:[%s14207_s18 + $0x120] sm:$0xff] }
 0x321   :  { %4129 = vmatpush.bf16.msrb.mxu1 %v10073_v37  ;;  %4155 = vmatpush.bf16.msra.mxu3 %v10089_v39  ;;  %v2823_v49 = vpop.f32.mrf.mxu1  ;;  %v2836_v2 = vpop.f32.mrf.mxu2  ;;  %v10111_v37 = vld [vmem:[%s14207_s18 + $0x1a0] sm:$0xff]  ;;  %v10104_v39 = vld [vmem:[%s14207_s18 + $0x168] sm:$0xff] }
 0x323   :  { %4118 = vmatpush.bf16.msrb.mxu0 %v10063_v42  ;;  %4144 = vmatpush.bf16.msra.mxu2 %v10079_v43  ;;  %v10120_v42 = vld [vmem:[%s14207_s18 + $0x1e8] sm:$0xff]  ;;  %v10094_v43 = vld [vmem:[%s14207_s18 + $0x118] sm:$0xff] }
 0x325   :  { %4130 = vmatpush.bf16.msrb.mxu1 %v10072_v30  ;;  %4156 = vmatpush.bf16.msra.mxu3 %v10088_v24  ;;  %v10110_v30 = vld [vmem:[%s14207_s18 + $0x198] sm:$0xff] }
 0x327   :  { %4119 = vmatpush.bf16.msrb.mxu0 %v10062_v44  ;;  %4145 = vmatpush.bf16.msra.mxu2 %v10078_v46  ;;  %v2849_v13 = vpop.f32.mrf.mxu3  ;;  %v10103_v46 = vld [vmem:[%s14207_s18 + $0x160] sm:$0xff] }
 0x328   :  { %v10129_v13 = vld [vmem:[%s14207_s18 + $0x230] sm:$0xff] }
 0x329   :  { %4131 = vmatpush.bf16.msrb.mxu1 %v10071_v51  ;;  %4157 = vmatpush.bf16.msra.mxu3 %v10087_v54  ;;  %v10119_v51 = vld [vmem:[%s14207_s18 + $0x1e0] sm:$0xff] }
 0x32b   :  { %4120 = vmatpush.bf16.msrb.mxu0 %v10061_v56  ;;  %4146 = vmatpush.bf16.msra.mxu2 %v10077_v57  ;;  %v10109_v56 = vld [vmem:[%s14207_s18 + $0x190] sm:$0xff]  ;;  %v10102_v57 = vld [vmem:[%s14207_s18 + $0x158] sm:$0xff] }
 0x32d   :  { %4132 = vmatpush.bf16.msrb.mxu1 %v10070_v58  ;;  %4158 = vmatpush.bf16.msra.mxu3 %v10086_v59  ;;  %v10118_v58 = vld [vmem:[%s14207_s18 + $0x1d8] sm:$0xff] }
 0x32f   :  { %4121 = vmatpush.bf16.msrb.mxu0 %v10060_v62  ;;  %4147 = vmatpush.bf16.msra.mxu2 %v10076_v0  ;;  %v10092_v62 = vld [vmem:[%s14207_s18 + $0x108] sm:$0xff] }
 0x330   :  { %v10108_v0 = vld [vmem:[%s14207_s18 + $0x188] sm:$0xff] }
 0x331   :  { %4133 = vmatpush.bf16.msrb.mxu1 %v10069_v6  ;;  %4159 = vmatpush.bf16.msra.mxu3 %v10085_v7  ;;  %v10101_v6 = vld [vmem:[%s14207_s18 + $0x150] sm:$0xff] }
 0x332   :  { %v10117_v7 = vld [vmem:[%s14207_s18 + $0x1d0] sm:$0xff] }
 0x333   :  { %4122 = vmatpush.bf16.msrb.mxu0 %v10059_v8  ;;  %4148 = vmatpush.bf16.msra.mxu2 %v10075_v47  ;;  %v12727_v34 = vpop.f32.mrf.mxu0  ;;  %v10091_v8 = vld [vmem:[%s14207_s18 + $0x100] sm:$0xff]  ;;  %v10146_v47 = vld [vmem:[%s14207_s18 + $0x2b8] sm:$0xff] }
 0x335   :  { %4134 = vmatpush.bf16.msrb.mxu1 %v10068_v11  ;;  %4160 = vmatpush.bf16.msra.mxu3 %v10084_v12  ;;  %v3079_v11 = vpack.c.bf16 %v3063_v31, %v3063_v31  ;;  %v3081_v12 = vpack.c.bf16 %v3065_v41, %v3065_v41  ;;  %v10148_v31 = vld [vmem:[%s14207_s18 + $0x2c8] sm:$0xff] }
 0x336   :  { %4123 = vmatmul.bf16.vlgmr.msrb.gmra.mxu0 %v3075_v15  ;;  %4149 = vmatmul.bf16.vlgmr.msra.gmra.mxu2 %v3077_v19  ;;  %v3064_v15 = vmul.f32 %v12543_v60, %v11511_v18  ;;  %v10128_v60 = vld [vmem:[%s14207_s18 + $0x228] sm:$0xff] }
 0x337   :  { %4167 = vmatpush.bf16.msra.mxu0 %v10098_v16  ;;  %4193 = vmatpush.bf16.msrb.mxu2 %v10114_v9  ;;  %v2848_v9 = vadd.f32 %v12654_v61, %v12634_v50  ;;  %v10099_v50 = vld [vmem:[%s14207_s18 + $0x140] sm:$0xff] }
 0x338   :  { %v10115_v61 = vld [vmem:[%s14207_s18 + $0x1c0] sm:$0xff] }
 0x339   :  { %4135 = vmatpush.bf16.msrb.mxu1 %v10067_v17  ;;  %4161 = vmatpush.bf16.msra.mxu3 %v10083_v45  ;;  %v12747_v24 = vpop.f32.mrf.mxu1  ;;  %v12749_v44 = vpop.f32.mrf.mxu2  ;;  %v3066_v19 = vmul.f32 %v2848_v9, %v11511_v18  ;;  %v10144_v17 = vld [vmem:[%s14207_s18 + $0x2a8] sm:$0xff]  ;;  %v3080_v45 = vpack.c.bf16 %v3064_v15, %v3064_v15  ;;  %v10147_v9 = vld [vmem:[%s14207_s18 + $0x2c0] sm:$0xff]  ;;  %v10169_v15 = vld [vmem:[%s14207_s18 + $0x370] sm:$0xff] }
 0x33b   :  { %4168 = vmatpush.bf16.msra.mxu0 %v10097_v20  ;;  %4194 = vmatpush.bf16.msrb.mxu2 %v10113_v21  ;;  %v2862_v54 = vpop.f32.mrf.mxu0  ;;  %v10138_v20 = vld [vmem:[%s14207_s18 + $0x278] sm:$0xff]  ;;  %v3082_v22 = vpack.c.bf16 %v3066_v19, %v3066_v19 }
 0x33c   :  { %4136 = vmatmul.bf16.vlgmr.msrb.gmra.mxu1 %v3076_v28  ;;  %4162 = vmatmul.bf16.vlgmr.msra.gmra.mxu3 %v3078_v29  ;;  %v10154_v21 = vld [vmem:[%s14207_s18 + $0x2f8] sm:$0xff]  ;;  %v10136_v28 = vld [vmem:[%s14207_s18 + $0x268] sm:$0xff] }
 0x33d   :  { %4180 = vmatpush.bf16.msra.mxu1 %v10106_v25  ;;  %4206 = vmatpush.bf16.msrb.mxu3 %v10122_v26  ;;  %v10153_v25 = vld [vmem:[%s14207_s18 + $0x2f0] sm:$0xff]  ;;  %v10152_v29 = vld [vmem:[%s14207_s18 + $0x2e8] sm:$0xff]  ;;  %v10150_v54 = vld [vmem:[%s14207_s18 + $0x2d8] sm:$0xff] }
 0x33f   :  { %4169 = vmatpush.bf16.msra.mxu0 %v10096_v40  ;;  %4195 = vmatpush.bf16.msrb.mxu2 %v10112_v27  ;;  %v12769_v59 = vpop.f32.mrf.mxu3  ;;  %v10127_v40 = vld [vmem:[%s14207_s18 + $0x220] sm:$0xff] }
 0x340   :  { %v10143_v27 = vld [vmem:[%s14207_s18 + $0x2a0] sm:$0xff] }
 0x341   :  { %4181 = vmatpush.bf16.msra.mxu1 %v10105_v32  ;;  %4207 = vmatpush.bf16.msrb.mxu3 %v10121_v33  ;;  %v2875_v49 = vpop.f32.mrf.mxu1  ;;  %v2888_v2 = vpop.f32.mrf.mxu2  ;;  %v10126_v32 = vld [vmem:[%s14207_s18 + $0x218] sm:$0xff] }
 0x342   :  { %v10142_v33 = vld [vmem:[%s14207_s18 + $0x298] sm:$0xff]  ;;  %v10133_v2 = vld [vmem:[%s14207_s18 + $0x250] sm:$0xff] }
 0x343   :  { %4170 = vmatpush.bf16.msra.mxu0 %v10095_v63  ;;  %4196 = vmatpush.bf16.msrb.mxu2 %v10111_v37 }
 0x345   :  { %4182 = vmatpush.bf16.msra.mxu1 %v10104_v39  ;;  %4208 = vmatpush.bf16.msrb.mxu3 %v10120_v42  ;;  %v10135_v39 = vld [vmem:[%s14207_s18 + $0x260] sm:$0xff] }
 0x346   :  { %v10151_v42 = vld [vmem:[%s14207_s18 + $0x2e0] sm:$0xff] }
 0x347   :  { %4171 = vmatpush.bf16.msra.mxu0 %v10094_v43  ;;  %4197 = vmatpush.bf16.msrb.mxu2 %v10110_v30  ;;  %v2901_v16 = vpop.f32.mrf.mxu3  ;;  %v10125_v30 = vld [vmem:[%s14207_s18 + $0x210] sm:$0xff] }
 0x349   :  { %4183 = vmatpush.bf16.msra.mxu1 %v10103_v46  ;;  %4209 = vmatpush.bf16.msrb.mxu3 %v10119_v51  ;;  %v10141_v46 = vld [vmem:[%s14207_s18 + $0x290] sm:$0xff]  ;;  %v10134_v51 = vld [vmem:[%s14207_s18 + $0x258] sm:$0xff] }
 0x34b   :  { %4172 = vmatpush.bf16.msra.mxu0 %v10093_v55  ;;  %4198 = vmatpush.bf16.msrb.mxu2 %v10109_v56  ;;  %v10124_v56 = vld [vmem:[%s14207_s18 + $0x208] sm:$0xff] }
 0x34d   :  { %4184 = vmatpush.bf16.msra.mxu1 %v10102_v57  ;;  %4210 = vmatpush.bf16.msrb.mxu3 %v10118_v58  ;;  %v10140_v57 = vld [vmem:[%s14207_s18 + $0x288] sm:$0xff] }
 0x34f   :  { %4173 = vmatpush.bf16.msra.mxu0 %v10092_v62  ;;  %4199 = vmatpush.bf16.msrb.mxu2 %v10108_v0  ;;  %v2874_v0 = vadd.f32 %v12747_v24, %v12727_v34  ;;  %v10139_v34 = vld [vmem:[%s14207_s18 + $0x280] sm:$0xff] }
 0x351   :  { %4185 = vmatpush.bf16.msra.mxu1 %v10101_v6  ;;  %4211 = vmatpush.bf16.msrb.mxu3 %v10117_v7  ;;  %v3067_v24 = vmul.f32 %v2874_v0, %v11467_v53  ;;  %v10162_v7 = vld [vmem:[%s14207_s18 + $0x338] sm:$0xff] }
 0x353   :  { %4174 = vmatpush.bf16.msra.mxu0 %v10091_v8  ;;  %4200 = vmatpush.bf16.msrb.mxu2 %v10107_v1  ;;  %v2912_v26 = vpop.f32.mrf.mxu0  ;;  %v10132_v8 = vld [vmem:[%s14207_s18 + $0x248] sm:$0xff]  ;;  %v2900_v1 = vadd.f32 %v12769_v59, %v12749_v44  ;;  %v10161_v44 = vld [vmem:[%s14207_s18 + $0x330] sm:$0xff]  ;;  %v10131_v59 = vld [vmem:[%s14207_s18 + $0x240] sm:$0xff] }
 0x355   :  { %4186 = vmatpush.bf16.msra.mxu1 %v10100_v10  ;;  %4212 = vmatpush.bf16.msrb.mxu3 %v10116_v52  ;;  %v3083_v10 = vpack.c.bf16 %v3067_v24, %v3067_v24  ;;  %v3068_v16 = vmul.f32 %v2900_v1, %v11511_v18 }
 0x356   :  { %4175 = vmatmul.bf16.vlgmr.msra.gmra.mxu0 %v3079_v11  ;;  %4201 = vmatmul.bf16.vlgmr.msrb.gmra.mxu2 %v3081_v12  ;;  %v10170_v11 = vld [vmem:[%s14207_s18 + $0x378] sm:$0xff] }
 0x357   :  { %4219 = vmatpush.bf16.msrb.mxu0 %v10130_v48  ;;  %4245 = vmatpush.bf16.msra.mxu2 %v10146_v47  ;;  %v10178_v48 = vld [vmem:[%s14207_s18 + $0x3b8] sm:$0xff] }
 0x359   :  { %4187 = vmatpush.bf16.msra.mxu1 %v10099_v50  ;;  %4213 = vmatpush.bf16.msrb.mxu3 %v10115_v61  ;;  %v2925_v63 = vpop.f32.mrf.mxu1  ;;  %v2938_v37 = vpop.f32.mrf.mxu2  ;;  %v10160_v50 = vld [vmem:[%s14207_s18 + $0x328] sm:$0xff]  ;;  %v3084_v61 = vpack.c.bf16 %v3068_v16, %v3068_v16 }
 0x35a   :  { %v2926_v49 = vadd.f32 %v2925_v63, %v2912_v26  ;;  %v10166_v63 = vld [vmem:[%s14207_s18 + $0x358] sm:$0xff] }
 0x35b   :  { %4220 = vmatpush.bf16.msrb.mxu0 %v10129_v13  ;;  %4246 = vmatpush.bf16.msra.mxu2 %v10145_v14  ;;  %v2914_v43 = vpop.f32.mrf.mxu0  ;;  %v10177_v13 = vld [vmem:[%s14207_s18 + $0x3b0] sm:$0xff]  ;;  %v10186_v14 = vld [vmem:[%s14207_s18 + $0x3f8] sm:$0xff] }
 0x35c   :  { %4188 = vmatmul.bf16.vlgmr.msra.gmra.mxu1 %v3080_v45  ;;  %4214 = vmatmul.bf16.vlgmr.msrb.gmra.mxu3 %v3082_v22  ;;  %v3069_v6 = vmul.f32 %v2926_v49, %v11467_v53  ;;  %v10168_v45 = vld [vmem:[%s14207_s18 + $0x368] sm:$0xff]  ;;  %v10175_v22 = vld [vmem:[%s14207_s18 + $0x3a0] sm:$0xff] }
 0x35d   :  { %4232 = vmatpush.bf16.msrb.mxu1 %v10138_v20  ;;  %4258 = vmatpush.bf16.msra.mxu3 %v10154_v21  ;;  %v10176_v20 = vld [vmem:[%s14207_s18 + $0x3a8] sm:$0xff]  ;;  %v10185_v21 = vld [vmem:[%s14207_s18 + $0x3f0] sm:$0xff]  ;;  %v10171_v49 = vld [vmem:[%s14207_s18 + $0x380] sm:$0xff] }
 0x35e   :  { %v3085_v52 = vpack.c.bf16 %v3069_v6, %v3069_v6  ;;  %v10156_v43 = vld [vmem:[%s14207_s18 + $0x308] sm:$0xff]  ;;  %v10179_v6 = vld [vmem:[%s14207_s18 + $0x3c0] sm:$0xff] }
 0x35f   :  { %4221 = vmatpush.bf16.msrb.mxu0 %v10128_v60  ;;  %4247 = vmatpush.bf16.msra.mxu2 %v10144_v17  ;;  %v2951_v55 = vpop.f32.mrf.mxu3  ;;  %v10159_v17 = vld [vmem:[%s14207_s18 + $0x320] sm:$0xff] }
 0x360   :  { %v2952_v47 = vadd.f32 %v2951_v55, %v2938_v37  ;;  %v10173_v37 = vld [vmem:[%s14207_s18 + $0x390] sm:$0xff]  ;;  %v10172_v55 = vld [vmem:[%s14207_s18 + $0x388] sm:$0xff] }
 0x361   :  { %4233 = vmatpush.bf16.msrb.mxu1 %v10137_v23  ;;  %4259 = vmatpush.bf16.msra.mxu3 %v10153_v25  ;;  %v2927_v58 = vpop.f32.mrf.mxu1  ;;  %v2940_v62 = vpop.f32.mrf.mxu2  ;;  %v10184_v23 = vld [vmem:[%s14207_s18 + $0x3e8] sm:$0xff]  ;;  %v10158_v25 = vld [vmem:[%s14207_s18 + $0x318] sm:$0xff] }
 0x362   :  { %v3070_v12 = vmul.f32 %v2952_v47, %v11511_v18  ;;  %v10164_v62 = vld [vmem:[%s14207_s18 + $0x348] sm:$0xff] }
 0x363   :  { %4222 = vmatpush.bf16.msrb.mxu0 %v10127_v40  ;;  %4248 = vmatpush.bf16.msra.mxu2 %v10143_v27  ;;  %v10167_v27 = vld [vmem:[%s14207_s18 + $0x360] sm:$0xff] }
 0x364   :  { %v3086_v19 = vpack.c.bf16 %v3070_v12, %v3070_v12 }
 0x365   :  { %4234 = vmatpush.bf16.msrb.mxu1 %v10136_v28  ;;  %4260 = vmatpush.bf16.msra.mxu3 %v10152_v29  ;;  %v10174_v28 = vld [vmem:[%s14207_s18 + $0x398] sm:$0xff]  ;;  %v10183_v29 = vld [vmem:[%s14207_s18 + $0x3e0] sm:$0xff] }
 0x367   :  { %4223 = vmatpush.bf16.msrb.mxu0 %v10126_v32  ;;  %4249 = vmatpush.bf16.msra.mxu2 %v10142_v33  ;;  %v2953_v41 = vpop.f32.mrf.mxu3  ;;  %v10157_v33 = vld [vmem:[%s14207_s18 + $0x310] sm:$0xff] }
 0x369   :  { %4235 = vmatpush.bf16.msrb.mxu1 %v10135_v39  ;;  %4261 = vmatpush.bf16.msra.mxu3 %v10151_v42  ;;  %v10182_v39 = vld [vmem:[%s14207_s18 + $0x3d8] sm:$0xff] }
 0x36b   :  { %4224 = vmatpush.bf16.msrb.mxu0 %v10125_v30  ;;  %4250 = vmatpush.bf16.msra.mxu2 %v10141_v46 }
 0x36d   :  { %4236 = vmatpush.bf16.msrb.mxu1 %v10134_v51  ;;  %4262 = vmatpush.bf16.msra.mxu3 %v10150_v54  ;;  %v10165_v54 = vld [vmem:[%s14207_s18 + $0x350] sm:$0xff] }
 0x36f   :  { %4225 = vmatpush.bf16.msrb.mxu0 %v10124_v56  ;;  %4251 = vmatpush.bf16.msra.mxu2 %v10140_v57  ;;  %v10181_v56 = vld [vmem:[%s14207_s18 + $0x3d0] sm:$0xff]  ;;  %v10155_v57 = vld [vmem:[%s14207_s18 + $0x300] sm:$0xff] }
 0x371   :  { %4237 = vmatpush.bf16.msrb.mxu1 %v10133_v2  ;;  %4263 = vmatpush.bf16.msra.mxu3 %v10149_v3  ;;  %v10180_v2 = vld [vmem:[%s14207_s18 + $0x3c8] sm:$0xff] }
 0x373   :  { %4226 = vmatpush.bf16.msrb.mxu0 %v10123_v5  ;;  %4252 = vmatpush.bf16.msra.mxu2 %v10139_v34  ;;  %v2964_v60 = vpop.f32.mrf.mxu0  ;;  %v10163_v34 = vld [vmem:[%s14207_s18 + $0x340] sm:$0xff] }
 0x375   :  { %4238 = vmatpush.bf16.msrb.mxu1 %v10132_v8  ;;  %4264 = vmatpush.bf16.msra.mxu3 %v10148_v31 }
 0x376   :  { %4227 = vmatmul.bf16.vlgmr.msrb.gmra.mxu0 %v3083_v10  ;;  %4253 = vmatmul.bf16.vlgmr.msra.gmra.mxu2 %v3085_v52 }
 0x377   :  { %4271 = vmatpush.bf16.msra.mxu0 %v10162_v7  ;;  %4297 = vmatpush.bf16.msrb.mxu2 %v10178_v48 }
 0x379   :  { %4239 = vmatpush.bf16.msrb.mxu1 %v10131_v59  ;;  %4265 = vmatpush.bf16.msra.mxu3 %v10147_v9  ;;  %v2977_v26 = vpop.f32.mrf.mxu1  ;;  %v2990_v40 = vpop.f32.mrf.mxu2 }
 0x37a   :  { %v2978_v30 = vadd.f32 %v2977_v26, %v2964_v60 }
 0x37b   :  { %4272 = vmatpush.bf16.msra.mxu0 %v10161_v44  ;;  %4298 = vmatpush.bf16.msrb.mxu2 %v10177_v13  ;;  %v2966_v32 = vpop.f32.mrf.mxu0 }
 0x37c   :  { %4240 = vmatmul.bf16.vlgmr.msrb.gmra.mxu1 %v3084_v61  ;;  %4266 = vmatmul.bf16.vlgmr.msra.gmra.mxu3 %v3086_v19  ;;  %v3071_v58 = vmul.f32 %v2978_v30, %v11467_v53 }
 0x37d   :  { %4284 = vmatpush.bf16.msra.mxu1 %v10170_v11  ;;  %4310 = vmatpush.bf16.msrb.mxu3 %v10186_v14 }
 0x37e   :  { %v3087_v5 = vpack.c.bf16 %v3071_v58, %v3071_v58 }
 0x37f   :  { %4273 = vmatpush.bf16.msra.mxu0 %v10160_v50  ;;  %4299 = vmatpush.bf16.msrb.mxu2 %v10176_v20  ;;  %v3003_v42 = vpop.f32.mrf.mxu3 }
 0x380   :  { %v3004_v0 = vadd.f32 %v3003_v42, %v2990_v40 }
 0x381   :  { %4285 = vmatpush.bf16.msra.mxu1 %v10169_v15  ;;  %4311 = vmatpush.bf16.msrb.mxu3 %v10185_v21  ;;  %v2979_v46 = vpop.f32.mrf.mxu1  ;;  %v2992_v51 = vpop.f32.mrf.mxu2 }
 0x382   :  { %v3072_v24 = vmul.f32 %v3004_v0, %v11511_v18  ;;  %v4337_v0 = vld [vmem:[%s14208_s11 + $0x38] sm:$0xff] }
 0x383   :  { %4274 = vmatpush.bf16.msra.mxu0 %v10159_v17  ;;  %4300 = vmatpush.bf16.msrb.mxu2 %v10175_v22 }
 0x384   :  { %v3088_v7 = vpack.c.bf16 %v3072_v24, %v3072_v24  ;;  %v4333_v24 = vld [vmem:[%s14208_s11 + $0x18] sm:$0xff] }
 0x385   :  { %4286 = vmatpush.bf16.msra.mxu1 %v10168_v45  ;;  %4312 = vmatpush.bf16.msrb.mxu3 %v10184_v23 }
 0x387   :  { %4275 = vmatpush.bf16.msra.mxu0 %v10158_v25  ;;  %4301 = vmatpush.bf16.msrb.mxu2 %v10174_v28  ;;  %v3005_v3 = vpop.f32.mrf.mxu3 }
 0x388   :  { %v4335_v3 = vld [vmem:[%s14208_s11 + $0x28] sm:$0xff] }
 0x389   :  { %4287 = vmatpush.bf16.msra.mxu1 %v10167_v27  ;;  %4313 = vmatpush.bf16.msrb.mxu3 %v10183_v29 }
 0x38b   :  { %4276 = vmatpush.bf16.msra.mxu0 %v10157_v33  ;;  %4302 = vmatpush.bf16.msrb.mxu2 %v10173_v37 }
 0x38d   :  { %4288 = vmatpush.bf16.msra.mxu1 %v10166_v63  ;;  %4314 = vmatpush.bf16.msrb.mxu3 %v10182_v39 }
 0x38f   :  { %4277 = vmatpush.bf16.msra.mxu0 %v10156_v43  ;;  %4303 = vmatpush.bf16.msrb.mxu2 %v10172_v55 }
 0x391   :  { %4289 = vmatpush.bf16.msra.mxu1 %v10165_v54  ;;  %4315 = vmatpush.bf16.msrb.mxu3 %v10181_v56 }
 0x393   :  { %4278 = vmatpush.bf16.msra.mxu0 %v10155_v57  ;;  %4304 = vmatpush.bf16.msrb.mxu2 %v10171_v49  ;;  %v3016_v8 = vpop.f32.mrf.mxu0  ;;  %v4336_v49 = vld [vmem:[%s14208_s11 + $0x30] sm:$0xff] }
 0x395   :  { %4290 = vmatpush.bf16.msra.mxu1 %v10164_v62  ;;  %4316 = vmatpush.bf16.msrb.mxu3 %v10180_v2 }
 0x396   :  { %4279 = vmatmul.bf16.vlgmr.msra.gmra.mxu0 %v3087_v5 }
 0x397   :  { %4350 = vmatpush.msrb.mxu0 %v4337_v0 }
 0x399   :  { %4291 = vmatpush.bf16.msra.mxu1 %v10163_v34  ;;  %4317 = vmatpush.bf16.msrb.mxu3 %v10179_v6  ;;  %v3029_v1 = vpop.f32.mrf.mxu1  ;;  %v3042_v31 = vpop.f32.mrf.mxu2  ;;  %v4334_v34 = vld [vmem:[%s14208_s11 + $0x20] sm:$0xff] }
 0x39a   :  { %v3030_v41 = vadd.f32 %v3029_v1, %v3016_v8  ;;  %4351 = vmatpush.msrb.mxu0 %v4336_v49  ;;  %v4332_v8 = vld [vmem:[%s14208_s11 + $0x10] sm:$0xff]  ;;  %v8786_v49 = vld [vmem:[%s14209_s9] sm:$0xf] }
 0x39b   :  { %v3018_v48 = vpop.f32.mrf.mxu0 }
 0x39c   :  { %4292 = vmatmul.bf16.vlgmr.msra.gmra.mxu1 %v3088_v7  ;;  %v3073_v47 = vmul.f32 %v3030_v41, %v11467_v53  ;;  %4352 = vmatpush.msrb.mxu0 %v4335_v3  ;;  %v4330_v48 = vld [vmem:[%s14208_s11] sm:$0xff] }
 0x39d   :  { %v10187_v3 = vld [vmem:[%s14209_s9 + $0x4] sm:$0xf] }
 0x39e   :  { %v3089_v10 = vpack.c.bf16 %v3073_v47, %v3073_v47  ;;  %4353 = vmatpush.msrb.mxu0 %v4334_v34  ;;  %v8788_v34 = vld [vmem:[%s14209_s9 + $0x40] sm:$0xf0] }
 0x39f   :  { %v3055_v52 = vpop.f32.mrf.mxu3 }
 0x3a0   :  { %v3056_v44 = vadd.f32 %v3055_v52, %v3042_v31  ;;  %4305 = vmatmul.bf16.vlgmr.msrb.gmra.mxu2 %v3089_v10  ;;  %4354 = vmatpush.msrb.mxu0 %v4333_v24  ;;  %v4331_v31 = vld [vmem:[%s14208_s11 + $0x8] sm:$0xff]  ;;  %v8978_v10 = vld [vmem:[%s14209_s9 + $0x180] sm:$0xf] }
 0x3a1   :  { %v3031_v59 = vpop.f32.mrf.mxu1  ;;  %v3044_v16 = vpop.f32.mrf.mxu2  ;;  %v10243_v52 = vld [vmem:[%s14209_s9 + $0x1bc] sm:$0xf0]  ;;  %v10188_v24 = vld [vmem:[%s14209_s9 + $0xc] sm:$0xf] }
 0x3a2   :  { %v3074_v9 = vmul.f32 %v3056_v44, %v11511_v18  ;;  %4355 = vmatpush.msrb.mxu0 %v4332_v8  ;;  %v10235_v44 = vld [vmem:[%s14209_s9 + $0x184] sm:$0xf]  ;;  %v8979_v16 = vor.u32 %v10243_v52, %v8978_v10  ;;  %v10237_v10 = vld [vmem:[%s14209_s9 + $0x194] sm:$0xf] }
 0x3a4   :  { %v3090_v11 = vpack.c.bf16 %v3074_v9, %v3074_v9  ;;  %4356 = vmatpush.msrb.mxu0 %v4331_v31  ;;  %v8980_v9 = vld [vmem:[%s14209_s9 + $0x1c0] sm:$0xf0]  ;;  %4756 = vmatpush.bf16.msrb.mxu1 %v8979_v16  ;;  %v10197_v31 = vld [vmem:[%s14209_s9 + $0x4c] sm:$0xf0]  ;;  %v9004_v16 = vld [vmem:[%s14209_s9 + $0x1d8] sm:$0xf0] }
 0x3a6   :  { %4318 = vmatmul.bf16.vlgmr.msrb.gmra.mxu3 %v3090_v11  ;;  %v10236_v11 = vld [vmem:[%s14209_s9 + $0x18c] sm:$0xf]  ;;  %4357 = vmatpush.msrb.mxu0 %v4330_v48  ;;  %v8986_v48 = vld [vmem:[%s14209_s9 + $0x188] sm:$0xf] }
 0x3a7   :  { %v3057_v12 = vpop.f32.mrf.mxu3 }
 0x3a8   :  { %v8988_v12 = vld [vmem:[%s14209_s9 + $0x1c8] sm:$0xf0] }
 0x3b3   :  { %v4124_v13 = vpop.f32.mrf.mxu0 }
 0x3b9   :  { %v4137_v14 = vpop.f32.mrf.mxu1  ;;  %v4150_v50 = vpop.f32.mrf.mxu2 }
 0x3ba   :  { %v4138_v61 = vadd.f32 %v4137_v14, %v4124_v13  ;;  %v8983_v14 = vor.u32 %v10235_v44, %v8980_v9  ;;  %v8996_v44 = vld [vmem:[%s14209_s9 + $0x1d0] sm:$0xf0] }
 0x3bb   :  { %v4126_v15 = vpop.f32.mrf.mxu0  ;;  %v8999_v9 = vor.u32 %v10237_v10, %v8996_v44 }
 0x3bc   :  { %v4151_v19 = vadd.f32 %v4150_v50, %v4138_v61  ;;  %v8991_v50 = vor.u32 %v10236_v11, %v8988_v12  ;;  %v8994_v61 = vld [vmem:[%s14209_s9 + $0x190] sm:$0xf]  ;;  %4769 = vmatpush.bf16.msra.mxu0 %v8983_v14  ;;  %v9010_v12 = vld [vmem:[%s14209_s9 + $0x1a0] sm:$0xf]  ;;  %v8922_v14 = vld [vmem:[%s14209_s9 + $0x108] sm:$0xf] }
 0x3bd   :  { %v10245_v15 = vld [vmem:[%s14209_s9 + $0x1cc] sm:$0xf0] }
 0x3be   :  { %4795 = vmatpush.bf16.msra.mxu2 %v8991_v50 }
 0x3bf   :  { %v4163_v20 = vpop.f32.mrf.mxu3 }
 0x3c0   :  { %v4164_v45 = vadd.f32 %v4163_v20, %v4151_v19  ;;  %v8995_v20 = vor.u32 %v10245_v15, %v8994_v61  ;;  %v10228_v61 = vld [vmem:[%s14209_s9 + $0x144] sm:$0xf0]  ;;  %v10221_v15 = vld [vmem:[%s14209_s9 + $0x114] sm:$0xf] }
 0x3c1   :  { %v4139_v21 = vpop.f32.mrf.mxu1  ;;  %v4152_v53 = vpop.f32.mrf.mxu2 }
 0x3c2   :  { %4808 = vmatpush.bf16.msra.mxu3 %v8995_v20  ;;  %v8923_v20 = vor.u32 %v10228_v61, %v8922_v14  ;;  %v10233_v14 = vld [vmem:[%s14209_s9 + $0x16c] sm:$0xf0] }
 0x3c7   :  { %v4165_v60 = vpop.f32.mrf.mxu3 }
 0x3d3   :  { %v4176_v17 = vpop.f32.mrf.mxu0 }
 0x3d4   :  { %v4177_v22 = vadd.f32 %v4176_v17, %v4164_v45 }
 0x3d9   :  { %v4189_v23 = vpop.f32.mrf.mxu1  ;;  %v4202_v25 = vpop.f32.mrf.mxu2 }
 0x3da   :  { %v4190_v26 = vadd.f32 %v4189_v23, %v4177_v22 }
 0x3db   :  { %v4178_v18 = vpop.f32.mrf.mxu0 }
 0x3dc   :  { %v4203_v55 = vadd.f32 %v4202_v25, %v4190_v26  ;;  %v8914_v25 = vld [vmem:[%s14209_s9 + $0x100] sm:$0xf]  ;;  %v10219_v18 = vld [vmem:[%s14209_s9 + $0x104] sm:$0xf] }
 0x3dd   :  { %v10227_v26 = vld [vmem:[%s14209_s9 + $0x13c] sm:$0xf0] }
 0x3df   :  { %v4215_v40 = vpop.f32.mrf.mxu3 }
 0x3e0   :  { %v4216_v57 = vadd.f32 %v4215_v40, %v4203_v55  ;;  %v8915_v40 = vor.u32 %v10227_v26, %v8914_v25  ;;  %v8860_v55 = vld [vmem:[%s14209_s9 + $0xc8] sm:$0xf0]  ;;  %v8858_v25 = vld [vmem:[%s14209_s9 + $0x88] sm:$0xf] }
 0x3e1   :  { %v4191_v27 = vpop.f32.mrf.mxu1  ;;  %v4204_v28 = vpop.f32.mrf.mxu2  ;;  %v10212_v26 = vld [vmem:[%s14209_s9 + $0xc4] sm:$0xf0] }
 0x3e2   :  { %v8916_v27 = vld [vmem:[%s14209_s9 + $0x140] sm:$0xf0]  ;;  %v10220_v28 = vld [vmem:[%s14209_s9 + $0x10c] sm:$0xf]  ;;  %4757 = vmatpush.bf16.msrb.mxu1 %v8915_v40  ;;  %v10205_v40 = vld [vmem:[%s14209_s9 + $0x94] sm:$0xf] }
 0x3e7   :  { %v4217_v29 = vpop.f32.mrf.mxu3 }
 0x3e8   :  { %v8924_v29 = vld [vmem:[%s14209_s9 + $0x148] sm:$0xf0] }
 0x3f3   :  { %v4228_v32 = vpop.f32.mrf.mxu0 }
 0x3f4   :  { %v4229_v58 = vadd.f32 %v4228_v32, %v4216_v57  ;;  %v8919_v32 = vor.u32 %v10219_v18, %v8916_v27  ;;  %v8868_v27 = vld [vmem:[%s14209_s9 + $0xd0] sm:$0xf0] }
 0x3f6   :  { %4770 = vmatpush.bf16.msra.mxu0 %v8919_v32  ;;  %v8876_v32 = vld [vmem:[%s14209_s9 + $0xd8] sm:$0xf0] }
 0x3f9   :  { %v4241_v33 = vpop.f32.mrf.mxu1  ;;  %v4254_v63 = vpop.f32.mrf.mxu2 }
 0x3fa   :  { %v4242_v62 = vadd.f32 %v4241_v33, %v4229_v58  ;;  %v8927_v33 = vor.u32 %v10220_v28, %v8924_v29  ;;  %v8866_v58 = vld [vmem:[%s14209_s9 + $0x90] sm:$0xf]  ;;  %v10206_v28 = vld [vmem:[%s14209_s9 + $0x9c] sm:$0xf]  ;;  %v8859_v29 = vor.u32 %v10212_v26, %v8858_v25 }
 0x3fb   :  { %v4230_v37 = vpop.f32.mrf.mxu0  ;;  %v10217_v25 = vld [vmem:[%s14209_s9 + $0xec] sm:$0xf0] }
 0x3fc   :  { %v4255_v2 = vadd.f32 %v4254_v63, %v4242_v62  ;;  %v8930_v63 = vld [vmem:[%s14209_s9 + $0x110] sm:$0xf]  ;;  %4796 = vmatpush.bf16.msra.mxu2 %v8927_v33  ;;  %v8882_v33 = vld [vmem:[%s14209_s9 + $0xa0] sm:$0xf] }
 0x3fd   :  { %v10229_v37 = vld [vmem:[%s14209_s9 + $0x14c] sm:$0xf0] }
 0x3fe   :  { %v10213_v62 = vld [vmem:[%s14209_s9 + $0xcc] sm:$0xf0] }
 0x3ff   :  { %v4267_v39 = vpop.f32.mrf.mxu3  ;;  %v8867_v0 = vor.u32 %v10213_v62, %v8866_v58 }
 0x400   :  { %v4268_v5 = vadd.f32 %v4267_v39, %v4255_v2  ;;  %v8931_v39 = vor.u32 %v10229_v37, %v8930_v63  ;;  %v10195_v2 = vld [vmem:[%s14209_s9 + $0x3c] sm:$0xf0]  ;;  %v8871_v37 = vor.u32 %v10205_v40, %v8868_v27  ;;  %v8810_v40 = vld [vmem:[%s14209_s9 + $0x18] sm:$0xf] }
 0x401   :  { %v4243_v42 = vpop.f32.mrf.mxu1  ;;  %v4256_v43 = vpop.f32.mrf.mxu2  ;;  %v10215_v63 = vld [vmem:[%s14209_s9 + $0xdc] sm:$0xf0]  ;;  %v10198_v27 = vld [vmem:[%s14209_s9 + $0x54] sm:$0xf0] }
 0x402   :  { %v8850_v42 = vld [vmem:[%s14209_s9 + $0x80] sm:$0xf]  ;;  %4809 = vmatpush.bf16.msra.mxu3 %v8931_v39  ;;  %v8879_v39 = vor.u32 %v10206_v28, %v8876_v32  ;;  %v10191_v32 = vld [vmem:[%s14209_s9 + $0x24] sm:$0xf] }
 0x403   :  { %v10211_v43 = vld [vmem:[%s14209_s9 + $0xbc] sm:$0xf0] }
 0x406   :  { %4810 = vmatpush.bf16.msra.mxu3 %v8867_v0 }
 0x407   :  { %v4269_v30 = vpop.f32.mrf.mxu3 }
 0x408   :  { %v10203_v30 = vld [vmem:[%s14209_s9 + $0x84] sm:$0xf] }
 0x413   :  { %v4280_v46 = vpop.f32.mrf.mxu0 }
 0x414   :  { %v4281_v7 = vadd.f32 %v4280_v46, %v4268_v5  ;;  %v8851_v46 = vor.u32 %v10211_v43, %v8850_v42  ;;  %v8787_v5 = vor.u32 %v10195_v2, %v8786_v49  ;;  %v8794_v42 = vld [vmem:[%s14209_s9 + $0x8] sm:$0xf] }
 0x415   :  { %v10196_v43 = vld [vmem:[%s14209_s9 + $0x44] sm:$0xf0] }
 0x416   :  { %4758 = vmatpush.bf16.msrb.mxu1 %v8851_v46  ;;  %v8883_v46 = vor.u32 %v10215_v63, %v8882_v33  ;;  %v8795_v58 = vor.u32 %v10196_v43, %v8794_v42  ;;  %v8820_v33 = vld [vmem:[%s14209_s9 + $0x60] sm:$0xf0]  ;;  %v10192_v63 = vld [vmem:[%s14209_s9 + $0x2c] sm:$0xf]  ;;  %v10201_v42 = vld [vmem:[%s14209_s9 + $0x6c] sm:$0xf0]  ;;  %v8811_v43 = vor.u32 %v10198_v27, %v8810_v40 }
 0x417   :  { %v8906_v40 = vld [vmem:[%s14209_s9 + $0xb8] sm:$0xf]  ;;  %v10257_v27 = vld [vmem:[%s14210_s12 + $0x30] sm:$0xff] }
 0x419   :  { %v4293_v51 = vpop.f32.mrf.mxu1 }
 0x41a   :  { %v4294_v1 = vadd.f32 %v4293_v51, %v4281_v7  ;;  %v8852_v51 = vld [vmem:[%s14209_s9 + $0xc0] sm:$0xf0]  ;;  %v8791_v7 = vor.u32 %v10187_v3, %v8788_v34  ;;  %4759 = vmatpush.bf16.msrb.mxu1 %v8787_v5  ;;  %v9002_v3 = vld [vmem:[%s14209_s9 + $0x198] sm:$0xf] }
 0x41b   :  { %v4282_v54 = vpop.f32.mrf.mxu0  ;;  %v10246_v5 = vld [vmem:[%s14209_s9 + $0x1d4] sm:$0xf0] }
 0x41c   :  { %v10204_v54 = vld [vmem:[%s14209_s9 + $0x8c] sm:$0xf] }
 0x41d   :  { %v8863_v57 = vor.u32 %v10204_v54, %v8860_v55  ;;  %v10190_v54 = vld [vmem:[%s14209_s9 + $0x1c] sm:$0xf] }
 0x41e   :  { %v8812_v55 = vld [vmem:[%s14209_s9 + $0x58] sm:$0xf0] }
 0x41f   :  { %4797 = vmatpush.bf16.msra.mxu2 %v8863_v57  ;;  %v10199_v57 = vld [vmem:[%s14209_s9 + $0x5c] sm:$0xf0]  ;;  %v8815_v0 = vor.u32 %v10190_v54, %v8812_v55  ;;  %v10248_v55 = vld [vmem:[%s14209_s9 + $0x1e4] sm:$0xf0] }
 0x421   :  { %v4295_v56 = vpop.f32.mrf.mxu1 }
 0x422   :  { %v8855_v56 = vor.u32 %v10203_v30, %v8852_v51  ;;  %v10189_v30 = vld [vmem:[%s14209_s9 + $0x14] sm:$0xf] }
 0x423   :  { %v4306_v6 = vpop.f32.mrf.mxu2  ;;  %v8804_v51 = vld [vmem:[%s14209_s9 + $0x50] sm:$0xf0] }
 0x424   :  { %v4307_v41 = vadd.f32 %v4306_v6, %v4294_v1  ;;  %4771 = vmatpush.bf16.msra.mxu0 %v8855_v56  ;;  %v8796_v6 = vld [vmem:[%s14209_s9 + $0x48] sm:$0xf0]  ;;  %v8802_v1 = vld [vmem:[%s14209_s9 + $0x10] sm:$0xf]  ;;  %v8818_v56 = vld [vmem:[%s14209_s9 + $0x20] sm:$0xf]  ;;  %v8807_v62 = vor.u32 %v10189_v30, %v8804_v51  ;;  %v8823_v30 = vor.u32 %v10191_v32, %v8820_v33 }
 0x425   :  { %v8799_v8 = vor.u32 %v10188_v24, %v8796_v6  ;;  %v8819_v49 = vor.u32 %v10199_v57, %v8818_v56  ;;  %v10239_v24 = vld [vmem:[%s14209_s9 + $0x1a4] sm:$0xf]  ;;  %v10241_v56 = vld [vmem:[%s14209_s9 + $0x1b4] sm:$0xf] }
 0x426   :  { %v9012_v6 = vld [vmem:[%s14209_s9 + $0x1e0] sm:$0xf0]  ;;  %v9028_v57 = vld [vmem:[%s14209_s9 + $0x1f0] sm:$0xf0] }
 0x427   :  { %4798 = vmatpush.bf16.msra.mxu2 %v8799_v8  ;;  %v9015_v10 = vor.u32 %v10239_v24, %v9012_v6  ;;  %v8964_v24 = vld [vmem:[%s14209_s9 + $0x170] sm:$0xf0]  ;;  %v10226_v6 = vld [vmem:[%s14209_s9 + $0x13c] sm:$0xf] }
 0x428   :  { %4772 = vmatpush.bf16.msra.mxu0 %v8791_v7  ;;  %v10240_v7 = vld [vmem:[%s14209_s9 + $0x1ac] sm:$0xf]  ;;  %v10281_v32 = vld [vmem:[%s14210_s12 + $0xf0] sm:$0xff] }
 0x429   :  { %v4319_v47 = vpop.f32.mrf.mxu3 }
 0x42a   :  { %v4320_v59 = vadd.f32 %v4319_v47, %v4307_v41  ;;  %v8803_v41 = vor.u32 %v10197_v31, %v8802_v1  ;;  %v10244_v47 = vld [vmem:[%s14209_s9 + $0x1c4] sm:$0xf0]  ;;  %v9020_v1 = vld [vmem:[%s14209_s9 + $0x1e8] sm:$0xf0]  ;;  %v9026_v31 = vld [vmem:[%s14209_s9 + $0x1b0] sm:$0xf] }
 0x42b   :  { %v4308_v13 = vpop.f32.mrf.mxu2  ;;  %v8987_v52 = vor.u32 %v10244_v47, %v8986_v48  ;;  %v9003_v47 = vor.u32 %v10246_v5, %v9002_v3  ;;  %v9023_v44 = vor.u32 %v10240_v7, %v9020_v1  ;;  %v10232_v5 = vld [vmem:[%s14209_s9 + $0x164] sm:$0xf0]  ;;  %v8972_v7 = vld [vmem:[%s14209_s9 + $0x178] sm:$0xf0] }
 0x42c   :  { %v4323_v19 = vsub.f32 0.0, %v4320_v59  ;;  %4811 = vmatpush.bf16.msra.mxu3 %v8803_v41  ;;  %v10238_v59 = vld [vmem:[%s14209_s9 + $0x19c] sm:$0xf]  ;;  %v10247_v13 = vld [vmem:[%s14209_s9 + $0x1dc] sm:$0xf0] }
 0x42d   :  { %v9007_v11 = vor.u32 %v10238_v59, %v9004_v16  ;;  %4782 = vmatpush.bf16.msra.mxu1 %v8987_v52  ;;  %v9011_v50 = vor.u32 %v10247_v13, %v9010_v12  ;;  %v10249_v41 = vld [vmem:[%s14209_s9 + $0x1ec] sm:$0xf0]  ;;  %v10230_v52 = vld [vmem:[%s14209_s9 + $0x154] sm:$0xf0]  ;;  %v10223_v16 = vld [vmem:[%s14209_s9 + $0x124] sm:$0xf] }
 0x42e   :  { %v4324_v21 = vmul.f32 1.442695, %v4323_v19  ;;  %v8932_v19 = vld [vmem:[%s14209_s9 + $0x150] sm:$0xf0]  ;;  %v9027_v59 = vor.u32 %v10249_v41, %v9026_v31  ;;  %v8956_v12 = vld [vmem:[%s14209_s9 + $0x168] sm:$0xf0]  ;;  %v8975_v41 = vor.u32 %v10226_v6, %v8972_v7 }
 0x42f   :  { %4847 = vmatpush.bf16.msrb.mxu2 %v9007_v11  ;;  %v10224_v11 = vld [vmem:[%s14209_s9 + $0x12c] sm:$0xf]  ;;  %v8962_v13 = vld [vmem:[%s14209_s9 + $0x130] sm:$0xf]  ;;  %v8890_v31 = vld [vmem:[%s14209_s9 + $0xa8] sm:$0xf] }
 0x430   :  { %10428 = vpow2.f32 %v4324_v21  ;;  %v8935_v21 = vor.u32 %v10221_v15, %v8932_v19  ;;  %4860 = vmatpush.bf16.msrb.mxu3 %v9011_v50  ;;  %v8874_v15 = vld [vmem:[%s14209_s9 + $0x98] sm:$0xf]  ;;  %v10271_v6 = vld [vmem:[%s14210_s12 + $0xa0] sm:$0xff] }
 0x431   :  { %v4321_v53 = vpop.f32.mrf.mxu3  ;;  %4783 = vmatpush.bf16.msra.mxu1 %v8923_v20  ;;  %v10214_v19 = vld [vmem:[%s14209_s9 + $0xd4] sm:$0xf0]  ;;  %v8959_v20 = vor.u32 %v10224_v11, %v8956_v12  ;;  %v10200_v12 = vld [vmem:[%s14209_s9 + $0x64] sm:$0xf0]  ;;  %v10251_v7 = vld [vmem:[%s14210_s12] sm:$0xff] }
 0x432   :  { %v10222_v53 = vld [vmem:[%s14209_s9 + $0x11c] sm:$0xf]  ;;  %v8875_v26 = vor.u32 %v10214_v19, %v8874_v15 }
 0x435   :  { %4784 = vmatpush.bf16.msra.mxu1 %v8859_v29 }
 0x436   :  { %v10429_v60 = vpop.eup %10428 }
 0x437   :  { %v4326_v17 = vadd.f32 1.0, %v10429_v60  ;;  %v8940_v60 = vld [vmem:[%s14209_s9 + $0x158] sm:$0xf0] }
 0x439   :  { %10430 = vrcp.f32 %v4326_v17  ;;  %v8946_v17 = vld [vmem:[%s14209_s9 + $0x120] sm:$0xf]  ;;  %4785 = vmatpush.bf16.msra.mxu1 %v8795_v58  ;;  %v10242_v58 = vld [vmem:[%s14209_s9 + $0x1bc] sm:$0xf] }
 0x43f   :  { %v10431_v45 = vpop.eup %10430 }
 0x440   :  { %v4328_v22 = vmul.f32 1.442695, %v10431_v45  ;;  %v8943_v45 = vor.u32 %v10222_v53, %v8940_v60  ;;  %v10207_v53 = vld [vmem:[%s14209_s9 + $0xa4] sm:$0xf] }
 0x441   :  { %v8884_v60 = vld [vmem:[%s14209_s9 + $0xe0] sm:$0xf0] }
 0x442   :  { %10432 = vpow2.f32 %v4328_v22  ;;  %v10231_v22 = vld [vmem:[%s14209_s9 + $0x15c] sm:$0xf0]  ;;  %4848 = vmatpush.bf16.msrb.mxu2 %v8943_v45  ;;  %v8892_v45 = vld [vmem:[%s14209_s9 + $0xe8] sm:$0xf0] }
 0x443   :  { %v8947_v18 = vor.u32 %v10231_v22, %v8946_v17  ;;  %v10208_v17 = vld [vmem:[%s14209_s9 + $0xac] sm:$0xf]  ;;  %v8898_v22 = vld [vmem:[%s14209_s9 + $0xb0] sm:$0xf] }
 0x444   :  { %v8895_v28 = vor.u32 %v10208_v17, %v8892_v45  ;;  %v8899_v29 = vor.u32 %v10217_v25, %v8898_v22  ;;  %v8970_v17 = vld [vmem:[%s14209_s9 + $0x138] sm:$0xf] }
 0x445   :  { %4861 = vmatpush.bf16.msrb.mxu3 %v8947_v18  ;;  %v8887_v18 = vor.u32 %v10207_v53, %v8884_v60  ;;  %v10250_v53 = vld [vmem:[%s14209_s9 + $0x1f4] sm:$0xf0] }
 0x446   :  { %4849 = vmatpush.bf16.msrb.mxu2 %v8879_v39  ;;  %v8834_v39 = vld [vmem:[%s14209_s9 + $0x30] sm:$0xf]  ;;  %v10234_v45 = vld [vmem:[%s14209_s9 + $0x174] sm:$0xf0] }
 0x447   :  { %v8835_v54 = vor.u32 %v10201_v42, %v8834_v39  ;;  %v10258_v22 = vld [vmem:[%s14210_s12 + $0x38] sm:$0xff]  ;;  %v10264_v42 = vld [vmem:[%s14210_s12 + $0x68] sm:$0xff] }
 0x448   :  { %v13064_v23 = vpop.eup %10432  ;;  %v10266_v25 = vld [vmem:[%s14210_s12 + $0x78] sm:$0xff] }
 0x449   :  { %8783 = vmatmul.msk.f32.vlgmr.msrb.gmra.mxu0 %vm4338_vm5, %v13064_v23  ;;  %4862 = vmatpush.bf16.msrb.mxu3 %v8883_v46  ;;  %v9018_v46 = vld [vmem:[%s14209_s9 + $0x1a8] sm:$0xf]  ;;  %v10202_v39 = vld [vmem:[%s14209_s9 + $0x74] sm:$0xf0] }
 0x44a   :  { %4821 = vmatpush.bf16.msrb.mxu0 %v8999_v9  ;;  %4850 = vmatpush.bf16.msrb.mxu2 %v8815_v0  ;;  %v8948_v9 = vld [vmem:[%s14209_s9 + $0x160] sm:$0xf0]  ;;  %v9019_v0 = vor.u32 %v10248_v55, %v9018_v46  ;;  %v10274_v55 = vld [vmem:[%s14210_s12 + $0xb8] sm:$0xff] }
 0x44b   :  { %v8951_v61 = vor.u32 %v10223_v16, %v8948_v9  ;;  %v8826_v9 = vld [vmem:[%s14209_s9 + $0x28] sm:$0xf]  ;;  %v10255_v46 = vld [vmem:[%s14210_s12 + $0x20] sm:$0xff] }
 0x44c   :  { %v8827_v15 = vor.u32 %v10200_v12, %v8826_v9  ;;  %v10268_v9 = vld [vmem:[%s14210_s12 + $0x88] sm:$0xff]  ;;  %v10287_v12 = vld [vmem:[%s14210_s12 + $0x120] sm:$0xff] }
 0x44d   :  { %4863 = vmatpush.bf16.msrb.mxu3 %v8819_v49  ;;  %v9031_v49 = vor.u32 %v10241_v56, %v9028_v57  ;;  %v10254_v56 = vld [vmem:[%s14210_s12 + $0x18] sm:$0xff] }
 0x44e   :  { %4822 = vmatpush.bf16.msrb.mxu0 %v8935_v21  ;;  %v8963_v21 = vor.u32 %v10233_v14, %v8962_v13  ;;  %v10193_v13 = vld [vmem:[%s14209_s9 + $0x34] sm:$0xf]  ;;  %v10262_v57 = vld [vmem:[%s14210_s12 + $0x58] sm:$0xff] }
 0x44f   :  { %v8836_v14 = vld [vmem:[%s14209_s9 + $0x70] sm:$0xf0] }
 0x450   :  { %v8839_v19 = vor.u32 %v10193_v13, %v8836_v14  ;;  %v10295_v13 = vld [vmem:[%s14210_s12 + $0x160] sm:$0xff] }
 0x451   :  { %v10267_v14 = vld [vmem:[%s14210_s12 + $0x80] sm:$0xff] }
 0x452   :  { %4823 = vmatpush.bf16.msrb.mxu0 %v8871_v37  ;;  %v8828_v37 = vld [vmem:[%s14209_s9 + $0x68] sm:$0xf0] }
 0x453   :  { %v8831_v51 = vor.u32 %v10192_v63, %v8828_v37  ;;  %v8842_v63 = vld [vmem:[%s14209_s9 + $0x38] sm:$0xf]  ;;  %v10256_v37 = vld [vmem:[%s14210_s12 + $0x28] sm:$0xff] }
 0x456   :  { %4824 = vmatpush.bf16.msrb.mxu0 %v8807_v62  ;;  %v9036_v62 = vld [vmem:[%s14209_s9 + $0x1f8] sm:$0xf0] }
 0x457   :  { %v9039_v3 = vor.u32 %v10242_v58, %v9036_v62  ;;  %v10278_v58 = vld [vmem:[%s14210_s12 + $0xd8] sm:$0xff]  ;;  %v10273_v62 = vld [vmem:[%s14210_s12 + $0xb0] sm:$0xff] }
 0x4c6   :  { %v4359_v2 = vpop.f32.mrf.mxu0 }
 0x4c7   :  { %10434 = vrcp.f32 %v4359_v2  ;;  %v8954_v2 = vld [vmem:[%s14209_s9 + $0x128] sm:$0xf] }
 0x4cd   :  { %v10435_v34 = vpop.eup %10434 }
 0x4ce   :  { %v4363_v8 = vmul.f32 %v10435_v34, %v13064_v23  ;;  %v8938_v23 = vld [vmem:[%s14209_s9 + $0x118] sm:$0xf]  ;;  %v10225_v34 = vld [vmem:[%s14209_s9 + $0x134] sm:$0xf] }
 0x4cf   :  { %v8939_v50 = vor.u32 %v10230_v52, %v8938_v23  ;;  %v8967_v1 = vor.u32 %v10225_v34, %v8964_v24  ;;  %v8900_v23 = vld [vmem:[%s14209_s9 + $0xf0] sm:$0xf0]  ;;  %v10210_v52 = vld [vmem:[%s14209_s9 + $0xbc] sm:$0xf]  ;;  %v10260_v34 = vld [vmem:[%s14210_s12 + $0x48] sm:$0xff] }
 0x4d0   :  { %v13261_v48 = vpack.c.bf16 %v4363_v8, %v4363_v8  ;;  %v8955_v8 = vor.u32 %v10232_v5, %v8954_v2  ;;  %v10277_v2 = vld [vmem:[%s14210_s12 + $0xd0] sm:$0xff]  ;;  %v10252_v5 = vld [vmem:[%s14210_s12 + $0x8] sm:$0xff] }
 0x4d1   :  { %v10276_v24 = vld [vmem:[%s14210_s12 + $0xc8] sm:$0xff] }
 0x4d2   :  { %9040 = vmatmul.msk.bf16.vlgmr.msrb.gmra.mxu1 %vm4338_vm5, %v13261_v48  ;;  %9041 = vmatmul.msk.bf16.vlgmr.msra.gmra.mxu0 %vm4338_vm5, %v13261_v48 }
 0x4d3   :  { %9043 = vmatmul.msk.bf16.vlgmr.msra.gmra.mxu2 %vm4338_vm5, %v13261_v48  ;;  %9044 = vmatmul.msk.bf16.vlgmr.msra.gmra.mxu3 %vm4338_vm5, %v13261_v48 }
 0x4d4   :  { %4834 = vmatpush.bf16.msrb.mxu1 %v9003_v47  ;;  %4873 = vmatpush.bf16.msra.mxu0 %v9015_v10  ;;  %v10216_v47 = vld [vmem:[%s14209_s9 + $0xe4] sm:$0xf0]  ;;  %v10209_v10 = vld [vmem:[%s14209_s9 + $0xb4] sm:$0xf] }
 0x4d5   :  { %4899 = vmatpush.bf16.msra.mxu2 %v9023_v44  ;;  %4912 = vmatpush.bf16.msra.mxu3 %v9027_v59  ;;  %v8908_v44 = vld [vmem:[%s14209_s9 + $0xf8] sm:$0xf0]  ;;  %v8891_v59 = vor.u32 %v10216_v47, %v8890_v31  ;;  %v8903_v16 = vor.u32 %v10209_v10, %v8900_v23  ;;  %v10275_v47 = vld [vmem:[%s14210_s12 + $0xc0] sm:$0xff]  ;;  %v10289_v23 = vld [vmem:[%s14210_s12 + $0x130] sm:$0xff] }
 0x4d6   :  { %v8911_v11 = vor.u32 %v10210_v52, %v8908_v44  ;;  %v10298_v31 = vld [vmem:[%s14210_s12 + $0x178] sm:$0xff]  ;;  %v10297_v52 = vld [vmem:[%s14210_s12 + $0x170] sm:$0xff] }
 0x4d7   :  { %v10314_v10 = vld [vmem:[%s14210_s12 + $0x1f8] sm:$0xff]  ;;  %v10269_v44 = vld [vmem:[%s14210_s12 + $0x90] sm:$0xff] }
 0x4d8   :  { %4835 = vmatpush.bf16.msrb.mxu1 %v8939_v50  ;;  %4874 = vmatpush.bf16.msra.mxu0 %v8951_v61  ;;  %v10194_v50 = vld [vmem:[%s14209_s9 + $0x3c] sm:$0xf] }
 0x4d9   :  { %4900 = vmatpush.bf16.msra.mxu2 %v8959_v20  ;;  %4913 = vmatpush.bf16.msra.mxu3 %v8963_v21  ;;  %v8844_v61 = vld [vmem:[%s14209_s9 + $0x78] sm:$0xf0]  ;;  %v9034_v21 = vld [vmem:[%s14209_s9 + $0x1b8] sm:$0xf] }
 0x4da   :  { %v8847_v20 = vor.u32 %v10194_v50, %v8844_v61  ;;  %v9035_v60 = vor.u32 %v10250_v53, %v9034_v21  ;;  %v10306_v50 = vld [vmem:[%s14210_s12 + $0x1b8] sm:$0xff]  ;;  %v10311_v61 = vld [vmem:[%s14210_s12 + $0x1e0] sm:$0xff]  ;;  %v10285_v53 = vld [vmem:[%s14210_s12 + $0x110] sm:$0xff] }
 0x4db   :  { %v10310_v21 = vld [vmem:[%s14210_s12 + $0x1d8] sm:$0xff] }
 0x4dc   :  { %4836 = vmatpush.bf16.msrb.mxu1 %v8875_v26  ;;  %4875 = vmatpush.bf16.msra.mxu0 %v8887_v18  ;;  %v10282_v26 = vld [vmem:[%s14210_s12 + $0xf8] sm:$0xff]  ;;  %v8971_v18 = vor.u32 %v10234_v45, %v8970_v17  ;;  %v10284_v17 = vld [vmem:[%s14210_s12 + $0x108] sm:$0xff] }
 0x4dd   :  { %4901 = vmatpush.bf16.msra.mxu2 %v8895_v28  ;;  %4914 = vmatpush.bf16.msra.mxu3 %v8899_v29  ;;  %v10218_v28 = vld [vmem:[%s14209_s9 + $0xf4] sm:$0xf0]  ;;  %v10265_v29 = vld [vmem:[%s14210_s12 + $0x70] sm:$0xff]  ;;  %v10292_v45 = vld [vmem:[%s14210_s12 + $0x148] sm:$0xff]  ;;  %s14211_s9 = sld [smem:[#allocation27_spill]] }
 0x4de   :  { %v8907_v33 = vor.u32 %v10218_v28, %v8906_v40  ;;  %v10303_v40 = vld [vmem:[%s14210_s12 + $0x1a0] sm:$0xff]  ;;  %v10302_v28 = vld [vmem:[%s14210_s12 + $0x198] sm:$0xff] }
 0x4e0   :  { %4837 = vmatpush.bf16.msrb.mxu1 %v8811_v43  ;;  %4876 = vmatpush.bf16.msra.mxu0 %v8823_v30  ;;  %v10280_v43 = vld [vmem:[%s14210_s12 + $0xe8] sm:$0xff]  ;;  %v8843_v30 = vor.u32 %v10202_v39, %v8842_v63  ;;  %v10299_v63 = vld [vmem:[%s14210_s12 + $0x180] sm:$0xff] }
 0x4e1   :  { %4902 = vmatpush.bf16.msra.mxu2 %v8831_v51  ;;  %4915 = vmatpush.bf16.msra.mxu3 %v8835_v54  ;;  %v10263_v51 = vld [vmem:[%s14210_s12 + $0x60] sm:$0xff] }
 0x4e2   :  { %9042 = vmatmul.msk.bf16.vlgmr.msra.gmra.mxu1 %vm4338_vm5, %v13261_v48  ;;  %9045 = vmatmul.msk.bf16.vlgmr.msrb.gmra.mxu0 %vm4338_vm5, %v13261_v48  ;;  %v10279_v54 = vld [vmem:[%s14210_s12 + $0xe0] sm:$0xff] }
 0x4e3   :  { %9047 = vmatmul.msk.bf16.vlgmr.msrb.gmra.mxu2 %vm4338_vm5, %v13261_v48  ;;  %9048 = vmatmul.msk.bf16.vlgmr.msrb.gmra.mxu3 %vm4338_vm5, %v13261_v48 }
 0x4e4   :  { %4886 = vmatpush.bf16.msra.mxu1 %v9019_v0  ;;  %4925 = vmatpush.bf16.msrb.mxu0 %v9031_v49  ;;  %v10253_v0 = vld [vmem:[%s14210_s12 + $0x10] sm:$0xff] }
 0x4e5   :  { %4951 = vmatpush.bf16.msrb.mxu2 %v9039_v3  ;;  %6020 = vmatpush.bf16.msrb.mxu3 %v10258_v22  ;;  %v10261_v49 = vld [vmem:[%s14210_s12 + $0x50] sm:$0xff]  ;;  %v10272_v3 = vld [vmem:[%s14210_s12 + $0xa8] sm:$0xff] }
 0x4e6   :  { %v10304_v22 = vld [vmem:[%s14210_s12 + $0x1a8] sm:$0xff] }
 0x4e8   :  { %4887 = vmatpush.bf16.msra.mxu1 %v8955_v8  ;;  %4926 = vmatpush.bf16.msrb.mxu0 %v8967_v1  ;;  %v10259_v8 = vld [vmem:[%s14210_s12 + $0x40] sm:$0xff]  ;;  %v10290_v1 = vld [vmem:[%s14210_s12 + $0x138] sm:$0xff] }
 0x4e9   :  { %4952 = vmatpush.bf16.msrb.mxu2 %v8975_v41  ;;  %6021 = vmatpush.bf16.msrb.mxu3 %v10257_v27  ;;  %v10270_v41 = vld [vmem:[%s14210_s12 + $0x98] sm:$0xff]  ;;  %v10308_v27 = vld [vmem:[%s14210_s12 + $0x1c8] sm:$0xff] }
 0x4ec   :  { %4888 = vmatpush.bf16.msra.mxu1 %v8891_v59  ;;  %4927 = vmatpush.bf16.msrb.mxu0 %v8903_v16  ;;  %v10313_v59 = vld [vmem:[%s14210_s12 + $0x1f0] sm:$0xff]  ;;  %v10296_v16 = vld [vmem:[%s14210_s12 + $0x168] sm:$0xff] }
 0x4ed   :  { %4953 = vmatpush.bf16.msrb.mxu2 %v8911_v11  ;;  %6022 = vmatpush.bf16.msrb.mxu3 %v10256_v37  ;;  %v10312_v11 = vld [vmem:[%s14210_s12 + $0x1e8] sm:$0xff] }
 0x4f0   :  { %4889 = vmatpush.bf16.msra.mxu1 %v8827_v15  ;;  %4928 = vmatpush.bf16.msrb.mxu0 %v8839_v19  ;;  %v10286_v15 = vld [vmem:[%s14210_s12 + $0x118] sm:$0xff] }
 0x4f1   :  { %4954 = vmatpush.bf16.msrb.mxu2 %v8847_v20  ;;  %6023 = vmatpush.bf16.msrb.mxu3 %v10255_v46  ;;  %v10294_v19 = vld [vmem:[%s14210_s12 + $0x158] sm:$0xff]  ;;  %v10305_v20 = vld [vmem:[%s14210_s12 + $0x1b0] sm:$0xff] }
 0x4f2   :  { %9046 = vmatmul.msk.bf16.vlgmr.msrb.gmra.mxu1 %vm4338_vm5, %v13261_v48  ;;  %9049 = vmatmul.msk.bf16.vlgmr.msra.gmra.mxu0 %vm4338_vm5, %v13261_v48  ;;  %v10330_v46 = vld [vmem:[%s14210_s12 + $0x278] sm:$0xff] }
 0x4f3   :  { %9051 = vmatmul.msk.bf16.vlgmr.msra.gmra.mxu2 %vm4338_vm5, %v13261_v48  ;;  %9052 = vmatmul.msk.bf16.vlgmr.msra.gmra.mxu3 %vm4338_vm5, %v13261_v48 }
 0x4f4   :  { %4938 = vmatpush.bf16.msrb.mxu1 %v9035_v60  ;;  %6033 = vmatpush.bf16.msra.mxu0 %v10266_v25  ;;  %v10293_v60 = vld [vmem:[%s14210_s12 + $0x150] sm:$0xff] }
 0x4f5   :  { %6059 = vmatpush.bf16.msra.mxu2 %v10282_v26  ;;  %6024 = vmatpush.bf16.msrb.mxu3 %v10254_v56  ;;  %v10309_v25 = vld [vmem:[%s14210_s12 + $0x1d0] sm:$0xff]  ;;  %v10283_v26 = vld [vmem:[%s14210_s12 + $0x100] sm:$0xff] }
 0x4f6   :  { %v10329_v56 = vld [vmem:[%s14210_s12 + $0x270] sm:$0xff] }
 0x4f8   :  { %4939 = vmatpush.bf16.msrb.mxu1 %v8971_v18  ;;  %6034 = vmatpush.bf16.msra.mxu0 %v10265_v29  ;;  %v10291_v18 = vld [vmem:[%s14210_s12 + $0x140] sm:$0xff] }
 0x4f9   :  { %6060 = vmatpush.bf16.msra.mxu2 %v10281_v32  ;;  %6025 = vmatpush.bf16.msrb.mxu3 %v10253_v0  ;;  %v10307_v29 = vld [vmem:[%s14210_s12 + $0x1c0] sm:$0xff]  ;;  %v10301_v32 = vld [vmem:[%s14210_s12 + $0x190] sm:$0xff] }
 0x4fc   :  { %4940 = vmatpush.bf16.msrb.mxu1 %v8907_v33  ;;  %6035 = vmatpush.bf16.msra.mxu0 %v10264_v42  ;;  %v10300_v33 = vld [vmem:[%s14210_s12 + $0x188] sm:$0xff] }
 0x4fd   :  { %6061 = vmatpush.bf16.msra.mxu2 %v10280_v43  ;;  %6026 = vmatpush.bf16.msrb.mxu3 %v10252_v5  ;;  %v10320_v5 = vld [vmem:[%s14210_s12 + $0x228] sm:$0xff] }
 0x500   :  { %4941 = vmatpush.bf16.msrb.mxu1 %v8843_v30  ;;  %6036 = vmatpush.bf16.msra.mxu0 %v10263_v51  ;;  %v10322_v30 = vld [vmem:[%s14210_s12 + $0x238] sm:$0xff] }
 0x501   :  { %6062 = vmatpush.bf16.msra.mxu2 %v10279_v54  ;;  %6027 = vmatpush.bf16.msrb.mxu3 %v10251_v7  ;;  %v10327_v7 = vld [vmem:[%s14210_s12 + $0x260] sm:$0xff] }
 0x502   :  { %9050 = vmatmul.msk.bf16.vlgmr.msra.gmra.mxu1 %vm4338_vm5, %v13261_v48  ;;  %9053 = vmatmul.msk.bf16.vlgmr.msrb.gmra.mxu0 %vm4338_vm5, %v13261_v48 }
 0x503   :  { %9055 = vmatmul.msk.bf16.vlgmr.msrb.gmra.mxu2 %vm4338_vm5, %v13261_v48 }
 0x504   :  { %6046 = vmatpush.bf16.msra.mxu1 %v10274_v55  ;;  %6037 = vmatpush.bf16.msra.mxu0 %v10262_v57  ;;  %v10321_v55 = vld [vmem:[%s14210_s12 + $0x230] sm:$0xff] }
 0x505   :  { %6063 = vmatpush.bf16.msra.mxu2 %v10278_v58  ;;  %6072 = vmatpush.bf16.msra.mxu3 %v10290_v1 }
 0x508   :  { %6047 = vmatpush.bf16.msra.mxu1 %v10273_v62  ;;  %6038 = vmatpush.bf16.msra.mxu0 %v10261_v49 }
 0x509   :  { %6064 = vmatpush.bf16.msra.mxu2 %v10277_v2  ;;  %6073 = vmatpush.bf16.msra.mxu3 %v10289_v23  ;;  %v10346_v2 = vld [vmem:[%s14210_s12 + $0x2f8] sm:$0xff] }
 0x50c   :  { %6048 = vmatpush.bf16.msra.mxu1 %v10272_v3  ;;  %6039 = vmatpush.bf16.msra.mxu0 %v10260_v34  ;;  %v10328_v34 = vld [vmem:[%s14210_s12 + $0x268] sm:$0xff] }
 0x50d   :  { %6065 = vmatpush.bf16.msra.mxu2 %v10276_v24  ;;  %v10345_v24 = vld [vmem:[%s14210_s12 + $0x2f0] sm:$0xff] }
 0x510   :  { %6049 = vmatpush.bf16.msra.mxu1 %v10271_v6  ;;  %6040 = vmatpush.bf16.msra.mxu0 %v10259_v8  ;;  %v10319_v6 = vld [vmem:[%s14210_s12 + $0x220] sm:$0xff] }
 0x511   :  { %6066 = vmatpush.bf16.msra.mxu2 %v10275_v47 }
 0x512   :  { %9054 = vmatmul.msk.bf16.vlgmr.msrb.gmra.mxu1 %vm4338_vm5, %v13261_v48  ;;  %v10288_v48 = vld [vmem:[%s14210_s12 + $0x128] sm:$0xff] }
 0x513   :  { %6074 = vmatpush.bf16.msra.mxu3 %v10288_v48  ;;  %v10318_v48 = vld [vmem:[%s14210_s12 + $0x218] sm:$0xff] }
 0x514   :  { %6085 = vmatpush.bf16.msrb.mxu0 %v10298_v31  ;;  %6050 = vmatpush.bf16.msra.mxu1 %v10270_v41 }
 0x515   :  { %6111 = vmatpush.bf16.msrb.mxu2 %v10314_v10 }
 0x517   :  { %6075 = vmatpush.bf16.msra.mxu3 %v10287_v12  ;;  %v10343_v12 = vld [vmem:[%s14210_s12 + $0x2e0] sm:$0xff] }
 0x518   :  { %6086 = vmatpush.bf16.msrb.mxu0 %v10297_v52  ;;  %6051 = vmatpush.bf16.msra.mxu1 %v10269_v44  ;;  %v10344_v52 = vld [vmem:[%s14210_s12 + $0x2e8] sm:$0xff] }
 0x519   :  { %6112 = vmatpush.bf16.msrb.mxu2 %v10313_v59 }
 0x51b   :  { %6076 = vmatpush.bf16.msra.mxu3 %v10286_v15 }
 0x51c   :  { %6087 = vmatpush.bf16.msrb.mxu0 %v10296_v16  ;;  %6052 = vmatpush.bf16.msra.mxu1 %v10268_v9  ;;  %v10326_v16 = vld [vmem:[%s14210_s12 + $0x258] sm:$0xff] }
 0x51d   :  { %6113 = vmatpush.bf16.msrb.mxu2 %v10312_v11  ;;  %v10338_v11 = vld [vmem:[%s14210_s12 + $0x2b8] sm:$0xff] }
 0x51f   :  { %6077 = vmatpush.bf16.msra.mxu3 %v10285_v53  ;;  %v10342_v53 = vld [vmem:[%s14210_s12 + $0x2d8] sm:$0xff] }
 0x520   :  { %6088 = vmatpush.bf16.msrb.mxu0 %v10295_v13  ;;  %6053 = vmatpush.bf16.msra.mxu1 %v10267_v14 }
 0x521   :  { %6114 = vmatpush.bf16.msrb.mxu2 %v10311_v61  ;;  %v10325_v61 = vld [vmem:[%s14210_s12 + $0x250] sm:$0xff] }
 0x523   :  { %6078 = vmatpush.bf16.msra.mxu3 %v10284_v17  ;;  %v10316_v17 = vld [vmem:[%s14210_s12 + $0x208] sm:$0xff] }
 0x524   :  { %6098 = vmatpush.bf16.msrb.mxu1 %v10306_v50  ;;  %6089 = vmatpush.bf16.msrb.mxu0 %v10294_v19  ;;  %v10317_v50 = vld [vmem:[%s14210_s12 + $0x210] sm:$0xff] }
 0x525   :  { %6115 = vmatpush.bf16.msrb.mxu2 %v10310_v21  ;;  %v10337_v21 = vld [vmem:[%s14210_s12 + $0x2b0] sm:$0xff] }
 0x527   :  { %6079 = vmatpush.bf16.msra.mxu3 %v10283_v26 }
 0x528   :  { %6099 = vmatpush.bf16.msrb.mxu1 %v10305_v20  ;;  %6090 = vmatpush.bf16.msrb.mxu0 %v10293_v60 }
 0x529   :  { %6116 = vmatpush.bf16.msrb.mxu2 %v10309_v25  ;;  %v10341_v25 = vld [vmem:[%s14210_s12 + $0x2d0] sm:$0xff] }
 0x52c   :  { %6091 = vmatpush.bf16.msrb.mxu0 %v10292_v45  ;;  %6100 = vmatpush.bf16.msrb.mxu1 %v10304_v22  ;;  %v10324_v45 = vld [vmem:[%s14210_s12 + $0x248] sm:$0xff] }
 0x52d   :  { %6117 = vmatpush.bf16.msrb.mxu2 %v10308_v27  ;;  %v10336_v22 = vld [vmem:[%s14210_s12 + $0x2a8] sm:$0xff]  ;;  %v10323_v27 = vld [vmem:[%s14210_s12 + $0x240] sm:$0xff] }
 0x530   :  { %6092 = vmatpush.bf16.msrb.mxu0 %v10291_v18  ;;  %6101 = vmatpush.bf16.msrb.mxu1 %v10303_v40  ;;  %v10315_v40 = vld [vmem:[%s14210_s12 + $0x200] sm:$0xff] }
 0x531   :  { %6118 = vmatpush.bf16.msrb.mxu2 %v10307_v29 }
 0x534   :  { %6102 = vmatpush.bf16.msrb.mxu1 %v10302_v28 }
 0x538   :  { %6103 = vmatpush.bf16.msrb.mxu1 %v10301_v32 }
 0x53c   :  { %6104 = vmatpush.bf16.msrb.mxu1 %v10300_v33  ;;  %v10335_v33 = vld [vmem:[%s14210_s12 + $0x2a0] sm:$0xff] }
 0x540   :  { %6105 = vmatpush.bf16.msrb.mxu1 %v10299_v63  ;;  %v10354_v63 = vld [vmem:[%s14210_s12 + $0x338] sm:$0xff] }
 0x54f   :  { %v4761_v37 = vpop.f32.mrf.mxu1  ;;  %v4774_v39 = vpop.f32.mrf.mxu0 }
 0x550   :  { %v4960_v42 = vmul.f32 %v4761_v37, %v11592_v4  ;;  %v4961_v43 = vmul.f32 %v4774_v39, %v11641_v38 }
 0x552   :  { %v4976_v51 = vpack.c.bf16 %v4960_v42, %v4960_v42  ;;  %v4977_v54 = vpack.c.bf16 %v4961_v43, %v4961_v43  ;;  %v10362_v42 = vld [vmem:[%s14210_s12 + $0x378] sm:$0xff]  ;;  %v10340_v43 = vld [vmem:[%s14210_s12 + $0x2c8] sm:$0xff] }
 0x554   :  { %6028 = vmatmul.bf16.vlgmr.msrb.gmra.mxu3 %v4976_v51  ;;  %6041 = vmatmul.bf16.vlgmr.msra.gmra.mxu0 %v4977_v54  ;;  %v10334_v54 = vld [vmem:[%s14210_s12 + $0x298] sm:$0xff] }
 0x555   :  { %6124 = vmatpush.bf16.msrb.mxu3 %v10322_v30  ;;  %6137 = vmatpush.bf16.msra.mxu0 %v10330_v46 }
 0x556   :  { %v4800_v57 = vpop.f32.mrf.mxu2  ;;  %v4813_v58 = vpop.f32.mrf.mxu3 }
 0x557   :  { %v4963_v62 = vmul.f32 %v4800_v57, %v11641_v38  ;;  %v4763_v0 = vpop.f32.mrf.mxu1  ;;  %v4776_v49 = vpop.f32.mrf.mxu0  ;;  %v4964_v31 = vmul.f32 %v4813_v58, %v11592_v4  ;;  %v10339_v57 = vld [vmem:[%s14210_s12 + $0x2c0] sm:$0xff]  ;;  %v10378_v58 = vld [vmem:[%s14210_s12 + $0x3f8] sm:$0xff] }
 0x559   :  { %v4979_v3 = vpack.c.bf16 %v4963_v62, %v4963_v62  ;;  %6125 = vmatpush.bf16.msrb.mxu3 %v10321_v55  ;;  %6138 = vmatpush.bf16.msra.mxu0 %v10329_v56  ;;  %v4980_v9 = vpack.c.bf16 %v4964_v31, %v4964_v31  ;;  %v10353_v55 = vld [vmem:[%s14210_s12 + $0x330] sm:$0xff]  ;;  %v10359_v31 = vld [vmem:[%s14210_s12 + $0x360] sm:$0xff] }
 0x55a   :  { %v10361_v56 = vld [vmem:[%s14210_s12 + $0x370] sm:$0xff] }
 0x55b   :  { %6067 = vmatmul.bf16.vlgmr.msra.gmra.mxu2 %v4979_v3 }
 0x55c   :  { %6163 = vmatpush.bf16.msra.mxu2 %v10346_v2 }
 0x55d   :  { %6126 = vmatpush.bf16.msrb.mxu3 %v10320_v5  ;;  %6139 = vmatpush.bf16.msra.mxu0 %v10328_v34  ;;  %v10333_v5 = vld [vmem:[%s14210_s12 + $0x290] sm:$0xff]  ;;  %v10352_v34 = vld [vmem:[%s14210_s12 + $0x328] sm:$0xff] }
 0x55e   :  { %v4802_v8 = vpop.f32.mrf.mxu2  ;;  %v4815_v1 = vpop.f32.mrf.mxu3 }
 0x55f   :  { %v4787_v41 = vpop.f32.mrf.mxu1  ;;  %v4826_v47 = vpop.f32.mrf.mxu0  ;;  %v10332_v8 = vld [vmem:[%s14210_s12 + $0x288] sm:$0xff]  ;;  %v10351_v1 = vld [vmem:[%s14210_s12 + $0x320] sm:$0xff] }
 0x560   :  { %6164 = vmatpush.bf16.msra.mxu2 %v10345_v24  ;;  %v4962_v10 = vmul.f32 %v4787_v41, %v11592_v4  ;;  %v4965_v23 = vmul.f32 %v4826_v47, %v11641_v38  ;;  %v10360_v24 = vld [vmem:[%s14210_s12 + $0x368] sm:$0xff] }
 0x561   :  { %6127 = vmatpush.bf16.msrb.mxu3 %v10319_v6  ;;  %6140 = vmatpush.bf16.msra.mxu0 %v10327_v7  ;;  %v10377_v7 = vld [vmem:[%s14210_s12 + $0x3f0] sm:$0xff]  ;;  %v10376_v41 = vld [vmem:[%s14210_s12 + $0x3e8] sm:$0xff] }
 0x562   :  { %v4978_v44 = vpack.c.bf16 %v4962_v10, %v4962_v10  ;;  %v4981_v59 = vpack.c.bf16 %v4965_v23, %v4965_v23 }
 0x564   :  { %6165 = vmatpush.bf16.msra.mxu2 %v10344_v52  ;;  %6054 = vmatmul.bf16.vlgmr.msra.gmra.mxu1 %v4978_v44  ;;  %v10331_v44 = vld [vmem:[%s14210_s12 + $0x280] sm:$0xff] }
 0x565   :  { %6080 = vmatmul.bf16.vlgmr.msra.gmra.mxu3 %v4980_v9  ;;  %6093 = vmatmul.bf16.vlgmr.msrb.gmra.mxu0 %v4981_v59  ;;  %v10350_v59 = vld [vmem:[%s14210_s12 + $0x318] sm:$0xff] }
 0x566   :  { %6128 = vmatpush.bf16.msrb.mxu3 %v10318_v48  ;;  %6141 = vmatpush.bf16.msra.mxu0 %v10326_v16  ;;  %v4852_v13 = vpop.f32.mrf.mxu2  ;;  %v4865_v14 = vpop.f32.mrf.mxu3  ;;  %v10358_v16 = vld [vmem:[%s14210_s12 + $0x358] sm:$0xff] }
 0x567   :  { %6150 = vmatpush.bf16.msra.mxu1 %v10338_v11  ;;  %v4967_v15 = vmul.f32 %v4852_v13, %v11641_v38  ;;  %v4789_v19 = vpop.f32.mrf.mxu1  ;;  %v4828_v20 = vpop.f32.mrf.mxu0  ;;  %v4968_v28 = vmul.f32 %v4865_v14, %v11592_v4  ;;  %v10370_v9 = vld [vmem:[%s14210_s12 + $0x3b8] sm:$0xff]  ;;  %v10375_v11 = vld [vmem:[%s14210_s12 + $0x3e0] sm:$0xff]  ;;  %v10349_v13 = vld [vmem:[%s14210_s12 + $0x310] sm:$0xff] }
 0x568   :  { %6166 = vmatpush.bf16.msra.mxu2 %v10343_v12  ;;  %v10357_v14 = vld [vmem:[%s14210_s12 + $0x350] sm:$0xff] }
 0x569   :  { %v4983_v60 = vpack.c.bf16 %v4967_v15, %v4967_v15  ;;  %v4984_v51 = vpack.c.bf16 %v4968_v28, %v4968_v28  ;;  %v10367_v28 = vld [vmem:[%s14210_s12 + $0x3a0] sm:$0xff] }
 0x56a   :  { %6129 = vmatpush.bf16.msrb.mxu3 %v10317_v50  ;;  %6142 = vmatpush.bf16.msra.mxu0 %v10325_v61  ;;  %v10369_v50 = vld [vmem:[%s14210_s12 + $0x3b0] sm:$0xff]  ;;  %v10374_v61 = vld [vmem:[%s14210_s12 + $0x3d8] sm:$0xff] }
 0x56b   :  { %6151 = vmatpush.bf16.msra.mxu1 %v10337_v21  ;;  %6119 = vmatmul.bf16.vlgmr.msrb.gmra.mxu2 %v4983_v60  ;;  %v10348_v21 = vld [vmem:[%s14210_s12 + $0x308] sm:$0xff] }
 0x56c   :  { %6167 = vmatpush.bf16.msra.mxu2 %v10342_v53  ;;  %v10356_v53 = vld [vmem:[%s14210_s12 + $0x348] sm:$0xff] }
 0x56d   :  { %v10368_v60 = vld [vmem:[%s14210_s12 + $0x3a8] sm:$0xff] }
 0x56e   :  { %6130 = vmatpush.bf16.msrb.mxu3 %v10316_v17  ;;  %6143 = vmatpush.bf16.msra.mxu0 %v10324_v45  ;;  %v4854_v26 = vpop.f32.mrf.mxu2  ;;  %v4867_v18 = vpop.f32.mrf.mxu3  ;;  %v10373_v17 = vld [vmem:[%s14210_s12 + $0x3d0] sm:$0xff]  ;;  %v9627_v45 = vld [vmem:[#allocation7 + $0x70] sm:$0xf] }
 0x56f   :  { %6152 = vmatpush.bf16.msra.mxu1 %v10336_v22  ;;  %v4839_v29 = vpop.f32.mrf.mxu1  ;;  %v4878_v32 = vpop.f32.mrf.mxu0  ;;  %v10394_v22 = vld [vmem:[#allocation7 + $0x74] sm:$0xf0] }
 0x570   :  { %6168 = vmatpush.bf16.msra.mxu2 %v10341_v25  ;;  %v4966_v37 = vmul.f32 %v4839_v29, %v11592_v4  ;;  %v4969_v39 = vmul.f32 %v4878_v32, %v11641_v38  ;;  %v9691_v25 = vld [vmem:[#allocation7 + $0xf0] sm:$0xf]  ;;  %v10410_v26 = vld [vmem:[#allocation7 + $0xf4] sm:$0xf0]  ;;  %v9628_v32 = vor.u32 %v10394_v22, %v9627_v45  ;;  %v9587_v22 = vld [vmem:[#allocation7 + $0x20] sm:$0xf] }
 0x571   :  { %v10347_v18 = vld [vmem:[%s14210_s12 + $0x300] sm:$0xff] }
 0x572   :  { %v4982_v30 = vpack.c.bf16 %v4966_v37, %v4966_v37  ;;  %v4985_v46 = vpack.c.bf16 %v4969_v39, %v4969_v39  ;;  %6131 = vmatpush.bf16.msrb.mxu3 %v10315_v40  ;;  %6144 = vmatpush.bf16.msra.mxu0 %v10323_v27  ;;  %v10355_v27 = vld [vmem:[%s14210_s12 + $0x340] sm:$0xff]  ;;  %v9619_v37 = vld [vmem:[#allocation7 + $0x60] sm:$0xf] }
 0x573   :  { %6153 = vmatpush.bf16.msra.mxu1 %v10335_v33  ;;  %v9692_v33 = vor.u32 %v10410_v26, %v9691_v25  ;;  %v10384_v26 = vld [vmem:[#allocation7 + $0x24] sm:$0xf0] }
 0x574   :  { %6169 = vmatpush.bf16.msra.mxu2 %v10340_v43  ;;  %6106 = vmatmul.bf16.vlgmr.msrb.gmra.mxu1 %v4982_v30  ;;  %v9683_v43 = vld [vmem:[#allocation7 + $0xe0] sm:$0xf]  ;;  %v10408_v30 = vld [vmem:[#allocation7 + $0xe4] sm:$0xf0] }
 0x575   :  { %6132 = vmatmul.bf16.vlgmr.msrb.gmra.mxu3 %v4984_v51  ;;  %6145 = vmatmul.bf16.vlgmr.msra.gmra.mxu0 %v4985_v46 }
 0x576   :  { %6176 = vmatpush.bf16.msra.mxu3 %v10354_v63  ;;  %6189 = vmatpush.bf16.msrb.mxu0 %v10362_v42  ;;  %v4904_v62 = vpop.f32.mrf.mxu2  ;;  %v13767_v0 = vpop.f32.mrf.mxu3  ;;  %v10372_v63 = vld [vmem:[%s14210_s12 + $0x3c8] sm:$0xff]  ;;  %v10392_v42 = vld [vmem:[#allocation7 + $0x64] sm:$0xf0] }
 0x577   :  { %6154 = vmatpush.bf16.msra.mxu1 %v10334_v54  ;;  %v4971_v49 = vmul.f32 %v4904_v62, %v11641_v38  ;;  %v4841_v2 = vpop.f32.mrf.mxu1  ;;  %v4880_v3 = vpop.f32.mrf.mxu0  ;;  %v4972_v40 = vmul.f32 %v13767_v0, %v11592_v4  ;;  %v10366_v54 = vld [vmem:[%s14210_s12 + $0x398] sm:$0xff]  ;;  %v9684_v62 = vor.u32 %v10408_v30, %v9683_v43  ;;  %v10371_v0 = vld [vmem:[%s14210_s12 + $0x3c0] sm:$0xff] }
 0x578   :  { %6170 = vmatpush.bf16.msra.mxu2 %v10339_v57  ;;  %v10390_v2 = vld [vmem:[#allocation7 + $0x54] sm:$0xf0]  ;;  %v10389_v30 = vld [vmem:[#allocation7 + $0x54] sm:$0xf] }
 0x579   :  { %v4987_v6 = vpack.c.bf16 %v4971_v49, %v4971_v49  ;;  %v4988_v51 = vpack.c.bf16 %v4972_v40, %v4972_v40  ;;  %v9611_v49 = vld [vmem:[#allocation7 + $0x50] sm:$0xf]  ;;  %v9621_v40 = vld [vmem:[#allocation7 + $0x68] sm:$0xf0]  ;;  %v10382_v43 = vld [vmem:[#allocation7 + $0x14] sm:$0xf0] }
 0x57a   :  { %6177 = vmatpush.bf16.msra.mxu3 %v10353_v55  ;;  %6190 = vmatpush.bf16.msrb.mxu0 %v10361_v56  ;;  %v10409_v55 = vld [vmem:[#allocation7 + $0xf4] sm:$0xf]  ;;  %v9693_v56 = vld [vmem:[#allocation7 + $0xf8] sm:$0xf0] }
 0x57b   :  { %6155 = vmatpush.bf16.msra.mxu1 %v10333_v5  ;;  %6171 = vmatmul.bf16.vlgmr.msra.gmra.mxu2 %v4987_v6  ;;  %v9696_v5 = vor.u32 %v10409_v55, %v9693_v56  ;;  %v10365_v6 = vld [vmem:[%s14210_s12 + $0x390] sm:$0xff]  ;;  %v10398_v55 = vld [vmem:[#allocation7 + $0x94] sm:$0xf0]  ;;  %v10399_v56 = vld [vmem:[#allocation7 + $0xa4] sm:$0xf] }
 0x57c   :  { %6215 = vmatpush.bf16.msrb.mxu2 %v10378_v58  ;;  %v9620_v58 = vor.u32 %v10392_v42, %v9619_v37 }
 0x57e   :  { %6178 = vmatpush.bf16.msra.mxu3 %v10352_v34  ;;  %6191 = vmatpush.bf16.msrb.mxu0 %v10360_v24  ;;  %v4906_v47 = vpop.f32.mrf.mxu2  ;;  %v4919_v10 = vpop.f32.mrf.mxu3  ;;  %v9675_v34 = vld [vmem:[#allocation7 + $0xd0] sm:$0xf]  ;;  %v10406_v24 = vld [vmem:[#allocation7 + $0xd4] sm:$0xf0] }
 0x57f   :  { %6156 = vmatpush.bf16.msra.mxu1 %v10332_v8  ;;  %v4891_v23 = vpop.f32.mrf.mxu1  ;;  %v4930_v52 = vpop.f32.mrf.mxu0  ;;  %v9685_v8 = vld [vmem:[#allocation7 + $0xe8] sm:$0xf0]  ;;  %v10388_v47 = vld [vmem:[#allocation7 + $0x44] sm:$0xf0] }
 0x580   :  { %6216 = vmatpush.bf16.msrb.mxu2 %v10377_v7  ;;  %v4970_v48 = vmul.f32 %v4891_v23, %v11592_v4  ;;  %v4973_v29 = vmul.f32 %v4930_v52, %v11641_v38  ;;  %v10407_v7 = vld [vmem:[#allocation7 + $0xe4] sm:$0xf]  ;;  %v9667_v52 = vld [vmem:[#allocation7 + $0xc0] sm:$0xf] }
 0x581   :  { %v9688_v23 = vor.u32 %v10407_v7, %v9685_v8  ;;  %v10397_v7 = vld [vmem:[#allocation7 + $0x94] sm:$0xf]  ;;  %v9645_v8 = vld [vmem:[#allocation7 + $0x98] sm:$0xf0] }
 0x582   :  { %6179 = vmatpush.bf16.msra.mxu3 %v10351_v1  ;;  %6192 = vmatpush.bf16.msrb.mxu0 %v10359_v31  ;;  %v4986_v12 = vpack.c.bf16 %v4970_v48, %v4970_v48  ;;  %v4989_v57 = vpack.c.bf16 %v4973_v29, %v4973_v29  ;;  %v9612_v1 = vor.u32 %v10390_v2, %v9611_v49  ;;  %v10405_v48 = vld [vmem:[#allocation7 + $0xd4] sm:$0xf]  ;;  %v10400_v29 = vld [vmem:[#allocation7 + $0xa4] sm:$0xf0] }
 0x583   :  { %6157 = vmatpush.bf16.msra.mxu1 %v10331_v44  ;;  %v9676_v31 = vor.u32 %v10406_v24, %v9675_v34  ;;  %v10404_v44 = vld [vmem:[#allocation7 + $0xc4] sm:$0xf0]  ;;  %v9635_v24 = vld [vmem:[#allocation7 + $0x80] sm:$0xf] }
 0x584   :  { %6217 = vmatpush.bf16.msrb.mxu2 %v10376_v41  ;;  %v9603_v41 = vld [vmem:[#allocation7 + $0x40] sm:$0xf]  ;;  %v10380_v2 = vld [vmem:[#allocation7 + $0x4] sm:$0xf0] }
 0x586   :  { %6180 = vmatpush.bf16.msra.mxu3 %v10350_v59  ;;  %6193 = vmatpush.bf16.msrb.mxu0 %v10358_v16  ;;  %v4956_v15 = vpop.f32.mrf.mxu2  ;;  %v10364_v59 = vld [vmem:[%s14210_s12 + $0x388] sm:$0xff]  ;;  %v9677_v16 = vld [vmem:[#allocation7 + $0xd8] sm:$0xf0] }
 0x587   :  { %6202 = vmatpush.bf16.msrb.mxu1 %v10370_v9  ;;  %v4893_v19 = vpop.f32.mrf.mxu1  ;;  %v4932_v20 = vpop.f32.mrf.mxu0  ;;  %v4975_v3 = vmul.f32 %v4956_v15, %v11641_v38  ;;  %v9604_v9 = vor.u32 %v10388_v47, %v9603_v41  ;;  %v9659_v15 = vld [vmem:[#allocation7 + $0xb0] sm:$0xf]  ;;  %v10385_v47 = vld [vmem:[#allocation7 + $0x34] sm:$0xf] }
 0x588   :  { %6218 = vmatpush.bf16.msrb.mxu2 %v10375_v11  ;;  %6158 = vmatmul.bf16.vlgmr.msra.gmra.mxu1 %v4986_v12  ;;  %v9595_v11 = vld [vmem:[#allocation7 + $0x30] sm:$0xf]  ;;  %v9668_v12 = vor.u32 %v10404_v44, %v9667_v52  ;;  %v10402_v19 = vld [vmem:[#allocation7 + $0xb4] sm:$0xf0]  ;;  %v9637_v52 = vld [vmem:[#allocation7 + $0x88] sm:$0xf0] }
 0x589   :  { %v4991_v10 = vpack.c.bf16 %v4975_v3, %v4975_v3  ;;  %v10363_v20 = vld [vmem:[%s14210_s12 + $0x380] sm:$0xff]  ;;  %v9660_v25 = vor.u32 %v10402_v19, %v9659_v15  ;;  %v10387_v3 = vld [vmem:[#allocation7 + $0x44] sm:$0xf]  ;;  %v9573_v15 = vld [vmem:[#allocation7 + $0x8] sm:$0xf0] }
 0x58a   :  { %6181 = vmatpush.bf16.msra.mxu3 %v10349_v13  ;;  %6194 = vmatpush.bf16.msrb.mxu0 %v10357_v14  ;;  %v10386_v13 = vld [vmem:[#allocation7 + $0x34] sm:$0xf0]  ;;  %v10393_v14 = vld [vmem:[#allocation7 + $0x74] sm:$0xf] }
 0x58b   :  { %6203 = vmatpush.bf16.msrb.mxu1 %v10369_v50  ;;  %v9629_v50 = vld [vmem:[#allocation7 + $0x78] sm:$0xf0] }
 0x58c   :  { %6219 = vmatpush.bf16.msrb.mxu2 %v10374_v61  ;;  %v9680_v61 = vor.u32 %v10405_v48, %v9677_v16  ;;  %v9632_v45 = vor.u32 %v10393_v14, %v9629_v50  ;;  %v10383_v48 = vld [vmem:[#allocation7 + $0x24] sm:$0xf]  ;;  %v9589_v16 = vld [vmem:[#allocation7 + $0x28] sm:$0xf0]  ;;  %v9581_v14 = vld [vmem:[#allocation7 + $0x18] sm:$0xf0] }
 0x58e   :  { %6182 = vmatpush.bf16.msra.mxu3 %v10348_v21  ;;  %6195 = vmatpush.bf16.msrb.mxu0 %v10356_v53  ;;  %v4958_v39 = vpop.f32.mrf.mxu2  ;;  %v10403_v21 = vld [vmem:[#allocation7 + $0xc4] sm:$0xf]  ;;  %v9669_v53 = vld [vmem:[#allocation7 + $0xc8] sm:$0xf0] }
 0x58f   :  { %6204 = vmatpush.bf16.msrb.mxu1 %v10368_v60  ;;  %v4943_v46 = vpop.f32.mrf.mxu1  ;;  %v9579_v39 = vld [vmem:[#allocation7 + $0x10] sm:$0xf] }
 0x590   :  { %6220 = vmatpush.bf16.msrb.mxu2 %v10373_v17  ;;  %v4974_v60 = vmul.f32 %v4943_v46, %v11592_v4  ;;  %v9596_v17 = vor.u32 %v10386_v13, %v9595_v11  ;;  %v9588_v4 = vor.u32 %v10384_v26, %v9587_v22  ;;  %v9613_v46 = vld [vmem:[#allocation7 + $0x58] sm:$0xf0]  ;;  %v10381_v13 = vld [vmem:[#allocation7 + $0x14] sm:$0xf] }
 0x591   :  { %v9584_v50 = vor.u32 %v10381_v13, %v9581_v14  ;;  %v6513_v14 = vld [vmem:[%s14167_s15 + $0x38] sm:$0xff] }
 0x592   :  { %6183 = vmatpush.bf16.msra.mxu3 %v10347_v18  ;;  %6196 = vmatpush.bf16.msrb.mxu0 %v10355_v27  ;;  %v10391_v18 = vld [vmem:[#allocation7 + $0x64] sm:$0xf]  ;;  %v9672_v27 = vor.u32 %v10403_v21, %v9669_v53  ;;  %v10421_v21 = vld [vmem:[#allocation6] ss:$0 sm:$0xff] }
 0x593   :  { %6205 = vmatpush.bf16.msrb.mxu1 %v10367_v28  ;;  %v9651_v28 = vld [vmem:[#allocation7 + $0xa0] sm:$0xf]  ;;  %v9624_v37 = vor.u32 %v10391_v18, %v9621_v40 }
 0x594   :  { %6221 = vmatpush.bf16.msrb.mxu2 %v10372_v63  ;;  %v4990_v63 = vpack.c.bf16 %v4974_v60, %v4974_v60  ;;  %v9652_v42 = vor.u32 %v10400_v29, %v9651_v28 }
 0x595   :  { %6184 = vmatmul.bf16.vlgmr.msra.gmra.mxu3 %v4988_v51  ;;  %6197 = vmatmul.bf16.vlgmr.msrb.gmra.mxu0 %v4989_v57  ;;  %v9653_v57 = vld [vmem:[#allocation7 + $0xa8] sm:$0xf0] }
 0x596   :  { %6434 = vmatpush.bf16.msrb.mxu3 %v9628_v32  ;;  %6447 = vmatpush.bf16.msra.mxu0 %v9692_v33  ;;  %v10401_v32 = vld [vmem:[#allocation7 + $0xb4] sm:$0xf]  ;;  %v9661_v33 = vld [vmem:[#allocation7 + $0xb8] sm:$0xf0]  ;;  %v9656_v34 = vor.u32 %v10399_v56, %v9653_v57 }
 0x597   :  { %6206 = vmatpush.bf16.msrb.mxu1 %v10366_v54  ;;  %v4945_v38 = vpop.f32.mrf.mxu1  ;;  %v9664_v51 = vor.u32 %v10401_v32, %v9661_v33  ;;  %v9643_v54 = vld [vmem:[#allocation7 + $0x90] sm:$0xf] }
 0x598   :  { %6222 = vmatpush.bf16.msrb.mxu2 %v10371_v0  ;;  %v9571_v0 = vld [vmem:[#allocation7] sm:$0xf]  ;;  %v9644_v49 = vor.u32 %v10398_v55, %v9643_v54  ;;  %v9648_v38 = vor.u32 %v10397_v7, %v9645_v8  ;;  %v6520_v7 = vld [vmem:[%s14167_s15 + $0x70] sm:$0xff] }
 0x59a   :  { %6435 = vmatpush.bf16.msrb.mxu3 %v9620_v58  ;;  %6448 = vmatpush.bf16.msra.mxu0 %v9684_v62  ;;  %v9580_v58 = vor.u32 %v10382_v43, %v9579_v39  ;;  %v9616_v62 = vor.u32 %v10389_v30, %v9613_v46 }
 0x59b   :  { %6207 = vmatpush.bf16.msrb.mxu1 %v10365_v6  ;;  %6223 = vmatmul.bf16.vlgmr.msrb.gmra.mxu2 %v4991_v10  ;;  %v10396_v6 = vld [vmem:[#allocation7 + $0x84] sm:$0xf0]  ;;  %v9597_v10 = vld [vmem:[#allocation7 + $0x38] sm:$0xf0] }
 0x59c   :  { %6473 = vmatpush.bf16.msra.mxu2 %v9696_v5  ;;  %v9605_v5 = vld [vmem:[#allocation7 + $0x48] sm:$0xf0]  ;;  %v9636_v41 = vor.u32 %v10396_v6, %v9635_v24  ;;  %v9600_v44 = vor.u32 %v10385_v47, %v9597_v10  ;;  %v6521_v6 = vld [vmem:[%s14167_s15 + $0x78] sm:$0xff] }
 0x59e   :  { %6436 = vmatpush.bf16.msrb.mxu3 %v9612_v1  ;;  %6449 = vmatpush.bf16.msra.mxu0 %v9676_v31  ;;  %v9572_v1 = vor.u32 %v10380_v2, %v9571_v0  ;;  %v9608_v31 = vor.u32 %v10387_v3, %v9605_v5 }
 0x59f   :  { %6208 = vmatpush.bf16.msrb.mxu1 %v10364_v59  ;;  %v6234_v59 = vpack.c.bf16 %v10916_v35, %v10916_v35 }
 0x5a0   :  { %6474 = vmatpush.bf16.msra.mxu2 %v9688_v23  ;;  %v10395_v23 = vld [vmem:[#allocation7 + $0x84] sm:$0xf] }
 0x5a1   :  { %v9640_v11 = vor.u32 %v10395_v23, %v9637_v52  ;;  %v6516_v23 = vld [vmem:[%s14167_s15 + $0x50] sm:$0xff]  ;;  %v6537_v52 = vld [vmem:[%s14167_s15 + $0xf8] sm:$0xff] }
 0x5a2   :  { %6437 = vmatpush.bf16.msrb.mxu3 %v9604_v9  ;;  %6450 = vmatpush.bf16.msra.mxu0 %v9668_v12  ;;  %v6235_v9 = vpack.c.bf16 %v10918_v36, %v10918_v36  ;;  %v9592_v12 = vor.u32 %v10383_v48, %v9589_v16  ;;  %v6515_v48 = vld [vmem:[%s14167_s15 + $0x48] sm:$0xff]  ;;  %v6536_v16 = vld [vmem:[%s14167_s15 + $0xf0] sm:$0xff] }
 0x5a3   :  { %6209 = vmatpush.bf16.msrb.mxu1 %v10363_v20 }
 0x5a4   :  { %6475 = vmatpush.bf16.msra.mxu2 %v9680_v61  ;;  %v10379_v61 = vld [vmem:[#allocation7 + $0x4] sm:$0xf] }
 0x5a5   :  { %v9576_v19 = vor.u32 %v10379_v61, %v9573_v15  ;;  %v6512_v15 = vld [vmem:[%s14167_s15 + $0x30] sm:$0xff] }
 0x5a6   :  { %6438 = vmatpush.bf16.msrb.mxu3 %v9596_v17  ;;  %6451 = vmatpush.bf16.msra.mxu0 %v9660_v25 }
 0x5a7   :  { %6460 = vmatpush.bf16.msra.mxu1 %v9632_v45 }
 0x5a8   :  { %6210 = vmatmul.bf16.vlgmr.msrb.gmra.mxu1 %v4990_v63  ;;  %6476 = vmatpush.bf16.msra.mxu2 %v9672_v27 }
 0x5aa   :  { %6439 = vmatpush.bf16.msrb.mxu3 %v9588_v4  ;;  %6452 = vmatpush.bf16.msra.mxu0 %v9652_v42 }
 0x5ab   :  { %6461 = vmatpush.bf16.msra.mxu1 %v9624_v37 }
 0x5ac   :  { %6477 = vmatpush.bf16.msra.mxu2 %v9664_v51 }
 0x5ae   :  { %6440 = vmatpush.bf16.msrb.mxu3 %v9580_v58  ;;  %6453 = vmatpush.bf16.msra.mxu0 %v9644_v49 }
 0x5af   :  { %6462 = vmatpush.bf16.msra.mxu1 %v9616_v62 }
 0x5b0   :  { %6478 = vmatpush.bf16.msra.mxu2 %v9656_v34 }
 0x5b2   :  { %6441 = vmatpush.bf16.msrb.mxu3 %v9572_v1  ;;  %6454 = vmatpush.bf16.msra.mxu0 %v9636_v41  ;;  %v6519_v1 = vld [vmem:[%s14167_s15 + $0x68] sm:$0xff]  ;;  %v6518_v41 = vld [vmem:[%s14167_s15 + $0x60] sm:$0xff] }
 0x5b3   :  { %6463 = vmatpush.bf16.msra.mxu1 %v9608_v31 }
 0x5b4   :  { %6479 = vmatpush.bf16.msra.mxu2 %v9648_v38  ;;  %v6517_v38 = vld [vmem:[%s14167_s15 + $0x58] sm:$0xff] }
 0x5b5   :  { %6442 = vmatmul.bf16.vlgmr.msrb.gmra.mxu3 %v6234_v59  ;;  %6455 = vmatmul.bf16.vlgmr.msra.gmra.mxu0 %v6235_v9 }
 0x5b6   :  { %6538 = vmatpush.msra.mxu3 %v6521_v6  ;;  %6558 = vmatpush.msrb.mxu0 %v6537_v52 }
 0x5b7   :  { %6464 = vmatpush.bf16.msra.mxu1 %v9600_v44 }
 0x5b8   :  { %6480 = vmatpush.bf16.msra.mxu2 %v9640_v11  ;;  %6539 = vmatpush.msra.mxu3 %v6520_v7  ;;  %v6535_v11 = vld [vmem:[%s14167_s15 + $0xe8] sm:$0xff] }
 0x5b9   :  { %6559 = vmatpush.msrb.mxu0 %v6536_v16 }
 0x5ba   :  { %6540 = vmatpush.msra.mxu3 %v6519_v1 }
 0x5bb   :  { %6465 = vmatpush.bf16.msra.mxu1 %v9592_v12  ;;  %6481 = vmatmul.bf16.vlgmr.msra.gmra.mxu2 %v6235_v9  ;;  %v6514_v9 = vld [vmem:[%s14167_s15 + $0x40] sm:$0xff] }
 0x5bc   :  { %6541 = vmatpush.msra.mxu3 %v6518_v41  ;;  %6560 = vmatpush.msrb.mxu0 %v6535_v11 }
 0x5be   :  { %6542 = vmatpush.msra.mxu3 %v6517_v38 }
 0x5bf   :  { %6466 = vmatpush.bf16.msra.mxu1 %v9584_v50  ;;  %v6534_v50 = vld [vmem:[%s14167_s15 + $0xe0] sm:$0xff] }
 0x5c0   :  { %6543 = vmatpush.msra.mxu3 %v6516_v23  ;;  %6561 = vmatpush.msrb.mxu0 %v6534_v50  ;;  %v10458_v50 = vld [vmem:[%s14204_s0 + $0xe8] sm:$0xff] }
 0x5c2   :  { %6544 = vmatpush.msra.mxu3 %v6515_v48 }
 0x5c3   :  { %6467 = vmatpush.bf16.msra.mxu1 %v9576_v19  ;;  %v6533_v19 = vld [vmem:[%s14167_s15 + $0xd8] sm:$0xff] }
 0x5c4   :  { %6545 = vmatpush.msra.mxu3 %v6514_v9  ;;  %6562 = vmatpush.msrb.mxu0 %v6533_v19  ;;  %v10460_v19 = vld [vmem:[%s14204_s0 + $0xd8] sm:$0xff] }
 0x5c6   :  { %6468 = vmatmul.bf16.vlgmr.msra.gmra.mxu1 %v6234_v59  ;;  %6546 = vmatpush.msra.mxu3 %v6513_v14  ;;  %v10457_v14 = vld [vmem:[%s14204_s0 + $0xf0] sm:$0xff] }
 0x5c8   :  { %6547 = vmatpush.msra.mxu3 %v6512_v15  ;;  %v10459_v15 = vld [vmem:[%s14204_s0 + $0xe0] sm:$0xff] }
 0x5d1   :  { %v6042_v20 = vpop.f32.mrf.mxu0 }
 0x5d7   :  { %v6029_v53 = vpop.f32.mrf.mxu3 }
 0x5d8   :  { %v6030_v60 = vadd.f32 %v10421_v21, %v6029_v53  ;;  %v6511_v21 = vld [vmem:[%s14167_s15 + $0x28] sm:$0xff]  ;;  %v6532_v53 = vld [vmem:[%s14167_s15 + $0xd0] sm:$0xff] }
 0x5d9   :  { %v6044_v17 = vpop.f32.mrf.mxu0  ;;  %6548 = vmatpush.msra.mxu3 %v6511_v21  ;;  %6563 = vmatpush.msrb.mxu0 %v6532_v53  ;;  %v10462_v21 = vld [vmem:[%s14204_s0 + $0xc8] sm:$0xff]  ;;  %v10463_v53 = vld [vmem:[%s14204_s0 + $0xc0] sm:$0xff] }
 0x5da   :  { %v6043_v45 = vadd.f32 %v6042_v20, %v6030_v60  ;;  %v6510_v60 = vld [vmem:[%s14167_s15 + $0x20] sm:$0xff]  ;;  %v6531_v17 = vld [vmem:[%s14167_s15 + $0xc8] sm:$0xff] }
 0x5db   :  { %6549 = vmatpush.msra.mxu3 %v6510_v60  ;;  %6564 = vmatpush.msrb.mxu0 %v6531_v17  ;;  %v10464_v60 = vld [vmem:[%s14204_s0 + $0xb8] sm:$0xff] }
 0x5de   :  { %v6068_v22 = vpop.f32.mrf.mxu2 }
 0x5df   :  { %v6031_v25 = vpop.f32.mrf.mxu3 }
 0x5e0   :  { %v6530_v25 = vld [vmem:[%s14167_s15 + $0xc0] sm:$0xff] }
 0x5e1   :  { %v6055_v26 = vpop.f32.mrf.mxu1  ;;  %6565 = vmatpush.msrb.mxu0 %v6530_v25 }
 0x5e2   :  { %v6056_v18 = vadd.f32 %v6055_v26, %v6043_v45  ;;  %v6094_v40 = vpop.f32.mrf.mxu0  ;;  %v6508_v26 = vld [vmem:[%s14167_s15 + $0x10] sm:$0xff] }
 0x5e4   :  { %v6069_v27 = vadd.f32 %v6068_v22, %v6056_v18  ;;  %v6509_v22 = vld [vmem:[%s14167_s15 + $0x18] sm:$0xff] }
 0x5e5   :  { %6550 = vmatpush.msra.mxu3 %v6509_v22  ;;  %v6529_v18 = vld [vmem:[%s14167_s15 + $0xb8] sm:$0xff]  ;;  %v10465_v22 = vld [vmem:[%s14204_s0 + $0xb0] sm:$0xff] }
 0x5e6   :  { %v6070_v28 = vpop.f32.mrf.mxu2  ;;  %6566 = vmatpush.msrb.mxu0 %v6529_v18  ;;  %v10467_v18 = vld [vmem:[%s14204_s0 + $0xa0] sm:$0xff] }
 0x5e7   :  { %6551 = vmatpush.msra.mxu3 %v6508_v26  ;;  %v6528_v28 = vld [vmem:[%s14167_s15 + $0xb0] sm:$0xff]  ;;  %v10466_v26 = vld [vmem:[%s14204_s0 + $0xa8] sm:$0xff] }
 0x5e8   :  { %v6081_v29 = vpop.f32.mrf.mxu3  ;;  %6567 = vmatpush.msrb.mxu0 %v6528_v28 }
 0x5e9   :  { %v6082_v32 = vadd.f32 %v6081_v29, %v6069_v27  ;;  %v6057_v33 = vpop.f32.mrf.mxu1  ;;  %v6507_v27 = vld [vmem:[%s14167_s15 + $0x8] sm:$0xff] }
 0x5ea   :  { %v6096_v63 = vpop.f32.mrf.mxu0  ;;  %6552 = vmatpush.msra.mxu3 %v6507_v27  ;;  %v6527_v33 = vld [vmem:[%s14167_s15 + $0xa8] sm:$0xff]  ;;  %v10469_v27 = vld [vmem:[%s14204_s0 + $0x90] sm:$0xff] }
 0x5eb   :  { %v6095_v4 = vadd.f32 %v6094_v40, %v6082_v32  ;;  %v6268_v40 = vld [vmem:[%s14165_s13] sm:$0x3]  ;;  %6568 = vmatpush.msrb.mxu0 %v6527_v33 }
 0x5ec   :  { %v6506_v32 = vld [vmem:[%s14167_s15] sm:$0xff]  ;;  %v6270_v63 = vperm.slane %v6268_v40, 0 }
 0x5ed   :  { %6553 = vmatpush.msra.mxu3 %v6506_v32  ;;  %v10471_v33 = vld [vmem:[%s14204_s0 + $0x80] sm:$0xff] }
 0x5ee   :  { %v6120_v37 = vpop.f32.mrf.mxu2 }
 0x5f0   :  { %v6083_v39 = vpop.f32.mrf.mxu3 }
 0x5f1   :  { %v6107_v42 = vpop.f32.mrf.mxu1 }
 0x5f2   :  { %v6108_v43 = vadd.f32 %v6107_v42, %v6095_v4  ;;  %v6146_v30 = vpop.f32.mrf.mxu0  ;;  %v6526_v4 = vld [vmem:[%s14167_s15 + $0xa0] sm:$0xff]  ;;  %v6524_v42 = vld [vmem:[%s14167_s15 + $0x90] sm:$0xff] }
 0x5f3   :  { %6569 = vmatpush.msrb.mxu0 %v6526_v4  ;;  %v10472_v4 = vld [vmem:[%s14204_s0 + $0x78] sm:$0xff] }
 0x5f4   :  { %v6121_v46 = vadd.f32 %v6120_v37, %v6108_v43  ;;  %v6525_v37 = vld [vmem:[%s14167_s15 + $0x98] sm:$0xff] }
 0x5f5   :  { %6570 = vmatpush.msrb.mxu0 %v6525_v37  ;;  %v10473_v37 = vld [vmem:[%s14204_s0 + $0x70] sm:$0xff] }
 0x5f6   :  { %v6122_v51 = vpop.f32.mrf.mxu2 }
 0x5f7   :  { %6571 = vmatpush.msrb.mxu0 %v6524_v42  ;;  %v10475_v42 = vld [vmem:[%s14204_s0 + $0x60] sm:$0xff] }
 0x5f8   :  { %v6133_v54 = vpop.f32.mrf.mxu3 }
 0x5f9   :  { %v6134_v55 = vadd.f32 %v6133_v54, %v6121_v46  ;;  %v6109_v56 = vpop.f32.mrf.mxu1  ;;  %v6522_v54 = vld [vmem:[%s14167_s15 + $0x80] sm:$0xff] }
 0x5fa   :  { %v6148_v57 = vpop.f32.mrf.mxu0 }
 0x5fb   :  { %v6147_v58 = vadd.f32 %v6146_v30, %v6134_v55  ;;  %v6523_v30 = vld [vmem:[%s14167_s15 + $0x88] sm:$0xff] }
 0x5fc   :  { %6572 = vmatpush.msrb.mxu0 %v6523_v30  ;;  %v10477_v30 = vld [vmem:[%s14204_s0 + $0x50] sm:$0xff] }
 0x5fe   :  { %v6172_v62 = vpop.f32.mrf.mxu2  ;;  %6573 = vmatpush.msrb.mxu0 %v6522_v54  ;;  %v10480_v54 = vld [vmem:[%s14204_s0 + $0x38] sm:$0xff] }
 0x600   :  { %v6135_v0 = vpop.f32.mrf.mxu3 }
 0x605   :  { %v6159_v49 = vpop.f32.mrf.mxu1 }
 0x606   :  { %v6160_v2 = vadd.f32 %v6159_v49, %v6147_v58  ;;  %v6174_v5 = vpop.f32.mrf.mxu2  ;;  %v6271_v58 = vperm.slane %v6268_v40, 1  ;;  %v10468_v40 = vld [vmem:[%s14204_s0 + $0x98] sm:$0xff] }
 0x608   :  { %v6173_v3 = vadd.f32 %v6172_v62, %v6160_v2 }
 0x60d   :  { %v6161_v34 = vpop.f32.mrf.mxu1 }
 0x612   :  { %v6198_v24 = vpop.f32.mrf.mxu0 }
 0x618   :  { %v6185_v8 = vpop.f32.mrf.mxu3 }
 0x619   :  { %v6186_v31 = vadd.f32 %v6185_v8, %v6173_v3  ;;  %v6496_v8 = vld [vmem:[%s14166_s14] sm:$0x3] }
 0x61a   :  { %v6200_v47 = vpop.f32.mrf.mxu0  ;;  %v6498_v1 = vperm.slane %v6496_v8, 0  ;;  %v6499_v23 = vperm.slane %v6496_v8, 1  ;;  %v6683_v8 = vld [vmem:[#allocation10 + $0x18] sm:$0xff] }
 0x61b   :  { %v6199_v10 = vadd.f32 %v6198_v24, %v6186_v31  ;;  %6699 = vmatpush.msrb.mxu3 %v6683_v8 }
 0x61e   :  { %v6224_v44 = vpop.f32.mrf.mxu2 }
 0x620   :  { %v6187_v59 = vpop.f32.mrf.mxu3 }
 0x625   :  { %v6211_v12 = vpop.f32.mrf.mxu1 }
 0x626   :  { %v6212_v13 = vadd.f32 %v6211_v12, %v6199_v10  ;;  %v6226_v20 = vpop.f32.mrf.mxu2  ;;  %v6590_v12 = vld [vmem:[#allocation9 + $0x8] sm:$0xff] }
 0x627   :  { %6629 = vmatpush.msrb.mxu2 %v6590_v12  ;;  %v10461_v20 = vld [vmem:[%s14204_s0 + $0xd0] sm:$0xff] }
 0x628   :  { %v13909_v61 = vadd.f32 %v6224_v44, %v6212_v13  ;;  %v10456_v13 = vld [vmem:[%s14204_s0 + $0xf8] sm:$0xff]  ;;  %v6747_v12 = vld [vmem:[%s14172_s20 + $0x30] sm:$0xff] }
 0x629   :  { %6656 = vmatpush.msra.mxu2 %v10456_v13  ;;  %v6746_v13 = vld [vmem:[%s14172_s20 + $0x28] sm:$0xff] }
 0x62a   :  { %vm6228_vm6 = vcmp.gt.f32.partialorder %v13909_v61, 0.0 }
 0x62b   :  { %6657 = vmatpush.msra.mxu2 %v10457_v14  ;;  %v6744_v14 = vld [vmem:[%s14172_s20 + $0x18] sm:$0xff] }
 0x62d   :  { %v6213_v45 = vpop.f32.mrf.mxu1  ;;  %6658 = vmatpush.msra.mxu2 %v10458_v50  ;;  %v6743_v50 = vld [vmem:[%s14172_s20 + $0x10] sm:$0xff] }
 0x62f   :  { %6659 = vmatpush.msra.mxu2 %v10459_v15  ;;  %v6742_v15 = vld [vmem:[%s14172_s20 + $0x8] sm:$0xff] }
 0x631   :  { %6660 = vmatpush.msra.mxu2 %v10460_v19  ;;  %v6741_v19 = vld [vmem:[%s14172_s20] sm:$0xff] }
 0x632   :  { %v6456_v29 = vpop.f32.mrf.mxu0 }
 0x633   :  { %6661 = vmatpush.msra.mxu2 %v10461_v20 }
 0x635   :  { %6662 = vmatpush.msra.mxu2 %v10462_v21  ;;  %v10422_v21 = vld [vmem:[%s14171_s19] ss:$0 sm:$0xff] }
 0x637   :  { %6663 = vmatpush.msra.mxu2 %v10463_v53 }
 0x638   :  { %v6443_v39 = vpop.f32.mrf.mxu3 }
 0x639   :  { %v6444_v43 = vadd.f32 %v6443_v39, %v6270_v63  ;;  %6664 = vmatpush.msra.mxu2 %v10464_v60  ;;  %v6589_v63 = vld [vmem:[#allocation9] sm:$0xff] }
 0x63a   :  { %v6458_v51 = vpop.f32.mrf.mxu0  ;;  %6609 = vmatpush.msrb.mxu1 %v6589_v63  ;;  %v10474_v39 = vld [vmem:[%s14204_s0 + $0x68] sm:$0xff] }
 0x63b   :  { %v6457_v46 = vadd.f32 %v6456_v29, %v6444_v43  ;;  %6665 = vmatpush.msra.mxu2 %v10465_v22  ;;  %v10470_v29 = vld [vmem:[%s14204_s0 + $0x88] sm:$0xff]  ;;  %v10476_v43 = vld [vmem:[%s14204_s0 + $0x58] sm:$0xff]  ;;  %v10479_v51 = vld [vmem:[%s14204_s0 + $0x40] sm:$0xff] }
 0x63c   :  { %6636 = vmatpush.msra.mxu1 %v10472_v4 }
 0x63d   :  { %v6486_v55 = vsub.f32 0.0, %v6457_v46  ;;  %6666 = vmatpush.msra.mxu2 %v10466_v26  ;;  %v10478_v46 = vld [vmem:[%s14204_s0 + $0x48] sm:$0xff] }
 0x63e   :  { %v6482_v56 = vpop.f32.mrf.mxu2  ;;  %6637 = vmatpush.msra.mxu1 %v10473_v37 }
 0x63f   :  { %v6488_v57 = vmul.f32 1.442695, %v6486_v55  ;;  %6667 = vmatpush.msra.mxu2 %v10467_v18  ;;  %v10481_v55 = vld [vmem:[%s14204_s0 + $0x30] sm:$0xff] }
 0x640   :  { %v6445_v62 = vpop.f32.mrf.mxu3  ;;  %6638 = vmatpush.msra.mxu1 %v10474_v39 }
 0x641   :  { %10436 = vpow2.f32 %v6488_v57  ;;  %6668 = vmatpush.msra.mxu2 %v10468_v40  ;;  %v10484_v62 = vld [vmem:[%s14204_s0 + $0x18] sm:$0xff] }
 0x642   :  { %6639 = vmatpush.msra.mxu1 %v10475_v42  ;;  %v6785_v40 = vld [vmem:[%s14174_s22 + $0x18] sm:$0xff] }
 0x643   :  { %v6469_v0 = vpop.f32.mrf.mxu1  ;;  %6669 = vmatpush.msra.mxu2 %v10469_v27  ;;  %v6784_v27 = vld [vmem:[%s14174_s22 + $0x10] sm:$0xff] }
 0x644   :  { %v6470_v49 = vadd.f32 %v6469_v0, %v6271_v58  ;;  %6640 = vmatpush.msra.mxu1 %v10476_v43  ;;  %v10483_v58 = vld [vmem:[%s14204_s0 + $0x20] sm:$0xff]  ;;  %v10485_v0 = vld [vmem:[%s14204_s0 + $0x10] sm:$0xff] }
 0x645   :  { %6670 = vmatpush.msra.mxu2 %v10470_v29  ;;  %v6782_v29 = vld [vmem:[%s14174_s22] sm:$0xff] }
 0x646   :  { %v6483_v2 = vadd.f32 %v6482_v56, %v6470_v49  ;;  %v6484_v3 = vpop.f32.mrf.mxu2  ;;  %6641 = vmatpush.msra.mxu1 %v10477_v30  ;;  %v10482_v56 = vld [vmem:[%s14204_s0 + $0x28] sm:$0xff] }
 0x647   :  { %v10437_v5 = vpop.eup %10436  ;;  %6671 = vmatpush.msra.mxu2 %v10471_v33  ;;  %v10486_v49 = vld [vmem:[%s14204_s0 + $0x8] sm:$0xff] }
 0x648   :  { %v6487_v34 = vsub.f32 0.0, %v6483_v2  ;;  %v6492_v24 = vadd.f32 1.0, %v10437_v5  ;;  %6642 = vmatpush.msra.mxu1 %v10478_v46  ;;  %v10487_v5 = vld [vmem:[%s14204_s0] sm:$0xff]  ;;  %v6820_v30 = vld [vmem:[%s14176_s24 + $0x8] sm:$0xff] }
 0x649   :  { %v6819_v46 = vld [vmem:[%s14176_s24] sm:$0xff] }
 0x64a   :  { %v6490_v6 = vmul.f32 1.442695, %v6487_v34  ;;  %10438 = vrcp.f32 %v6492_v24  ;;  %6643 = vmatpush.msra.mxu1 %v10479_v51  ;;  %v10424_v51 = vld [vmem:[%s14175_s23] ss:$0 sm:$0xff] }
 0x64b   :  { %v6471_v7 = vpop.f32.mrf.mxu1 }
 0x64c   :  { %10440 = vpow2.f32 %v6490_v6  ;;  %6644 = vmatpush.msra.mxu1 %v10480_v54 }
 0x64e   :  { %6645 = vmatpush.msra.mxu1 %v10481_v55 }
 0x650   :  { %v10439_v31 = vpop.eup %10438  ;;  %6646 = vmatpush.msra.mxu1 %v10482_v56 }
 0x651   :  { %v6502_v47 = vadd.f32 %v10439_v31, %v6498_v1  ;;  %v6682_v1 = vld [vmem:[#allocation10 + $0x10] sm:$0xff]  ;;  %v6681_v31 = vld [vmem:[#allocation10 + $0x8] sm:$0xff] }
 0x652   :  { %v10441_v41 = vpop.eup %10440  ;;  %6647 = vmatpush.msra.mxu1 %v10483_v58  ;;  %6700 = vmatpush.msrb.mxu3 %v6682_v1 }
 0x653   :  { %v6493_v10 = vadd.f32 1.0, %v10441_v41  ;;  %v6504_v38 = vmax.f32 %v6502_v47, 0.0  ;;  %v6680_v41 = vld [vmem:[#allocation10] sm:$0xff] }
 0x654   :  { %6648 = vmatpush.msra.mxu1 %v10484_v62  ;;  %6701 = vmatpush.msrb.mxu3 %v6681_v31  ;;  %v6679_v47 = vld [vmem:[%s14169_s17 + $0x18] sm:$0xff] }
 0x655   :  { %10442 = vrcp.f32 %v6493_v10  ;;  %6554 = vmatmul.f32.vlgmr.msra.gmra.mxu3 %v6504_v38  ;;  %v6676_v10 = vld [vmem:[%s14169_s17] sm:$0xff]  ;;  %v6229_v38 = vmin.f32 %v13909_v61, 0.0 }
 0x656   :  { %6649 = vmatpush.msra.mxu1 %v10485_v0  ;;  %6702 = vmatpush.msrb.mxu3 %v6680_v41 }
 0x658   :  { %6650 = vmatpush.msra.mxu1 %v10486_v49  ;;  %6722 = vmatpush.msra.mxu3 %v6679_v47  ;;  %v10425_v49 = vld [vmem:[%s14211_s9] ss:$0 sm:$0xff] }
 0x65a   :  { %6651 = vmatpush.msra.mxu1 %v10487_v5 }
 0x65b   :  { %v10443_v52 = vpop.eup %10442 }
 0x65c   :  { %v6503_v44 = vadd.f32 %v10443_v52, %v6499_v23  ;;  %v6230_v23 = vmul.f32 1.442695, %v6229_v38 }
 0x65e   :  { %v6505_v59 = vmax.f32 %v6503_v44, 0.0 }
 0x660   :  { %6574 = vmatmul.f32.vlgmr.msrb.gmra.mxu0 %v6505_v59 }
 0x6d8   :  { %v6555_v48 = vpop.f32.mrf.mxu3 }
 0x6dd   :  { %v6575_v16 = vpop.f32.mrf.mxu0 }
 0x6de   :  { %v6576_v9 = vadd.f32 %v6575_v16, %v6555_v48 }
 0x6e0   :  { %v6578_v11 = vsel %vm175_vm0, %v6576_v9, -inf }
 0x6e1   :  { %6579 = vmax.xlane.f32.xlu0 %v6578_v11  ;;  %v6748_v11 = vld [vmem:[%s14172_s20 + $0x38] sm:$0xff] }
 0x6e2   :  { %6764 = vmatpush.msra.mxu0 %v6748_v11 }
 0x6e4   :  { %6765 = vmatpush.msra.mxu0 %v6747_v12 }
 0x6e6   :  { %6766 = vmatpush.msra.mxu0 %v6746_v13 }
 0x754   :  { %v6580_v17 = vpop.xlane.xlu0 %6579 }
 0x755   :  { %v6581_v45 = vsub.f32 %v6576_v9, %v6580_v17 }
 0x757   :  { %v6582_v25 = vmul.f32 1.442695, %v6581_v45 }
 0x759   :  { %10444 = vpow2.f32 %v6582_v25 }
 0x75f   :  { %v10445_v28 = vpop.eup %10444 }
 0x760   :  { %v6584_v32 = vsel %vm175_vm0, %v10445_v28, 0.0 }
 0x761   :  { %6585 = vadd.xlane.f32.xlu0 %v6584_v32  ;;  %v10423_v32 = vld [vmem:[%s14173_s21] ss:$0 sm:$0xff] }
 0x7d4   :  { %v6586_v57 = vpop.xlane.xlu0 %6585 }
 0x7d5   :  { %10446 = vrcp.f32 %v6586_v57 }
 0x7d6   :  { %10448 = vpow2.f32 %v6230_v23 }
 0x7db   :  { %v10447_v2 = vpop.eup %10446 }
 0x7dc   :  { %v6588_v3 = vmul.f32 %v10447_v2, %v10445_v28  ;;  %v10449_v48 = vpop.eup %10448  ;;  %v6783_v28 = vld [vmem:[%s14174_s22 + $0x8] sm:$0xff] }
 0x7dd   :  { %v9568_v16 = vadd.f32 -1.0, %v10449_v48 }
 0x7de   :  { %9697 = vmatmul.msk.f32.vlgmr.msrb.gmra.mxu1 %vm175_vm0, %v6588_v3  ;;  %9698 = vmatmul.msk.f32.vlgmr.msrb.gmra.mxu2 %vm175_vm0, %v6588_v3 }
 0x7df   :  { %v6233_v9 = vsel %vm6228_vm6, %v13909_v61, %v9568_v16  ;;  %v6745_v61 = vld [vmem:[%s14172_s20 + $0x20] sm:$0xff] }
 0x7e0   :  { %6767 = vmatpush.msra.mxu0 %v6745_v61 }
 0x7e2   :  { %6768 = vmatpush.msra.mxu0 %v6744_v14 }
 0x7e4   :  { %6769 = vmatpush.msra.mxu0 %v6743_v50 }
 0x7e6   :  { %6770 = vmatpush.msra.mxu0 %v6742_v15 }
 0x7e8   :  { %6771 = vmatpush.msra.mxu0 %v6741_v19 }
 0x85b   :  { %v6611_v34 = vpop.f32.mrf.mxu1 }
 0x85c   :  { %v6634_v24 = vmul.f32 %v6611_v34, %v10916_v35  ;;  %v6678_v35 = vld [vmem:[%s14169_s17 + $0x10] sm:$0xff] }
 0x85d   :  { %6723 = vmatpush.msra.mxu3 %v6678_v35 }
 0x85e   :  { %6652 = vmatmul.f32.vlgmr.msra.gmra.mxu1 %v6634_v24 }
 0x861   :  { %v6631_v6 = vpop.f32.mrf.mxu2 }
 0x862   :  { %v6635_v7 = vmul.f32 %v6631_v6, %v10918_v36  ;;  %v6677_v36 = vld [vmem:[%s14169_s17 + $0x8] sm:$0xff] }
 0x863   :  { %6724 = vmatpush.msra.mxu3 %v6677_v36 }
 0x864   :  { %6672 = vmatmul.f32.vlgmr.msra.gmra.mxu2 %v6635_v7 }
 0x865   :  { %6725 = vmatpush.msra.mxu3 %v6676_v10 }
 0x8db   :  { %v6653_v52 = vpop.f32.mrf.mxu1 }
 0x8e7   :  { %v6673_v44 = vpop.f32.mrf.mxu2 }
 0x8e8   :  { %v6674_v59 = vadd.f32 %v6673_v44, %v6653_v52 }
 0x8ea   :  { %9699 = vmatmul.msk.f32.vlgmr.msrb.gmra.mxu3 %vm311_vm2, %v6674_v59 }
 0x8eb   :  { %6805 = vmatpush.msrb.mxu3 %v6785_v40 }
 0x8ed   :  { %6806 = vmatpush.msrb.mxu3 %v6784_v27 }
 0x8ef   :  { %6807 = vmatpush.msrb.mxu3 %v6783_v28 }
 0x8f1   :  { %6808 = vmatpush.msrb.mxu3 %v6782_v29 }
 0x8f2   :  { %9700 = vmatmul.msk.f32.vlgmr.msra.gmra.mxu3 %vm311_vm2, %v6233_v9 }
 0x8f3   :  { %6843 = vmatpush.msra.mxu3 %v6820_v30 }
 0x8f5   :  { %6844 = vmatpush.msra.mxu3 %v6819_v46 }
 0x96d   :  { %v6704_v20 = vpop.f32.mrf.mxu3 }
 0x975   :  { %v6727_v53 = vpop.f32.mrf.mxu3 }
 0x976   :  { %v6728_v60 = vadd.f32 %v6727_v53, %v6704_v20 }
 0x978   :  { %v6734_v17 = vadd.f32 %v10422_v21, %v6728_v60 }
 0x97a   :  { %v6736_v45 = vmin.f32 %v6734_v17, 0.0  ;;  %vm6735_vm7 = vcmp.gt.f32.partialorder %v6734_v17, 0.0 }
 0x97c   :  { %v6737_v22 = vmul.f32 1.442695, %v6736_v45 }
 0x97e   :  { %10450 = vpow2.f32 %v6737_v22 }
 0x984   :  { %v10451_v25 = vpop.eup %10450 }
 0x985   :  { %v9701_v26 = vadd.f32 -1.0, %v10451_v25 }
 0x987   :  { %v6740_v18 = vsel %vm6735_vm7, %v6734_v17, %v9701_v26 }
 0x988   :  { %9702 = vmatmul.msk.f32.vlgmr.msra.gmra.mxu0 %vm4338_vm5, %v6740_v18 }
 0xa05   :  { %v6773_v33 = vpop.f32.mrf.mxu0 }
 0xa06   :  { %v6774_v63 = vadd.f32 %v10423_v32, %v6773_v33 }
 0xa08   :  { %v6777_v4 = vmin.f32 %v6774_v63, 0.0  ;;  %vm6776_vm8 = vcmp.gt.f32.partialorder %v6774_v63, 0.0 }
 0xa0a   :  { %v6778_v37 = vmul.f32 1.442695, %v6777_v4 }
 0xa0c   :  { %10452 = vpow2.f32 %v6778_v37 }
 0xa12   :  { %v10453_v39 = vpop.eup %10452 }
 0xa13   :  { %v9703_v42 = vadd.f32 -1.0, %v10453_v39 }
 0xa15   :  { %v6781_v43 = vsel %vm6776_vm8, %v6774_v63, %v9703_v42 }
 0xa16   :  { %9704 = vmatmul.msk.f32.vlgmr.msrb.gmra.mxu3 %vm311_vm2, %v6781_v43 }
 0xa99   :  { %v6810_v54 = vpop.f32.mrf.mxu3 }
 0xa9a   :  { %v6811_v55 = vadd.f32 %v10424_v51, %v6810_v54 }
 0xa9c   :  { %v6814_v56 = vmin.f32 %v6811_v55, 0.0  ;;  %vm6813_vm10 = vcmp.gt.f32.partialorder %v6811_v55, 0.0 }
 0xa9e   :  { %v6815_v57 = vmul.f32 1.442695, %v6814_v56 }
 0xaa0   :  { %10454 = vpow2.f32 %v6815_v57 }
 0xaa6   :  { %v10455_v58 = vpop.eup %10454 }
 0xaa7   :  { %v9705_v62 = vadd.f32 -1.0, %v10455_v58 }
 0xaa9   :  { %v6818_v0 = vsel %vm6813_vm10, %v6811_v55, %v9705_v62 }
 0xaaa   :  { %9706 = vmatmul.msk.f32.vlgmr.msra.gmra.mxu3 %vm6825_vm9, %v6818_v0 }
 0xb2d   :  { %v6846_v2 = vpop.f32.mrf.mxu3 }
 0xb2e   :  { %v6847_v3 = vadd.f32 %v10425_v49, %v6846_v2 }
 0xb30   :  { %6850 = vst.msk [vmem:[%s14212_s10] sm:$0xff] %vm6849_vm11, %v6847_v3 }
 0xb31   :  { %6855 = vsyncpa [#allocation3], 1 }
 0xb32   :  { %6856 = vsyncpa [#allocation5], 1 }
 0xb33   :  { %6857 = vsyncpa [#allocation8], 1 }
 0xb34   :  { %6858 = vsyncpa [#allocation11], 1 }

</bundles_post_ra>
